<compile_context>
chip_gen: v6e
topology: v6e:2x2x1
jax: 0.10.0
libtpu: 0.0.40
codegen_flags: <defaults>
</compile_context>

<pallas_src>
import functools

import numpy as np
import jax
import jax.numpy as jnp
from jax import lax
from jax.experimental import pallas as pl
from jax.experimental.pallas import tpu as pltpu


# ----------------------------------------------------------------------------
# Hyper-parameters (PyTorch module defaults; small nfilters / signal for test)
# ----------------------------------------------------------------------------
NFILTERS      = 8
SAMPLERATE    = 16000
WLEN          = 25
WSTRIDE       = 10
WINDOW_SIZE   = SAMPLERATE * WLEN // 1000 + 1        # 401
WINDOW_STRIDE = SAMPLERATE * WSTRIDE // 1000         # 160
PADDING       = (WINDOW_SIZE - 1) // 2               # 200
K_PAD         = ((WINDOW_SIZE + 127) // 128) * 128   # 512 lane-aligned taps
NK            = K_PAD // 128                         # 4 K-blocks of 128 taps


def _round_up(x, m):
    return ((x + m - 1) // m) * m


def _tdfbanks_kernel(sig_ref, w_ref, lp_ref, out_ref, *, nf, fb, tm):
    """One grid step = one independent block of `fb` output frames.

    sig_ref : [1, 8, L]    signal span of this block; row b = signal shifted
                           by b samples (8 sublane phases, prebuilt host-side)
    w_ref   : [2nf, K_PAD] fused real+imag Gabor banks (bf16, zero padded)
    lp_ref  : [nf, K_PAD]  depthwise low-pass taps (f32, zero padded)
    out_ref : [1, fb, nf]  log-compressed filterbank frames of this block
    """
    # ---- build the tap-shift matrix S[r, t] = sig[t + r], r in [0, 128) ----
    # log2 doubling: 8 -> 16 -> 32 -> 64 -> 128 rows; every concat is along
    # sublanes with multiple-of-8 row counts, lane slices are static.
    cur = sig_ref[0]                              # [8, L] f32, cur[r,t]=sig[t+r]
    width = cur.shape[1]
    shift = 8
    while cur.shape[0] < 128:
        width -= shift
        cur = jnp.concatenate(
            [cur[:, :width], cur[:, shift:shift + width]], axis=0)
        shift *= 2
    s_bf = cur.astype(jnp.bfloat16)               # MXU operand, f32 accum below

    # ---- complex conv: fused [2nf, K] weight, K blocked into 128-tap dots ---
    w = w_ref[...]                                # [2nf, K_PAD] bf16
    acc = None
    for j in range(NK):
        part = jnp.dot(w[:, 128 * j:128 * (j + 1)],
                       s_bf[:, 128 * j:128 * j + tm],
                       preferred_element_type=jnp.float32)   # [2nf, tm] f32
        acc = part if acc is None else acc + part

    # ---- squared modulus (channels on sublanes, time on lanes) --------------
    yr = acc[:nf, :]
    yi = acc[nf:, :]
    modsq = yr * yr + yi * yi                     # [nf, tm] f32

    # ---- depthwise low-pass (stride 160), abs, +1, log ----------------------
    lp = lp_ref[...]                              # [nf, K_PAD] f32
    rows = []
    for f in range(fb):                           # static unroll over block
        win = modsq[:, f * WINDOW_STRIDE:f * WINDOW_STRIDE + K_PAD]
        rows.append(jnp.sum(win * lp, axis=1)[None, :])      # [1, nf]
    res = jnp.concatenate(rows, axis=0)                      # [fb, nf]
    out_ref[0] = jnp.log(jnp.abs(res) + 1.0)


def tdfbanks_forward(x, wc_torch, lp_torch, *, frames_per_block=8):
    """x: any shape (flattened to one signal, as in x.view(1,1,-1)).
    wc_torch: [2*nf, 1, W] complex_conv weight (torch layout, real/imag interleaved)
    lp_torch: [nf, 1, W]   lowpass depthwise weight (torch layout)
    returns:  (1, nf, n_frames) float32, matching the PyTorch module output."""
    nf = lp_torch.shape[0]
    assert wc_torch.shape[0] == 2 * nf and wc_torch.shape[-1] == WINDOW_SIZE

    xflat = jnp.reshape(x, (-1,)).astype(jnp.float32)
    t0 = xflat.shape[0]
    n_frames = (t0 - WINDOW_SIZE) // WINDOW_STRIDE + 1
    assert n_frames >= 1

    fb = frames_per_block
    n_blocks = -(-n_frames // fb)                            # ceil, ragged tail ok
    tm = _round_up((fb - 1) * WINDOW_STRIDE + K_PAD, 128)    # modsq lanes / block
    l_sig = tm + K_PAD                                       # signal lanes / block

    # Zero-padded signal (Conv1d padding=200) plus extra zeros so every block
    # slice is in bounds.  The extra zeros only hit zero-weight taps or frames
    # that are cropped away, so they never change a valid output.
    xpad = jnp.pad(xflat, (PADDING, PADDING))
    total = (n_blocks - 1) * fb * WINDOW_STRIDE + l_sig + 8
    xpad = jnp.pad(xpad, (0, max(0, total - xpad.shape[0])))

    # Per-block signal spans with 8 sublane phases (glue, ~12x total signal
    # bytes vs. 401x for full im2col):  sigblocks[i, b, t] = xpad[i*fb*160+b+t]
    starts = jnp.arange(n_blocks) * (fb * WINDOW_STRIDE)
    idx = (starts[:, None, None]
           + jnp.arange(8)[None, :, None]
           + jnp.arange(l_sig)[None, None, :])
    sigblocks = xpad[idx]                                    # [n_blocks, 8, l_sig]

    # Weight plumbing (glue): fused real+imag bank for the MXU (bf16),
    # low-pass taps for the VPU (f32), both zero padded to K_PAD taps.
    wr = wc_torch[0::2, 0, :]
    wi = wc_torch[1::2, 0, :]
    wfull = jnp.concatenate([wr, wi], axis=0).astype(jnp.float32)
    wfull = jnp.pad(wfull, ((0, 0), (0, K_PAD - WINDOW_SIZE)))
    wfull = wfull.astype(jnp.bfloat16)                       # [2nf, K_PAD]
    lp = jnp.pad(lp_torch[:, 0, :].astype(jnp.float32),
                 ((0, 0), (0, K_PAD - WINDOW_SIZE)))         # [nf, K_PAD]

    kernel = functools.partial(_tdfbanks_kernel, nf=nf, fb=fb, tm=tm)
    out = pl.pallas_call(
        kernel,
        out_shape=jax.ShapeDtypeStruct((n_blocks, fb, nf), jnp.float32),
        grid_spec=pltpu.PrefetchScalarGridSpec(
            num_scalar_prefetch=0,
            grid=(n_blocks,),
            in_specs=[
                pl.BlockSpec((1, 8, l_sig), lambda i: (i, 0, 0)),
                pl.BlockSpec((2 * nf, K_PAD), lambda i: (0, 0)),
                pl.BlockSpec((nf, K_PAD), lambda i: (0, 0)),
            ],
            out_specs=pl.BlockSpec((1, fb, nf), lambda i: (i, 0, 0)),
        ),
        compiler_params=pltpu.CompilerParams(
            dimension_semantics=("parallel",)),
    )(sigblocks, wfull, lp)

    out = out.reshape(n_blocks * fb, nf)[:n_frames]          # [n_frames, nf]
    return jnp.transpose(out)[None, :, :]                    # (1, nf, n_frames)


def ref_forward(x, wc_torch, lp_torch):
    """Pure-JAX reference replicating the PyTorch forward exactly (f32)."""
    xr = jnp.reshape(x, (1, 1, -1)).astype(jnp.float32)
    y = lax.conv_general_dilated(
        xr, wc_torch, window_strides=(1,), padding=[(PADDING, PADDING)],
        dimension_numbers=('NCH', 'OIH', 'NCH'))[0]          # [2*nf, T]
    # transpose + avg_pool1d(x^2, 2, 2) * 2 + transpose  ==  squared modulus
    modsq = y[0::2] ** 2 + y[1::2] ** 2                      # [nf, T]
    out = lax.conv_general_dilated(
        modsq[None], lp_torch, window_strides=(WINDOW_STRIDE,),
        padding=[(0, 0)], feature_group_count=lp_torch.shape[0],
        dimension_numbers=('NCH', 'OIH', 'NCH'))             # [1, nf, F]
    return jnp.log(jnp.abs(out) + 1.0)


if __name__ == "__main__":
    key = jax.random.PRNGKey(0)
    k_sig, k_w = jax.random.split(key)

    T0 = 4000                                    # 0.25 s of 16 kHz audio
    x = jax.random.normal(k_sig, (1, T0), dtype=jnp.float32)

    # Deterministic synthetic "Gabor" filterbank (stands in for melfilters.Gabor)
    wc = jax.random.normal(k_w, (2 * NFILTERS, 1, WINDOW_SIZE), dtype=jnp.float32)
    wc = wc / jnp.sqrt(jnp.float32(WINDOW_SIZE))
    # Low-pass init: normalized Hanning window shared across channels
    n = jnp.arange(WINDOW_SIZE, dtype=jnp.float32)
    hann = 0.5 - 0.5 * jnp.cos(2.0 * jnp.pi * n / (WINDOW_SIZE - 1))
    hann = hann / jnp.sum(hann)
    lp = jnp.broadcast_to(hann, (NFILTERS, 1, WINDOW_SIZE)).astype(jnp.float32)

    out = jax.block_until_ready(tdfbanks_forward(x, wc, lp))
    ref = jax.block_until_ready(ref_forward(x, wc, lp))

    n_frames = (T0 - WINDOW_SIZE) // WINDOW_STRIDE + 1       # 23
    assert out.shape == (1, NFILTERS, n_frames), out.shape
    # bf16 MXU operands (f32 accumulation) vs. f32 reference -> loose-ish tol
    np.testing.assert_allclose(np.asarray(out), np.asarray(ref),
                               rtol=5e-2, atol=2e-2)
    print("KERNEL_OK")
</pallas_src>

<mosaic_0001>
module attributes {stable_mosaic.version = 11 : i64} {
  func.func @_tdfbanks_kernel(%arg0: i32, %arg1: memref<1x8x2176xf32, #tpu.memory_space<vmem>>, %arg2: memref<16x512xbf16, #tpu.memory_space<vmem>>, %arg3: memref<8x512xf32, #tpu.memory_space<vmem>>, %arg4: memref<1x8x8xf32, #tpu.memory_space<vmem>>) attributes {dimension_semantics = [#tpu.dimension_semantics<parallel>], iteration_bounds = array<i64: 3>, scalar_prefetch = 0 : i64, scratch_operands = 0 : i64, tpu.core_type = #tpu.core_type<tc>, window_params = [{transform_indices = @transform_0, window_bounds = array<i64: 1, 8, 2176>}, {pipeline_mode = #tpu.pipeline_mode<synchronous>, transform_indices = @transform_1, window_bounds = array<i64: 16, 512>}, {pipeline_mode = #tpu.pipeline_mode<synchronous>, transform_indices = @transform_2, window_bounds = array<i64: 8, 512>}, {transform_indices = @transform_3, window_bounds = array<i64: 1, 8, 8>}]} {
    %c0 = arith.constant 0 : index
    %c0_0 = arith.constant 0 : index
    %c0_1 = arith.constant 0 : index
    %0 = vector.load %arg1[%c0, %c0_0, %c0_1] : memref<1x8x2176xf32, #tpu.memory_space<vmem>>, vector<1x8x2176xf32>
    %1 = vector.shape_cast %0 : vector<1x8x2176xf32> to vector<8x2176xf32>
    %2 = vector.extract_strided_slice %1 {offsets = [0, 0], sizes = [8, 2168], strides = [1, 1]} : vector<8x2176xf32> to vector<8x2168xf32>
    %3 = vector.extract_strided_slice %1 {offsets = [0, 8], sizes = [8, 2168], strides = [1, 1]} : vector<8x2176xf32> to vector<8x2168xf32>
    %4 = tpu.concatenate %2, %3 in 0 : vector<8x2168xf32>, vector<8x2168xf32> -> vector<16x2168xf32>
    %5 = vector.extract_strided_slice %4 {offsets = [0, 0], sizes = [16, 2152], strides = [1, 1]} : vector<16x2168xf32> to vector<16x2152xf32>
    %6 = vector.extract_strided_slice %4 {offsets = [0, 16], sizes = [16, 2152], strides = [1, 1]} : vector<16x2168xf32> to vector<16x2152xf32>
    %7 = tpu.concatenate %5, %6 in 0 : vector<16x2152xf32>, vector<16x2152xf32> -> vector<32x2152xf32>
    %8 = vector.extract_strided_slice %7 {offsets = [0, 0], sizes = [32, 2120], strides = [1, 1]} : vector<32x2152xf32> to vector<32x2120xf32>
    %9 = vector.extract_strided_slice %7 {offsets = [0, 32], sizes = [32, 2120], strides = [1, 1]} : vector<32x2152xf32> to vector<32x2120xf32>
    %10 = tpu.concatenate %8, %9 in 0 : vector<32x2120xf32>, vector<32x2120xf32> -> vector<64x2120xf32>
    %11 = vector.extract_strided_slice %10 {offsets = [0, 0], sizes = [64, 2056], strides = [1, 1]} : vector<64x2120xf32> to vector<64x2056xf32>
    %12 = vector.extract_strided_slice %10 {offsets = [0, 64], sizes = [64, 2056], strides = [1, 1]} : vector<64x2120xf32> to vector<64x2056xf32>
    %13 = tpu.concatenate %11, %12 in 0 : vector<64x2056xf32>, vector<64x2056xf32> -> vector<128x2056xf32>
    %14 = arith.truncf %13 : vector<128x2056xf32> to vector<128x2056xbf16>
    %c0_2 = arith.constant 0 : index
    %c0_3 = arith.constant 0 : index
    %15 = vector.load %arg2[%c0_2, %c0_3] : memref<16x512xbf16, #tpu.memory_space<vmem>>, vector<16x512xbf16>
    %16 = vector.extract_strided_slice %15 {offsets = [0, 0], sizes = [16, 128], strides = [1, 1]} : vector<16x512xbf16> to vector<16x128xbf16>
    %17 = vector.extract_strided_slice %14 {offsets = [0, 0], sizes = [128, 1664], strides = [1, 1]} : vector<128x2056xbf16> to vector<128x1664xbf16>
    %cst = arith.constant dense<0.000000e+00> : vector<16x1664xf32>
    %18 = tpu.matmul %16, %17, %cst {dimension_numbers = #tpu.dot_dimension_numbers<[1], [0], [0], [1], [0, 0, 1, 1], [], []>} : vector<16x128xbf16>, vector<128x1664xbf16>, vector<16x1664xf32> -> vector<16x1664xf32>
    %19 = vector.extract_strided_slice %15 {offsets = [0, 128], sizes = [16, 128], strides = [1, 1]} : vector<16x512xbf16> to vector<16x128xbf16>
    %20 = vector.extract_strided_slice %14 {offsets = [0, 128], sizes = [128, 1664], strides = [1, 1]} : vector<128x2056xbf16> to vector<128x1664xbf16>
    %cst_4 = arith.constant dense<0.000000e+00> : vector<16x1664xf32>
    %21 = tpu.matmul %19, %20, %cst_4 {dimension_numbers = #tpu.dot_dimension_numbers<[1], [0], [0], [1], [0, 0, 1, 1], [], []>} : vector<16x128xbf16>, vector<128x1664xbf16>, vector<16x1664xf32> -> vector<16x1664xf32>
    %22 = arith.addf %18, %21 : vector<16x1664xf32>
    %23 = vector.extract_strided_slice %15 {offsets = [0, 256], sizes = [16, 128], strides = [1, 1]} : vector<16x512xbf16> to vector<16x128xbf16>
    %24 = vector.extract_strided_slice %14 {offsets = [0, 256], sizes = [128, 1664], strides = [1, 1]} : vector<128x2056xbf16> to vector<128x1664xbf16>
    %cst_5 = arith.constant dense<0.000000e+00> : vector<16x1664xf32>
    %25 = tpu.matmul %23, %24, %cst_5 {dimension_numbers = #tpu.dot_dimension_numbers<[1], [0], [0], [1], [0, 0, 1, 1], [], []>} : vector<16x128xbf16>, vector<128x1664xbf16>, vector<16x1664xf32> -> vector<16x1664xf32>
    %26 = arith.addf %22, %25 : vector<16x1664xf32>
    %27 = vector.extract_strided_slice %15 {offsets = [0, 384], sizes = [16, 128], strides = [1, 1]} : vector<16x512xbf16> to vector<16x128xbf16>
    %28 = vector.extract_strided_slice %14 {offsets = [0, 384], sizes = [128, 1664], strides = [1, 1]} : vector<128x2056xbf16> to vector<128x1664xbf16>
    %cst_6 = arith.constant dense<0.000000e+00> : vector<16x1664xf32>
    %29 = tpu.matmul %27, %28, %cst_6 {dimension_numbers = #tpu.dot_dimension_numbers<[1], [0], [0], [1], [0, 0, 1, 1], [], []>} : vector<16x128xbf16>, vector<128x1664xbf16>, vector<16x1664xf32> -> vector<16x1664xf32>
    %30 = arith.addf %26, %29 : vector<16x1664xf32>
    %31 = vector.extract_strided_slice %30 {offsets = [0, 0], sizes = [8, 1664], strides = [1, 1]} : vector<16x1664xf32> to vector<8x1664xf32>
    %32 = vector.extract_strided_slice %30 {offsets = [8, 0], sizes = [8, 1664], strides = [1, 1]} : vector<16x1664xf32> to vector<8x1664xf32>
    %33 = arith.mulf %31, %31 : vector<8x1664xf32>
    %34 = arith.mulf %32, %32 : vector<8x1664xf32>
    %35 = arith.addf %33, %34 : vector<8x1664xf32>
    %c0_7 = arith.constant 0 : index
    %c0_8 = arith.constant 0 : index
    %36 = vector.load %arg3[%c0_7, %c0_8] : memref<8x512xf32, #tpu.memory_space<vmem>>, vector<8x512xf32>
    %37 = vector.extract_strided_slice %35 {offsets = [0, 0], sizes = [8, 512], strides = [1, 1]} : vector<8x1664xf32> to vector<8x512xf32>
    %38 = arith.mulf %37, %36 : vector<8x512xf32>
    %cst_9 = arith.constant dense<0.000000e+00> : vector<8xf32>
    %39 = vector.multi_reduction <add>, %38, %cst_9 [1] : vector<8x512xf32> to vector<8xf32>
    %40 = vector.shape_cast %39 : vector<8xf32> to vector<1x8xf32>
    %41 = vector.extract_strided_slice %35 {offsets = [0, 160], sizes = [8, 512], strides = [1, 1]} : vector<8x1664xf32> to vector<8x512xf32>
    %42 = arith.mulf %41, %36 : vector<8x512xf32>
    %cst_10 = arith.constant dense<0.000000e+00> : vector<8xf32>
    %43 = vector.multi_reduction <add>, %42, %cst_10 [1] : vector<8x512xf32> to vector<8xf32>
    %44 = vector.shape_cast %43 : vector<8xf32> to vector<1x8xf32>
    %45 = vector.extract_strided_slice %35 {offsets = [0, 320], sizes = [8, 512], strides = [1, 1]} : vector<8x1664xf32> to vector<8x512xf32>
    %46 = arith.mulf %45, %36 : vector<8x512xf32>
    %cst_11 = arith.constant dense<0.000000e+00> : vector<8xf32>
    %47 = vector.multi_reduction <add>, %46, %cst_11 [1] : vector<8x512xf32> to vector<8xf32>
    %48 = vector.shape_cast %47 : vector<8xf32> to vector<1x8xf32>
    %49 = vector.extract_strided_slice %35 {offsets = [0, 480], sizes = [8, 512], strides = [1, 1]} : vector<8x1664xf32> to vector<8x512xf32>
    %50 = arith.mulf %49, %36 : vector<8x512xf32>
    %cst_12 = arith.constant dense<0.000000e+00> : vector<8xf32>
    %51 = vector.multi_reduction <add>, %50, %cst_12 [1] : vector<8x512xf32> to vector<8xf32>
    %52 = vector.shape_cast %51 : vector<8xf32> to vector<1x8xf32>
    %53 = vector.extract_strided_slice %35 {offsets = [0, 640], sizes = [8, 512], strides = [1, 1]} : vector<8x1664xf32> to vector<8x512xf32>
    %54 = arith.mulf %53, %36 : vector<8x512xf32>
    %cst_13 = arith.constant dense<0.000000e+00> : vector<8xf32>
    %55 = vector.multi_reduction <add>, %54, %cst_13 [1] : vector<8x512xf32> to vector<8xf32>
    %56 = vector.shape_cast %55 : vector<8xf32> to vector<1x8xf32>
    %57 = vector.extract_strided_slice %35 {offsets = [0, 800], sizes = [8, 512], strides = [1, 1]} : vector<8x1664xf32> to vector<8x512xf32>
    %58 = arith.mulf %57, %36 : vector<8x512xf32>
    %cst_14 = arith.constant dense<0.000000e+00> : vector<8xf32>
    %59 = vector.multi_reduction <add>, %58, %cst_14 [1] : vector<8x512xf32> to vector<8xf32>
    %60 = vector.shape_cast %59 : vector<8xf32> to vector<1x8xf32>
    %61 = vector.extract_strided_slice %35 {offsets = [0, 960], sizes = [8, 512], strides = [1, 1]} : vector<8x1664xf32> to vector<8x512xf32>
    %62 = arith.mulf %61, %36 : vector<8x512xf32>
    %cst_15 = arith.constant dense<0.000000e+00> : vector<8xf32>
    %63 = vector.multi_reduction <add>, %62, %cst_15 [1] : vector<8x512xf32> to vector<8xf32>
    %64 = vector.shape_cast %63 : vector<8xf32> to vector<1x8xf32>
    %65 = vector.extract_strided_slice %35 {offsets = [0, 1120], sizes = [8, 512], strides = [1, 1]} : vector<8x1664xf32> to vector<8x512xf32>
    %66 = arith.mulf %65, %36 : vector<8x512xf32>
    %cst_16 = arith.constant dense<0.000000e+00> : vector<8xf32>
    %67 = vector.multi_reduction <add>, %66, %cst_16 [1] : vector<8x512xf32> to vector<8xf32>
    %68 = vector.shape_cast %67 : vector<8xf32> to vector<1x8xf32>
    %69 = tpu.concatenate %40, %44, %48, %52, %56, %60, %64, %68 in 0 : vector<1x8xf32>, vector<1x8xf32>, vector<1x8xf32>, vector<1x8xf32>, vector<1x8xf32>, vector<1x8xf32>, vector<1x8xf32>, vector<1x8xf32> -> vector<8x8xf32>
    %70 = math.absf %69 : vector<8x8xf32>
    %cst_17 = arith.constant 1.000000e+00 : f32
    %71 = vector.broadcast %cst_17 : f32 to vector<8x8xf32>
    %72 = arith.addf %70, %71 : vector<8x8xf32>
    %73 = math.log %72 : vector<8x8xf32>
    %c0_18 = arith.constant 0 : index
    %c0_19 = arith.constant 0 : index
    %c0_20 = arith.constant 0 : index
    %74 = vector.load %arg4[%c0_18, %c0_19, %c0_20] : memref<1x8x8xf32, #tpu.memory_space<vmem>>, vector<1x8x8xf32>
    %75 = vector.shape_cast %74 : vector<1x8x8xf32> to vector<8x8xf32>
    %76 = vector.shape_cast %73 : vector<8x8xf32> to vector<1x8x8xf32>
    tpu.vector_store %arg4[%c0_18, %c0_19, %c0_20], %76 {strides = array<i32>} : memref<1x8x8xf32, #tpu.memory_space<vmem>>, vector<1x8x8xf32>,
    return
  }
  func.func @transform_0(%arg0: i32) -> (i32, i32, i32) {
    %c0_i32 = arith.constant 0 : i32
    %c0_i32_0 = arith.constant 0 : i32
    %c0_i32_1 = arith.constant 0 : i32
    return %arg0, %c0_i32, %c0_i32_0 : i32, i32, i32
  }
  func.func @transform_1(%arg0: i32) -> (i32, i32) {
    %c0_i32 = arith.constant 0 : i32
    %c0_i32_0 = arith.constant 0 : i32
    %c0_i32_1 = arith.constant 0 : i32
    return %c0_i32, %c0_i32_0 : i32, i32
  }
  func.func @transform_2(%arg0: i32) -> (i32, i32) {
    %c0_i32 = arith.constant 0 : i32
    %c0_i32_0 = arith.constant 0 : i32
    %c0_i32_1 = arith.constant 0 : i32
    return %c0_i32, %c0_i32_0 : i32, i32
  }
  func.func @transform_3(%arg0: i32) -> (i32, i32, i32) {
    %c0_i32 = arith.constant 0 : i32
    %c0_i32_0 = arith.constant 0 : i32
    %c0_i32_1 = arith.constant 0 : i32
    return %arg0, %c0_i32, %c0_i32_0 : i32, i32, i32
  }
}

</mosaic_0001>

<bundles_post_ra>
// kernel: tpu_custom_call.1
= control target key start
LH: loop header
LB: loop body
LE: loop exit
PB: predicated region body
PF: predicated region fallthrough
CT: control target
= control target key end

     0   :  { %8 = vsyncpa [#allocation3], 0  ;;  %s7274_s0 = inlined_call_operand.hbm [shape: f32[3,8,2176], index: 0, kind: input, shape index: {}]   ;;  %s7275_s1 = inlined_call_operand.hbm [shape: bf16[16,512], index: 1, kind: input, shape index: {}]   ;;  %s7276_s2 = inlined_call_operand.hbm [shape: f32[8,512], index: 2, kind: input, shape index: {}]   ;;  %s7277_s3 = inlined_call_operand.hbm [shape: f32[3,8,8], index: 3, kind: output, shape index: {}]  }
   0x1   :  { %10 = vsyncpa [#allocation3 + $0x1], 0 }
   0x2   :  { %11 = vsyncpa [#allocation6], 0 }
   0x3   :  { %12 = vsyncpa [#allocation4], 0 }
   0x4   :  { %14 = vsyncpa [#allocation4 + $0x1], 0  ;;  %s4188_s12 = smov 0   ;;  %s4190_s13 = smov 0  }
   0x5   :  { %s4192_s14 = smov 0   ;;  %s4194_s15 = smov 0  }
   0x6 LB: > { %s4209_s16 = sadd.s32 4294967295, %s4152_s15   ;;  %s3128_s17 = sadd.s32 4294967294, %s4152_s15   ;;  %s4152_s15 = sphi %s4194_s15, %s8202_s15   ;;  %s4148_s14 = sphi %s4192_s14, %s8201_s14   ;;  %s4144_s13 = sphi %s4190_s13, %s8200_s13   ;;  %s4140_s12 = sphi %s4188_s12, %s8199_s12  }
   0x7   : > { %p40_p0 = scmp.ne.s32.totalorder %s4144_s13, %s4140_s12  ;;  %p7278_p1 = scmp.eq.s32.totalorder %s4209_s16, 0 }
   0x8   : > { %p112_p3 = scmp.eq.s32.totalorder %s3128_s17, 2  ;;  %p3129_p5 = scmp.ge.s32.totalorder %s4152_s15, 1 }
   0x9   : > { %p4218_p4 = por %p7278_p1, %p40_p0  ;;  %p119_p7 = scmp.lt.s32.totalorder %s4152_s15, 4 }
   0xa   : > { %p4223_p6 = por %p112_p3, %p40_p0  ;;  %s4154_s21 = smov [#allocation5]  }
   0xb   : > { %s7594_s18 = scalar_select %p4218_p4, 1, 0 }
   0xc   : > { %s7595_s19 = scalar_select %p4223_p6, 1, 0 }
   0xd   : > { %p4228_p8 = pnand %p3129_p5, %p119_p7  ;;  %s131_s22 = sshll.u32 %s4154_s21, 4  ;;  %s132_s22 = int_to_ptr.vmem [resolvable:$true] %s131_s22 }
   0xe   : > { %s4155_s24 = smov [#allocation7]   ;;  %s4015_s26 = scalar_lea.vmem %s132_s22, 512 }
   0xf   : > { %s7596_s20 = scalar_select %p4228_p8, 1, 0 }
  0x10   : > { %p3277_p9 = pneg %p4228_p8  ;;  %s145_s25 = sshll.u32 %s4155_s24, 4  ;;  %s146_s25 = int_to_ptr.vmem [resolvable:$true] %s145_s25 }
  0x11   : > { %p4016_p12 = scmp.ne.s32.totalorder %s132_s22, %s4015_s26  ;;  %p4023_p3 = scmp.lt.s32.totalorder %s132_s22, %s132_s22 }
  0x12   : > { %p4236_p10 = pnand %p3277_p9, %p7278_p1  ;;  %p4024_p5 = scmp.lt.s32.totalorder %s4015_s26, %s4015_s26 }
  0x14   : > { %p4006_p11 = pneg %p4236_p10  ;;  %p4025_p7 = por %p4024_p5, %p4023_p3 }
  0x16   : > { %p4018_p13 = pnand %p4016_p12, %p4006_p11 }
  0x18   : > { %p4019_p0 = pneg %p4018_p13 }
  0x1a   : > { %p4026_p9 = pnand %p4025_p7, %p4019_p0 }
  0x1c   : > { %4029 = shalt.err (!%p4026_p9)
}
  0x1d   : > { %s4156_s27 = smov 256   ;;  %s4157_s28 = smov 16  }
  0x1e   : > { %3280 = dma.hbm_to_vmem [thread:$0]  (!%p4236_p10), %s7275_s1, 512, %s132_s22, [#allocation6], %s4156_s27, %s4156_s27, %s4157_s28  }
  0x1f   : > { %s4041_s4 = scalar_lea.vmem %s146_s25, 512  ;;  %p4049_p2 = scmp.lt.s32.totalorder %s146_s25, %s146_s25 }
  0x20   : > { %p4042_p1 = scmp.ne.s32.totalorder %s146_s25, %s4041_s4  ;;  %p4050_p6 = scmp.lt.s32.totalorder %s4041_s4, %s4041_s4 }
  0x22   : > { %p4044_p12 = pnand %p4042_p1, %p4006_p11  ;;  %p4051_p3 = por %p4050_p6, %p4049_p2 }
  0x24   : > { %p4045_p13 = pneg %p4044_p12 }
  0x26   : > { %p4052_p0 = pnand %p4051_p3, %p4045_p13 }
  0x28   : > { %4055 = shalt.err (!%p4052_p0)
}
  0x29   : > { %3283 = dma.hbm_to_vmem [thread:$0]  (!%p4236_p10), %s7276_s2, 512, %s146_s25, [#allocation6]  }
  0x2a   : > { %s4259_s7 = sadd.s32 1, %s4152_s15   ;;  %s27_s8 = sadd.s32 1, %s4148_s14 }
  0x2b   : > { %s24_s9 = ssub.s32 %s4152_s15, %s4259_s7  ;;  %p34_p1 = scmp.ne.s32.totalorder %s4148_s14, %s4144_s13 }
  0x2c   : > { %p25_p2 = scmp.eq.s32.totalorder %s24_s9, 0  ;;  %p35_p6 = scmp.eq.s32.totalorder %s4152_s15, 0 }
  0x2d   : > { %p7598_p11 = scmp.eq.s32.totalorder %s4209_s16, 2  ;;  %p3294_p7 = scmp.lt.s32.totalorder %s4152_s15, 3 }
  0x2e   : > { %s4275_s11 = scalar_select %p25_p2, %s4148_s14, %s27_s8  }
  0x2f   : > { %p4269_p5 = por %p7598_p11, %p34_p1  ;;  %p36_p9 = por %p35_p6, %p34_p1 }
  0x30   : > { %s156_s17 = sand.u32 1, %s4148_s14   ;;  %s3263_s22 = smul.u32 2176, %s4152_s15 }
  0x31   : > { %s7599_s10 = scalar_select %p4269_p5, 1, 0 }
  0x32   : > { %s3262_s21 = smul.u32 136, %s156_s17  ;;  %p4279_p10 = pnand %p3294_p7, %p36_p9 }
  0x33   : > { %s4286_s26 = scalar_lea.hbm %s7274_s0, %s3263_s22  ;;  %s157_s29 = scalar_lea.sflag [#allocation3], %s156_s17 }
  0x34   : > { %s160_s27 = scalar_lea.vmem [#allocation2], %s3262_s21  ;;  %s4056_s30 = scalar_lea.hbm %s4286_s26, 2176 }
  0x35   : > { %s168_s28 = sshll.u32 %s160_s27, 4  ;;  %p4057_p12 = scmp.ne.s32.totalorder %s4286_s26, %s4056_s30  ;;  %s169_s28 = int_to_ptr.vmem [resolvable:$true] %s168_s28 }
  0x36   : > { %p4058_p13 = pneg %p4279_p10  ;;  %s4061_s6 = scalar_lea.hbm %s7274_s0, 6528 }
  0x37   : > { %p4062_p1 = scmp.lt.s32.totalorder %s4286_s26, %s7274_s0  ;;  %p4063_p2 = scmp.lt.s32.totalorder %s4061_s6, %s4056_s30 }
  0x38   : > { %p4059_p3 = pnand %p4058_p13, %p4057_p12 }
  0x39   : > { %p4064_p6 = por %p4063_p2, %p4062_p1 }
  0x3a   : > { %p4060_p0 = pneg %p4059_p3 }
  0x3c   : > { %p4065_p11 = pnand %p4064_p6, %p4060_p0 }
  0x3e   : > { %4068 = shalt.err (!%p4065_p11)
}
  0x3f   : > { %s4069_s21 = scalar_lea.vmem %s169_s28, 2176  ;;  %s4158_s17 = smov [#allocation2]  }
  0x40   : > { %p4070_p7 = scmp.ne.s32.totalorder %s169_s28, %s4069_s21  ;;  %s4074_s22 = sshll.u32 %s4158_s17, 4  ;;  %s4075_s22 = int_to_ptr.vmem [resolvable:$false] %s4074_s22 }
  0x41   : > { %s4076_s24 = scalar_lea.vmem %s4075_s22, 4352  ;;  %p4077_p12 = scmp.lt.s32.totalorder %s169_s28, %s4075_s22 }
  0x42   : > { %p4072_p9 = pnand %p4070_p7, %p4058_p13  ;;  %p4078_p3 = scmp.lt.s32.totalorder %s4076_s24, %s4069_s21 }
  0x44   : > { %p4073_p5 = pneg %p4072_p9  ;;  %p4079_p4 = por %p4078_p3, %p4077_p12 }
  0x46   : > { %p4080_p8 = pnand %p4079_p4, %p4073_p5 }
  0x48   : > { %4083 = shalt.err (!%p4080_p8)
}
  0x49   : > { %3287 = dma.hbm_to_vmem [thread:$0]  (!%p4279_p10), %s4286_s26, 2176, %s169_s28, %s157_s29  }
  0x4a   : > { %p7601_p0 = scmp.ne.s32.totalorder %s7596_s20, 0 }
  0x4c   : > { %177 = sbr.rel (%p7601_p0) target bundleno = 1656 (0x678), region = 32 }
  0x51   : > { %s4305_s25 = sand.u32 1, %s4144_s13   ;;  %p7602_p13 = scmp.ne.s32.totalorder %s7594_s18, 0 }
  0x52   : > { %s3264_s27 = smul.u32 136, %s4305_s25  ;;  %s180_s30 = scalar_lea.sflag [#allocation3], %s4305_s25 }
  0x54   : > { %s4309_s4 = scalar_lea.vmem [#allocation2], %s3264_s27 }
  0x55   : > { %4127 = dma.done.wait (%p7602_p13), %s180_s30, 2176  }
  0x56   : > { %4129 = vsyncadd (%p7602_p13), %s180_s30, 4294965120  ;;  %p7603_p4 = scmp.eq.s32.totalorder %s4209_s16, 0 }
  0x58   : > { %4131 = dma.done.wait (%p7603_p4), [#allocation6], 1024   ;;  %p7604_p8 = pmov %p7603_p4 }
  0x59   : > { %v217_v0 = vld [vmem:[%s4309_s4 + $0x10] sm:$0xff]  ;;  %v218_v1 = vld [vmem:[%s4309_s4 + $0x18] sm:$0xff]  ;;  %v216_v2 = vld [vmem:[%s4309_s4 + $0x8] sm:$0xff]  ;;  %s4159_s18 = smov 120   ;;  %s4160_s20 = smov 112   ;;  %vm283_vm0 = vcmask 982016  }
  0x5a   : > { %4133 = vsyncadd (%p7604_p8), [#allocation6], 4294966272  ;;  %v4322_v3 = vpack.i.bf16 %v218_v1, %v217_v0  ;;  %v4325_v4 = vld [vmem:[%s4309_s4 + $0x30] sm:$0xff]  ;;  %v4328_v5 = vld [vmem:[%s4309_s4 + $0x20] sm:$0xff]  ;;  %s4161_s23 = smov 96   ;;  %vm384_vm1 = vcmask 916480  }
  0x5b   : > { %v4331_v6 = vld [vmem:[%s4309_s4 + $0x28] sm:$0xff]  ;;  %v3352_v7 = vpack.i.bf16 %v216_v2, %v4325_v4  ;;  %v222_v8 = vld [vmem:[%s4309_s4 + $0x38] sm:$0xff]  ;;  %v4336_v9 = vld [vmem:[%s4309_s4 + $0x40] sm:$0xff]  ;;  %vm585_vm2 = vcmask 785408   ;;  %s4162_s26 = smov 64   ;;  %vm986_vm3 = vcmask 523264  }
  0x5c   : > { %3343 = vrot.lane.b32.xlu0 %v4322_v3, %s4159_s18  ;;  %v4342_v10 = vpack.i.bf16 %v4331_v6, %v4328_v5  ;;  %v4345_v11 = vld [vmem:[%s4309_s4 + $0x48] sm:$0xff]  ;;  %v4348_v12 = vld [vmem:[%s4309_s4 + $0x50] sm:$0xff]  ;;  %v4352_v13 = vpack.i.bf16 %v4336_v9, %v222_v8  ;;  %v4355_v14 = vld [vmem:[%s4309_s4 + $0x58] sm:$0xff]  ;;  %v4422_v43 = vpack.i.bf16 %v222_v8, %v4325_v4  ;;  %v3437_v62 = vpack.i.bf16 %v4325_v4, %v4331_v6  ;;  %s4166_s28 = smov 32   ;;  %s3137_s29 = sshll.u32 %s4305_s25, 3 }
  0x5d   : > { %3353 = vrot.lane.b32.xlu1 %v3352_v7, %s4159_s18  ;;  %v4358_v15 = vld [vmem:[%s4309_s4 + $0x60] sm:$0xff]  ;;  %v4364_v16 = vpack.i.bf16 %v4348_v12, %v4345_v11  ;;  %v228_v46 = vld [vmem:[%s4309_s4 + $0x68] sm:$0xff]  ;;  %v229_v47 = vld [vmem:[%s4309_s4 + $0x70] sm:$0xff]  ;;  %v4473_v60 = vpack.i.bf16 %v4345_v11, %v4336_v9  ;;  %v4480_v61 = vpack.i.bf16 %v4355_v14, %v4348_v12  ;;  %vm4165_vm4 = vmmov 0   ;;  %s3143_s5 = sshll.u32 %s4209_s16, 7  ;;  %s213_s6 = scalar_lea.vmem [#allocation8], %s3137_s29 }
  0x5e   : > { %v4370_v17 = vpack.i.bf16 %v4358_v15, %v4355_v14  ;;  %v4453_v55 = vpack.i.bf16 %v229_v47, %v228_v46  ;;  %v4460_v57 = vld [vmem:[%s4309_s4 + $0x78] sm:$0xff]  ;;  %v4463_v58 = vld [vmem:[%s4309_s4 + $0x80] sm:$0xff]  ;;  %v4496_v1 = vpack.i.bf16 %v228_v46, %v4358_v15  ;;  %vm2707_vm5 = vcmask 261120   ;;  %s3039_s8 = sshll.u32 %s213_s6, 4  ;;  %s3037_s17 = scalar_lea.hbm %s7277_s3, %s3143_s5  ;;  %s3040_s8 = int_to_ptr.vmem [resolvable:$true] %s3039_s8 }
  0x5f   : > { %v3412_v59 = vpack.i.bf16 %v4463_v58, %v4460_v57  ;;  %7615 = vst [vmem:[#allocation22_spill] sm:$0xff] %v4480_v61  ;;  %v4489_v63 = vld [vmem:[%s4309_s4] sm:$0xff]  ;;  %v3442_v0 = vpack.i.bf16 %v4460_v57, %v229_v47  ;;  %vm3005_vm6 = vcmask 1040384   ;;  %vm3007_vm7 = vcmask 1041408   ;;  %s3026_s22 = scalar_lea.sflag [#allocation4], %s4305_s25  ;;  %s4084_s24 = scalar_lea.vmem %s3040_s8, 128 }
  0x60   : > { %3348 = vrot.lane.b32.xlu0 %v4342_v10, %s4159_s18  ;;  %7616 = vst [vmem:[#allocation23_spill] sm:$0xff] %v4496_v1  ;;  %vm3009_vm8 = vcmask 1042432   ;;  %vm3011_vm9 = vcmask 1043456   ;;  %vm3013_vm10 = vcmask 1044480   ;;  %vm3015_vm11 = vcmask 1045504   ;;  %p4085_p5 = scmp.ne.s32.totalorder %s3040_s8, %s4084_s24  ;;  %p8197_p10 = scmp.ne.s32.totalorder %s7599_s10, 0 }
  0x61   : > { %3358 = vrot.lane.b32.xlu1 %v4352_v13, %s4159_s18  ;;  %vm3017_vm12 = vcmask 1046528   ;;  %vm3023_vm13 = vcmask 64512   ;;  %s4167_s27 = smov [#allocation8]  }
  0x62   : > { %p4086_p1 = pnand %p4085_p5, %p8197_p10  ;;  %s4088_s30 = sshll.u32 %s4167_s27, 4  ;;  %s4089_s30 = int_to_ptr.vmem [resolvable:$false] %s4088_s30 }
  0x63   : > { %s4090_s16 = scalar_lea.vmem %s4089_s30, 256  ;;  %p4091_p6 = scmp.lt.s32.totalorder %s3040_s8, %s4089_s30 }
  0x64   : > { %3363 = vrot.lane.b32.xlu0 %v4364_v16, %s4159_s18  ;;  %p4087_p2 = pneg %p4086_p1  ;;  %p4092_p11 = scmp.lt.s32.totalorder %s4090_s16, %s4084_s24 }
  0x65   : > { %3368 = vrot.lane.b32.xlu1 %v4370_v17, %s4159_s18 }
  0x66   : > { %p4093_p7 = por %p4092_p11, %p4091_p6 }
  0x68   : > { %3373 = vrot.lane.b32.xlu0 %v4322_v3, %s4160_s20  ;;  %p4094_p9 = pnand %p4093_p7, %p4087_p2 }
  0x69   : > { %3378 = vrot.lane.b32.xlu1 %v4342_v10, %s4160_s20 }
  0xce   : > { %v3344_v18 = vpop.permute.xlu0 %3343 }
  0xcf   : > { %v4380_v19 = vpop.permute.xlu1 %3353  ;;  %v3346_v20 = vunpack.i.h.bf16 %v3344_v18  ;;  %v3345_v21 = vunpack.i.l.bf16 %v3344_v18 }
  0xd0   : > { %v3355_v22 = vunpack.i.l.bf16 %v4380_v19  ;;  %v7284_v24 = vunpack.i.h.bf16 %v4380_v19 }
  0xd1   : > { %v4385_v30 = vsel %vm283_vm0, %v3345_v21, %v3346_v20 }
  0xd2   : > { %v3349_v23 = vpop.permute.xlu0 %3348  ;;  %7605 = vst [vmem:[#allocation12_spill] sm:$0xff] %v4385_v30  ;;  %v4413_v39 = vsel %vm283_vm0, %v7284_v24, %v3345_v21  ;;  %v3467_v4 = vpack.i.bf16 %v4385_v30, %v4328_v5 }
  0xd3   : > { %v3351_v25 = vunpack.i.h.bf16 %v3349_v23  ;;  %v3350_v26 = vunpack.i.l.bf16 %v3349_v23  ;;  %v3359_v27 = vpop.permute.xlu1 %3358  ;;  %7611 = vst [vmem:[#allocation18_spill] sm:$0xff] %v4413_v39  ;;  %v4440_v51 = vpack.i.bf16 %v4413_v39, %v216_v2 }
  0xd4   : > { %v3361_v28 = vunpack.i.h.bf16 %v3359_v27  ;;  %v3360_v29 = vunpack.i.l.bf16 %v3359_v27 }
  0xd5   : > { %v4388_v31 = vsel %vm283_vm0, %v3346_v20, %v3350_v26  ;;  %v4391_v32 = vsel %vm283_vm0, %v3350_v26, %v3351_v25  ;;  %v4394_v33 = vsel %vm283_vm0, %v3351_v25, %v3355_v22 }
  0xd6   : > { %7606 = vst [vmem:[#allocation13_spill] sm:$0xff] %v4388_v31  ;;  %7607 = vst [vmem:[#allocation14_spill] sm:$0xff] %v4391_v32  ;;  %v4398_v34 = vpack.i.bf16 %v4388_v31, %v4385_v30  ;;  %v4402_v35 = vpack.i.bf16 %v4394_v33, %v4391_v32  ;;  %v3364_v36 = vpop.permute.xlu0 %3363  ;;  %v4405_v37 = vsel %vm283_vm0, %v3355_v22, %v3360_v29 }
  0xd7   : > { %7608 = vst [vmem:[#allocation15_spill] sm:$0xff] %v4394_v33  ;;  %7609 = vst [vmem:[#allocation16_spill] sm:$0xff] %v4405_v37  ;;  %v4408_v38 = vsel %vm283_vm0, %v3360_v29, %v3361_v28  ;;  %v3366_v40 = vunpack.i.h.bf16 %v3364_v36  ;;  %v3365_v41 = vunpack.i.l.bf16 %v3364_v36  ;;  %v4415_v42 = vpop.permute.xlu1 %3368  ;;  %v3472_v18 = vpack.i.bf16 %v4391_v32, %v4388_v31 }
  0xd8   : > { %7610 = vst [vmem:[#allocation17_spill] sm:$0xff] %v4408_v38  ;;  %3383 = vrot.lane.b32.xlu0 %v4398_v34, %s4160_s20  ;;  %3388 = vrot.lane.b32.xlu1 %v4402_v35, %s4160_s20  ;;  %v3370_v44 = vunpack.i.l.bf16 %v4415_v42  ;;  %v4437_v50 = vpack.i.bf16 %v4408_v38, %v4405_v37  ;;  %v3371_v2 = vunpack.i.h.bf16 %v4415_v42 }
  0xd9   : > { %v4430_v48 = vsel %vm283_vm0, %v3361_v28, %v3365_v41  ;;  %v4433_v49 = vsel %vm283_vm0, %v3365_v41, %v3366_v40 }
  0xda   : > { %7612 = vst [vmem:[#allocation19_spill] sm:$0xff] %v4430_v48  ;;  %7613 = vst [vmem:[#allocation20_spill] sm:$0xff] %v4433_v49  ;;  %v4443_v52 = vsel %vm283_vm0, %v3366_v40, %v3370_v44  ;;  %v4457_v56 = vpack.i.bf16 %v4433_v49, %v4430_v48  ;;  %v3374_v6 = vpop.permute.xlu0 %3373  ;;  %v4508_v12 = vsel %vm283_vm0, %v3370_v44, %v3371_v2 }
  0xdb   : > { %7614 = vst [vmem:[#allocation21_spill] sm:$0xff] %v4443_v52  ;;  %v3379_v7 = vpop.permute.xlu1 %3378  ;;  %v3376_v8 = vunpack.i.h.bf16 %v3374_v6  ;;  %v3375_v9 = vunpack.i.l.bf16 %v3374_v6  ;;  %7617 = vst [vmem:[#allocation24_spill] sm:$0xff] %v4508_v12  ;;  %v4514_v5 = vpack.i.bf16 %v4508_v12, %v4443_v52 }
  0xdc   : > { %3398 = vrot.lane.b32.xlu0 %v4440_v51, %s4160_s20  ;;  %3393 = vrot.lane.b32.xlu1 %v4422_v43, %s4160_s20  ;;  %v3380_v11 = vunpack.i.l.bf16 %v3379_v7  ;;  %v3381_v20 = vunpack.i.h.bf16 %v3379_v7 }
  0xdd   : > { %7618 = vst [vmem:[#allocation25_spill] sm:$0xff] %v4514_v5  ;;  %v4517_v14 = vsel %vm384_vm1, %v3375_v9, %v3376_v8 }
  0xde   : > { %7619 = vst [vmem:[#allocation26_spill] sm:$0xff] %v4517_v14  ;;  %v4545_v42 = vsel %vm384_vm1, %v3380_v11, %v3381_v20 }
  0xe0   : > { %3403 = vrot.lane.b32.xlu0 %v4437_v50, %s4160_s20  ;;  %3408 = vrot.lane.b32.xlu1 %v4453_v55, %s4159_s18 }
  0xe4   : > { %3413 = vrot.lane.b32.xlu0 %v3412_v59, %s4159_s18  ;;  %3418 = vrot.lane.b32.xlu1 %v4473_v60, %s4160_s20 }
  0xe8   : > { %3428 = vrot.lane.b32.xlu0 %v4322_v3, %s4161_s23  ;;  %3423 = vrot.lane.b32.xlu1 %v4480_v61, %s4160_s20 }
  0xec   : > { %3438 = vrot.lane.b32.xlu0 %v3437_v62, %s4161_s23  ;;  %249 = vrot.lane.b32.xlu1 %v4489_v63, %s4159_s18 }
  0xf0   : > { %3443 = vrot.lane.b32.xlu0 %v3442_v0, %s4160_s20  ;;  %3433 = vrot.lane.b32.xlu1 %v4496_v1, %s4160_s20 }
  0xf4   : > { %3448 = vrot.lane.b32.xlu0 %v4352_v13, %s4161_s23  ;;  %3468 = vrot.lane.b32.xlu1 %v3467_v4, %s4161_s23  ;;  %v4520_v13 = vsel %vm384_vm1, %v3376_v8, %v3380_v11 }
  0xf5   : > { %7620 = vst [vmem:[#allocation27_spill] sm:$0xff] %v4520_v13  ;;  %v4526_v15 = vpack.i.bf16 %v4520_v13, %v4517_v14 }
  0xf8   : > { %3453 = vrot.lane.b32.xlu0 %v4457_v56, %s4160_s20 }
  0xfc   : > { %3458 = vrot.lane.b32.xlu0 %v4514_v5, %s4160_s20 }
 0x100   : > { %3463 = vrot.lane.b32.xlu0 %v4526_v15, %s4161_s23 }
 0x104   : > { %3473 = vrot.lane.b32.xlu0 %v3472_v18, %s4161_s23 }
 0x14a   : > { %v3384_v21 = vpop.permute.xlu0 %3383  ;;  %v3389_v22 = vpop.permute.xlu1 %3388 }
 0x14b   : > { %v3386_v23 = vunpack.i.h.bf16 %v3384_v21  ;;  %v3385_v25 = vunpack.i.l.bf16 %v3384_v21  ;;  %v3391_v26 = vunpack.i.h.bf16 %v3389_v22  ;;  %v3390_v27 = vunpack.i.l.bf16 %v3389_v22 }
 0x14d   : > { %v4534_v28 = vsel %vm384_vm1, %v3386_v23, %v3390_v27  ;;  %v4537_v29 = vsel %vm384_vm1, %v3390_v27, %v3391_v26  ;;  %v4540_v36 = vsel %vm384_vm1, %v3385_v25, %v3386_v23 }
 0x14e   : > { %v4542_v40 = vpop.permute.xlu0 %3398  ;;  %v3394_v41 = vpop.permute.xlu1 %3393  ;;  %v4553_v0 = vpack.c.bf16 %v4537_v29, %v4545_v42 }
 0x14f   : > { %v7282_v46 = vunpack.i.h.bf16 %v4542_v40  ;;  %v7283_v47 = vunpack.i.l.bf16 %v4542_v40  ;;  %v3396_v59 = vunpack.i.h.bf16 %v3394_v41  ;;  %v3395_v62 = vunpack.i.l.bf16 %v3394_v41 }
 0x150   : > { %7621 = vst [vmem:[#allocation28_spill] sm:$0xff] %v4553_v0 }
 0x151   : > { %v4556_v4 = vsel %vm384_vm1, %v3381_v20, %v3395_v62  ;;  %v4559_v6 = vsel %vm384_vm1, %v3395_v62, %v3396_v59  ;;  %v386_v7 = vsel %vm384_vm1, %v7283_v47, %v3375_v9  ;;  %v402_v8 = vsel %vm384_vm1, %v7282_v46, %v3385_v25 }
 0x152   : > { %v4567_v11 = vpop.permute.xlu0 %3403  ;;  %v3409_v18 = vpop.permute.xlu1 %3408  ;;  %v3477_v21 = vpack.i.bf16 %v4559_v6, %v4556_v4  ;;  %v4571_v22 = vpack.i.bf16 %v402_v8, %v386_v7  ;;  %v4576_v9 = vpack.c.bf16 %v402_v8, %v386_v7 }
 0x153   : > { %v7285_v20 = vunpack.i.h.bf16 %v4567_v11  ;;  %v3405_v23 = vunpack.i.l.bf16 %v4567_v11  ;;  %v3411_v27 = vunpack.i.h.bf16 %v3409_v18  ;;  %v3410_v41 = vunpack.i.l.bf16 %v3409_v18 }
 0x154   : > { %3478 = vrot.lane.b32.xlu1 %v3477_v21, %s4161_s23  ;;  %7622 = vst [vmem:[#allocation29_spill] sm:$0xff] %v4576_v9 }
 0x155   : > { %v4579_v25 = vsel %vm283_vm0, %v3371_v2, %v3410_v41  ;;  %v4582_v62 = vsel %vm283_vm0, %v3410_v41, %v3411_v27  ;;  %v4585_v46 = vsel %vm384_vm1, %v3391_v26, %v3405_v23  ;;  %v4590_v47 = vsel %vm384_vm1, %v3405_v23, %v7285_v20 }
 0x156   : > { %7623 = vst [vmem:[#allocation30_spill] sm:$0xff] %v4579_v25  ;;  %7624 = vst [vmem:[#allocation31_spill] sm:$0xff] %v4582_v62  ;;  %v3414_v44 = vpop.permute.xlu0 %3413  ;;  %v3419_v18 = vpop.permute.xlu1 %3418  ;;  %v4594_v7 = vpack.i.bf16 %v4582_v62, %v4579_v25  ;;  %v4606_v23 = vpack.c.bf16 %v4590_v47, %v4559_v6  ;;  %v4610_v54 = vpack.c.bf16 %v4585_v46, %v4556_v4 }
 0x157   : > { %v4598_v8 = vunpack.i.h.bf16 %v3414_v44  ;;  %v3415_v21 = vunpack.i.l.bf16 %v3414_v44  ;;  %v3421_v41 = vunpack.i.h.bf16 %v3419_v18  ;;  %v3420_v26 = vunpack.i.l.bf16 %v3419_v18 }
 0x158   : > { %7625 = vst [vmem:[#allocation32_spill] sm:$0xff] %v4594_v7  ;;  %3483 = vrot.lane.b32.xlu0 %v4594_v7, %s4160_s20  ;;  %3488 = vrot.lane.b32.xlu1 %v4440_v51, %s4161_s23  ;;  %7627 = vst [vmem:[#allocation34_spill] sm:$0xff] %v4606_v23 }
 0x159   : > { %7626 = vst [vmem:[#allocation33_spill] sm:$0xff] %v4598_v8  ;;  %7628 = vst [vmem:[#allocation35_spill] sm:$0xff] %v4610_v54  ;;  %v4613_v2 = vsel %vm384_vm1, %v3396_v59, %v3420_v26  ;;  %v4616_v44 = vsel %vm384_vm1, %v3420_v26, %v3421_v41  ;;  %v4619_v18 = vsel %vm283_vm0, %v3411_v27, %v3415_v21 }
 0x15a   : > { %7629 = vst [vmem:[#allocation36_spill] sm:$0xff] %v4619_v18  ;;  %v4623_v24 = vsel %vm283_vm0, %v3415_v21, %v4598_v8  ;;  %v4625_v20 = vpop.permute.xlu0 %3428  ;;  %v4627_v53 = vpop.permute.xlu1 %3423  ;;  %v3502_v45 = vpack.i.bf16 %v4616_v44, %v4613_v2  ;;  %v7631_v27 = vpack.i.bf16 %v4405_v37, %v4394_v33  ;;  %v3522_v26 = vpack.i.bf16 %v4537_v29, %v4534_v28 }
 0x15b   : > { %7630 = vst [vmem:[#allocation37_spill] sm:$0xff] %v4623_v24  ;;  %v7291_v59 = vunpack.i.h.bf16 %v4627_v53  ;;  %v3425_v54 = vunpack.i.l.bf16 %v4627_v53  ;;  %v3497_v21 = vpack.i.bf16 %v4623_v24, %v4619_v18 }
 0x15c   : > { %3503 = vrot.lane.b32.xlu0 %v3502_v45, %s4161_s23  ;;  %3493 = vrot.lane.b32.xlu1 %v7631_v27, %s4161_s23 }
 0x15d   : > { %v4643_v23 = vsel %vm384_vm1, %v3421_v41, %v3425_v54  ;;  %v4648_v0 = vsel %vm384_vm1, %v3425_v54, %v7291_v59  ;;  %v7633_v54 = vpack.i.bf16 %v4430_v48, %v4408_v38  ;;  %v3431_v48 = vunpack.i.h.bf16 %v4625_v20 }
 0x15e   : > { %7632 = vst [vmem:[#allocation38_spill] sm:$0xff] %v4648_v0  ;;  %v4650_v45 = vpop.permute.xlu0 %3438  ;;  %v3512_v33 = vpack.i.bf16 %v4648_v0, %v4643_v23  ;;  %v250_v37 = vpop.permute.xlu1 %249 }
 0x160   : > { %3513 = vrot.lane.b32.xlu0 %v3512_v33, %s4161_s23  ;;  %3498 = vrot.lane.b32.xlu1 %v3497_v21, %s4160_s20  ;;  %v3532_v33 = vpack.i.bf16 %v4590_v47, %v4585_v46  ;;  %v3517_v21 = vpack.i.bf16 %v4540_v36, %v4545_v42 }
 0x162   : > { %v4658_v41 = vpop.permute.xlu0 %3443  ;;  %v3434_v59 = vpop.permute.xlu1 %3433 }
 0x164   : > { %3523 = vrot.lane.b32.xlu0 %v3522_v26, %s4161_s23  ;;  %3508 = vrot.lane.b32.xlu1 %v7633_v54, %s4161_s23  ;;  %v3537_v26 = vpack.i.bf16 %v4598_v8, %v4463_v58 }
 0x166   : > { %v4667_v9 = vpop.permute.xlu0 %3448  ;;  %v4677_v54 = vpop.permute.xlu1 %3468 }
 0x168   : > { %3533 = vrot.lane.b32.xlu0 %v3532_v33, %s4161_s23  ;;  %3518 = vrot.lane.b32.xlu1 %v3517_v21, %s4161_s23  ;;  %v7634_v21 = vunpack.i.h.bf16 %v4567_v11 }
 0x16a   : > { %v3454_v27 = vpop.permute.xlu0 %3453 }
 0x16b   : > { %v3456_v13 = vunpack.i.h.bf16 %v3454_v27  ;;  %v3455_v38 = vunpack.i.l.bf16 %v3454_v27  ;;  %v3470_v27 = vunpack.i.l.bf16 %v4677_v54 }
 0x16c   : > { %3538 = vrot.lane.b32.xlu0 %v3537_v26, %s4160_s20  ;;  %3528 = vrot.lane.b32.xlu1 %v4571_v22, %s4161_s23  ;;  %v7639_v26 = vpack.i.bf16 %v4443_v52, %v4433_v49  ;;  %v3436_v49 = vunpack.i.h.bf16 %v3434_v59 }
 0x16d   : > { %v4687_v14 = vsel %vm384_vm1, %v7634_v21, %v3455_v38  ;;  %v4690_v58 = vsel %vm384_vm1, %v3455_v38, %v3456_v13  ;;  %v3440_v21 = vunpack.i.l.bf16 %v4650_v45  ;;  %v7637_v38 = vunpack.i.h.bf16 %v4380_v19 }
 0x16e   : > { %v4693_v8 = vpop.permute.xlu0 %3458  ;;  %v4699_v31 = vpack.c.bf16 %v4690_v58, %v4616_v44  ;;  %v4703_v11 = vpack.c.bf16 %v4687_v14, %v4613_v2  ;;  %v589_v30 = vsel %vm585_vm2, %v3431_v48, %v3470_v27 }
 0x16f   : > { %v4709_v33 = vsel %vm283_vm0, %v250_v37, %v7637_v38  ;;  %v3460_v32 = vunpack.i.l.bf16 %v4693_v8  ;;  %v3435_v37 = vunpack.i.l.bf16 %v3434_v59  ;;  %v3445_v59 = vunpack.i.l.bf16 %v4658_v41 }
 0x170   : > { %7635 = vst [vmem:[#allocation39_spill] sm:$0xff] %v4699_v31  ;;  %7636 = vst [vmem:[#allocation40_spill] sm:$0xff] %v4703_v11  ;;  %3548 = vrot.lane.b32.xlu0 %v7639_v26, %s4161_s23  ;;  %3543 = vrot.lane.b32.xlu1 %v4364_v16, %s4161_s23  ;;  %v7640_v11 = vunpack.i.l.bf16 %v4625_v20  ;;  %v4729_v39 = vpack.i.bf16 %v4709_v33, %v4489_v63 }
 0x171   : > { %7638 = vst [vmem:[#allocation41_spill] sm:$0xff] %v4709_v33  ;;  %v4723_v19 = vsel %vm384_vm1, %v3456_v13, %v3460_v32  ;;  %v7643_v13 = vunpack.i.h.bf16 %v4650_v45  ;;  %v4765_v63 = vsel %vm384_vm1, %v3435_v37, %v3436_v49 }
 0x172   : > { %v588_v31 = vsel %vm585_vm2, %v7640_v11, %v3431_v48  ;;  %v4725_v38 = vpop.permute.xlu0 %3463  ;;  %v4735_v16 = vpack.c.bf16 %v4723_v19, %v4643_v23  ;;  %v4738_v11 = vsel %vm585_vm2, %v3470_v27, %v3440_v21  ;;  %7647 = vst [vmem:[#allocation46_spill] sm:$0xff] %v4765_v63 }
 0x173   : > { %7642 = vst [vmem:[#allocation43_spill] sm:$0xff] %v4738_v11  ;;  %v4743_v52 = vsel %vm585_vm2, %v3440_v21, %v7643_v13  ;;  %v3557_v21 = vpack.i.bf16 %v589_v30, %v588_v31  ;;  %v7645_v13 = vunpack.i.h.bf16 %v4627_v53  ;;  %v7649_v53 = vunpack.i.h.bf16 %v4658_v41 }
 0x174   : > { %7641 = vst [vmem:[#allocation42_spill] sm:$0xff] %v4735_v16  ;;  %7644 = vst [vmem:[#allocation44_spill] sm:$0xff] %v4743_v52  ;;  %3568 = vrot.lane.b32.xlu0 %v4526_v15, %s4162_s26  ;;  %3553 = vrot.lane.b32.xlu1 %v4729_v39, %s4160_s20  ;;  %v3572_v16 = vpack.i.bf16 %v4743_v52, %v4738_v11  ;;  %v3471_v15 = vunpack.i.h.bf16 %v4677_v54  ;;  %v4770_v52 = vsel %vm384_vm1, %v3436_v49, %v3445_v59 }
 0x175   : > { %v4759_v48 = vsel %vm384_vm1, %v7645_v13, %v3435_v37  ;;  %7648 = vst [vmem:[#allocation47_spill] sm:$0xff] %v4770_v52  ;;  %v4775_v13 = vsel %vm384_vm1, %v3445_v59, %v7649_v53 }
 0x176   : > { %v4752_v26 = vpop.permute.xlu0 %3473  ;;  %7646 = vst [vmem:[#allocation45_spill] sm:$0xff] %v4759_v48  ;;  %7650 = vst [vmem:[#allocation48_spill] sm:$0xff] %v4775_v13  ;;  %v3587_v59 = vpack.i.bf16 %v4775_v13, %v4770_v52 }
 0x177   : > { %v7310_v27 = vunpack.i.h.bf16 %v4752_v26  ;;  %v3475_v33 = vunpack.i.l.bf16 %v4752_v26 }
 0x178   : > { %3573 = vrot.lane.b32.xlu0 %v3572_v16, %s4162_s26  ;;  %3558 = vrot.lane.b32.xlu1 %v3557_v21, %s4162_s26  ;;  %v3562_v16 = vpack.i.bf16 %v4765_v63, %v4759_v48 }
 0x179   : > { %v4778_v54 = vsel %vm585_vm2, %v3471_v15, %v3475_v33  ;;  %v4783_v37 = vsel %vm585_vm2, %v3475_v33, %v7310_v27  ;;  %v3582_v33 = vpack.i.bf16 %v4579_v25, %v4508_v12  ;;  %v3465_v12 = vunpack.i.l.bf16 %v4725_v38 }
 0x17a   : > { %v4788_v21 = vpack.c.bf16 %v4783_v37, %v589_v30  ;;  %v4791_v49 = vpack.c.bf16 %v4778_v54, %v588_v31  ;;  %v3602_v30 = vpack.i.bf16 %v4556_v4, %v4545_v42  ;;  %v3461_v31 = vunpack.i.h.bf16 %v4693_v8 }
 0x17c   : > { %7651 = vst [vmem:[#allocation49_spill] sm:$0xff] %v4788_v21  ;;  %7652 = vst [vmem:[#allocation50_spill] sm:$0xff] %v4791_v49  ;;  %3578 = vrot.lane.b32.xlu0 %v4370_v17, %s4161_s23  ;;  %3563 = vrot.lane.b32.xlu1 %v3562_v16, %s4161_s23  ;;  %v3612_v17 = vpack.i.bf16 %v4619_v18, %v4582_v62 }
 0x180   : > { %3588 = vrot.lane.b32.xlu0 %v3587_v59, %s4161_s23  ;;  %3583 = vrot.lane.b32.xlu1 %v3582_v33, %s4161_s23  ;;  %v7655_v59 = vunpack.i.l.bf16 %v4625_v20 }
 0x184   : > { %3598 = vrot.lane.b32.xlu0 %v4398_v34, %s4162_s26  ;;  %3593 = vrot.lane.b32.xlu1 %v4322_v3, %s4162_s26  ;;  %v3617_v34 = vpack.i.bf16 %v4690_v58, %v4687_v14  ;;  %v4818_v3 = vsel %vm384_vm1, %v3460_v32, %v3461_v31 }
 0x185   : > { %7653 = vst [vmem:[#allocation51_spill] sm:$0xff] %v4818_v3  ;;  %v3622_v42 = vpack.i.bf16 %v4818_v3, %v4723_v19 }
 0x188   : > { %3613 = vrot.lane.b32.xlu0 %v3612_v17, %s4161_s23  ;;  %3603 = vrot.lane.b32.xlu1 %v3602_v30, %s4162_s26 }
 0x18c   : > { %3608 = vrot.lane.b32.xlu1 %v4453_v55, %s4161_s23 }
 0x190   : > { %3618 = vrot.lane.b32.xlu1 %v3617_v34, %s4161_s23 }
 0x194   : > { %3623 = vrot.lane.b32.xlu1 %v3622_v42, %s4161_s23 }
 0x1c6   : > { %v4824_v4 = vpop.permute.xlu1 %3478 }
 0x1c7   : > { %v7334_v21 = vunpack.i.h.bf16 %v4824_v4  ;;  %v3480_v13 = vunpack.i.l.bf16 %v4824_v4 }
 0x1c9   : > { %v623_v1 = vsel %vm585_vm2, %v3480_v13, %v7334_v21 }
 0x1ca   : > { %v3484_v53 = vpop.permute.xlu0 %3483  ;;  %v4826_v8 = vpop.permute.xlu1 %3488 }
 0x1cb   : > { %7654 = vst [vmem:[#allocation52_spill] sm:$0xff] %v4826_v8  ;;  %v7313_v55 = vunpack.i.h.bf16 %v4826_v8  ;;  %v7312_v16 = vunpack.i.l.bf16 %v4826_v8  ;;  %v3486_v42 = vunpack.i.h.bf16 %v3484_v53  ;;  %v3485_v20 = vunpack.i.l.bf16 %v3484_v53 }
 0x1cd   : > { %v4835_v32 = vsel %vm585_vm2, %v7312_v16, %v7655_v59  ;;  %v4840_v33 = vsel %vm585_vm2, %v7313_v55, %v3471_v15  ;;  %v4856_v16 = vsel %vm384_vm1, %v3485_v20, %v3486_v42  ;;  %v3466_v55 = vunpack.i.h.bf16 %v4725_v38 }
 0x1ce   : > { %v4842_v17 = vpop.permute.xlu0 %3503  ;;  %v4844_v30 = vpop.permute.xlu1 %3493  ;;  %v4848_v34 = vpack.c.bf16 %v4840_v33, %v4835_v32  ;;  %v3632_v38 = vpack.i.bf16 %v4783_v37, %v4778_v54  ;;  %v3647_v11 = vpack.i.bf16 %v4840_v33, %v4835_v32  ;;  %v4885_v52 = vsel %vm384_vm1, %v3461_v31, %v3485_v20 }
 0x1cf   : > { %v620_v18 = vsel %vm585_vm2, %v3465_v12, %v3466_v55  ;;  %7658 = vst [vmem:[#allocation55_spill] sm:$0xff] %v4885_v52 }
 0x1d0   : > { %7656 = vst [vmem:[#allocation53_spill] sm:$0xff] %v4848_v34 }
 0x1d2   : > { %v4850_v27 = vpop.permute.xlu0 %3513  ;;  %v4852_v62 = vpop.permute.xlu1 %3498 }
 0x1d3   : > { %v7324_v59 = vunpack.i.l.bf16 %v4852_v62 }
 0x1d5   : > { %v4861_v15 = vsel %vm384_vm1, %v3486_v42, %v7324_v59 }
 0x1d6   : > { %7657 = vst [vmem:[#allocation54_spill] sm:$0xff] %v4861_v15  ;;  %v3524_v25 = vpop.permute.xlu0 %3523  ;;  %v4865_v53 = vpop.permute.xlu1 %3508 }
 0x1d7   : > { %v3526_v34 = vunpack.i.h.bf16 %v3524_v25  ;;  %v3525_v49 = vunpack.i.l.bf16 %v3524_v25 }
 0x1d9   : > { %v4888_v63 = vsel %vm585_vm2, %v3525_v49, %v3526_v34 }
 0x1da   : > { %v4872_v42 = vpop.permute.xlu0 %3533  ;;  %v3519_v59 = vpop.permute.xlu1 %3518 }
 0x1db   : > { %v3535_v7 = vunpack.i.l.bf16 %v4872_v42  ;;  %v3521_v5 = vunpack.i.h.bf16 %v3519_v59  ;;  %v3520_v8 = vunpack.i.l.bf16 %v3519_v59  ;;  %v7662_v25 = vunpack.i.h.bf16 %v4872_v42 }
 0x1dd   : > { %v621_v54 = vsel %vm585_vm2, %v3466_v55, %v3520_v8  ;;  %v622_v37 = vsel %vm585_vm2, %v3520_v8, %v3480_v13  ;;  %v4893_v59 = vsel %vm585_vm2, %v3521_v5, %v3525_v49  ;;  %v4896_v21 = vsel %vm585_vm2, %v3526_v34, %v3535_v7 }
 0x1de   : > { %v4899_v61 = vpop.permute.xlu0 %3538  ;;  %v4901_v32 = vpop.permute.xlu1 %3528  ;;  %v3627_v31 = vpack.i.bf16 %v621_v54, %v620_v18  ;;  %v3637_v33 = vpack.i.bf16 %v623_v1, %v622_v37  ;;  %v4904_v20 = vpack.c.bf16 %v4888_v63, %v621_v54  ;;  %v3501_v34 = vunpack.i.h.bf16 %v4852_v62 }
 0x1df   : > { %7659 = vst [vmem:[#allocation56_spill] sm:$0xff] %v4899_v61  ;;  %7660 = vst [vmem:[#allocation57_spill] sm:$0xff] %v4901_v32  ;;  %v3541_v55 = vunpack.i.h.bf16 %v4899_v61  ;;  %v3540_v13 = vunpack.i.l.bf16 %v4899_v61  ;;  %v7345_v8 = vunpack.i.l.bf16 %v4901_v32  ;;  %v4916_v48 = vsel %vm585_vm2, %v3535_v7, %v7662_v25 }
 0x1e0   : > { %7661 = vst [vmem:[#allocation58_spill] sm:$0xff] %v4904_v20  ;;  %3628 = vrot.lane.b32.xlu0 %v3627_v31, %s4162_s26  ;;  %3638 = vrot.lane.b32.xlu1 %v3637_v33, %s4162_s26  ;;  %v4919_v54 = vpack.c.bf16 %v4896_v21, %v622_v37  ;;  %v4922_v61 = vpack.c.bf16 %v4893_v59, %v620_v18  ;;  %v3495_v49 = vunpack.i.l.bf16 %v4844_v30  ;;  %v7665_v31 = vunpack.i.h.bf16 %v4901_v32 }
 0x1e1   : > { %v619_v20 = vsel %vm585_vm2, %v7345_v8, %v3465_v12  ;;  %v4932_v0 = vpack.c.bf16 %v4916_v48, %v623_v1  ;;  %v7349_v7 = vunpack.i.h.bf16 %v4865_v53  ;;  %v7667_v18 = vunpack.i.h.bf16 %v4658_v41 }
 0x1e2   : > { %7663 = vst [vmem:[#allocation59_spill] sm:$0xff] %v4919_v54  ;;  %7664 = vst [vmem:[#allocation60_spill] sm:$0xff] %v4922_v61  ;;  %v635_v33 = vsel %vm585_vm2, %v7665_v31, %v3521_v5  ;;  %v3549_v25 = vpop.permute.xlu0 %3548  ;;  %v3544_v37 = vpop.permute.xlu1 %3543  ;;  %v4941_v61 = vsel %vm384_vm1, %v3501_v34, %v3541_v55  ;;  %v7672_v41 = vunpack.i.h.bf16 %v4667_v9 }
 0x1e3   : > { %7666 = vst [vmem:[#allocation61_spill] sm:$0xff] %v4932_v0  ;;  %v4938_v54 = vsel %vm384_vm1, %v7667_v18, %v3540_v13  ;;  %7669 = vst [vmem:[#allocation63_spill] sm:$0xff] %v4941_v61  ;;  %v4943_v12 = vpack.c.bf16 %v635_v33, %v619_v20  ;;  %v3551_v8 = vunpack.i.h.bf16 %v3549_v25  ;;  %v3550_v32 = vunpack.i.l.bf16 %v3549_v25 }
 0x1e4   : > { %7668 = vst [vmem:[#allocation62_spill] sm:$0xff] %v4938_v54  ;;  %v3546_v5 = vunpack.i.h.bf16 %v3544_v37  ;;  %v3545_v31 = vunpack.i.l.bf16 %v3544_v37  ;;  %3633 = vrot.lane.b32.xlu0 %v3632_v38, %s4162_s26  ;;  %3648 = vrot.lane.b32.xlu1 %v3647_v11, %s4162_s26  ;;  %v4949_v1 = vpack.i.bf16 %v4941_v61, %v4938_v54  ;;  %v3642_v18 = vpack.i.bf16 %v4856_v16, %v4885_v52 }
 0x1e5   : > { %7670 = vst [vmem:[#allocation64_spill] sm:$0xff] %v4943_v12  ;;  %v4962_v25 = vsel %vm585_vm2, %v7349_v7, %v3550_v32  ;;  %v4965_v38 = vsel %vm585_vm2, %v3550_v32, %v3551_v8  ;;  %v7676_v12 = vunpack.i.h.bf16 %v4752_v26  ;;  %v7680_v26 = vunpack.i.l.bf16 %v4542_v40 }
 0x1e6   : > { %7671 = vst [vmem:[#allocation65_spill] sm:$0xff] %v4949_v1  ;;  %v4954_v13 = vsel %vm585_vm2, %v7672_v41, %v3545_v31  ;;  %v4957_v55 = vsel %vm585_vm2, %v3545_v31, %v3546_v5  ;;  %v4967_v11 = vpop.permute.xlu0 %3568  ;;  %v3554_v37 = vpop.permute.xlu1 %3553  ;;  %v3687_v61 = vpack.i.bf16 %v635_v33, %v619_v20 }
 0x1e7   : > { %7673 = vst [vmem:[#allocation66_spill] sm:$0xff] %v4967_v11  ;;  %v4973_v41 = vpack.c.bf16 %v4965_v38, %v4957_v55  ;;  %v4977_v31 = vpack.c.bf16 %v4962_v25, %v4954_v13  ;;  %v3556_v0 = vunpack.i.h.bf16 %v3554_v37  ;;  %v3555_v7 = vunpack.i.l.bf16 %v3554_v37 }
 0x1e8   : > { %v4982_v32 = vsel %vm585_vm2, %v7676_v12, %v3495_v49  ;;  %v7677_v11 = vunpack.i.h.bf16 %v4844_v30  ;;  %3643 = vrot.lane.b32.xlu0 %v3642_v18, %s4161_s23 }
 0x1e9   : > { %7674 = vst [vmem:[#allocation67_spill] sm:$0xff] %v4973_v41  ;;  %7675 = vst [vmem:[#allocation68_spill] sm:$0xff] %v4977_v31  ;;  %v7679_v41 = vpack.i.bf16 %v4534_v28, %v4540_v36  ;;  %v4999_v12 = vsel %vm384_vm1, %v3555_v7, %v7680_v26  ;;  %v7682_v31 = vunpack.i.h.bf16 %v4542_v40  ;;  %v7684_v26 = vunpack.i.l.bf16 %v4852_v62 }
 0x1ea   : > { %v4987_v3 = vsel %vm585_vm2, %v3495_v49, %v7677_v11  ;;  %7681 = vst [vmem:[#allocation70_spill] sm:$0xff] %v4999_v12  ;;  %v5006_v11 = vpop.permute.xlu0 %3573  ;;  %v5008_v18 = vpop.permute.xlu1 %3558  ;;  %v7686_v7 = vpack.i.bf16 %v4585_v46, %v4537_v29 }
 0x1eb   : > { %7678 = vst [vmem:[#allocation69_spill] sm:$0xff] %v4987_v3  ;;  %3653 = vrot.lane.b32.xlu1 %v7679_v41, %s4162_s26  ;;  %v5004_v49 = vsel %vm384_vm1, %v3556_v0, %v7682_v31  ;;  %v3657_v41 = vpack.i.bf16 %v4987_v3, %v4982_v32  ;;  %v5021_v40 = vsel %vm384_vm1, %v7684_v26, %v3501_v34 }
 0x1ec   : > { %7683 = vst [vmem:[#allocation71_spill] sm:$0xff] %v5004_v49  ;;  %v5014_v37 = vpack.i.bf16 %v5004_v49, %v4999_v12  ;;  %7685 = vst [vmem:[#allocation72_spill] sm:$0xff] %v5021_v40  ;;  %3668 = vrot.lane.b32.xlu0 %v4571_v22, %s4162_s26  ;;  %v3662_v54 = vpack.i.bf16 %v5021_v40, %v4861_v15 }
 0x1ee   : > { %v3579_v0 = vpop.permute.xlu0 %3578  ;;  %v5026_v31 = vpop.permute.xlu1 %3563 }
 0x1ef   : > { %3658 = vrot.lane.b32.xlu1 %v3657_v41, %s4162_s26  ;;  %v3581_v62 = vunpack.i.h.bf16 %v3579_v0  ;;  %v3580_v34 = vunpack.i.l.bf16 %v3579_v0  ;;  %v3677_v41 = vpack.i.bf16 %v4888_v63, %v4893_v59 }
 0x1f0   : > { %3673 = vrot.lane.b32.xlu0 %v7686_v7, %s4162_s26  ;;  %v3510_v7 = vunpack.i.l.bf16 %v4865_v53 }
 0x1f1   : > { %v5051_v20 = vsel %vm585_vm2, %v3580_v34, %v3581_v62 }
 0x1f2   : > { %v5035_v26 = vpop.permute.xlu0 %3588  ;;  %v3584_v22 = vpop.permute.xlu1 %3583 }
 0x1f3   : > { %3663 = vrot.lane.b32.xlu1 %v3662_v54, %s4161_s23  ;;  %v3586_v12 = vunpack.i.h.bf16 %v3584_v22  ;;  %v3585_v49 = vunpack.i.l.bf16 %v3584_v22  ;;  %v5048_v54 = vsel %vm585_vm2, %v3546_v5, %v3580_v34  ;;  %v3506_v5 = vunpack.i.h.bf16 %v4842_v17 }
 0x1f4   : > { %3688 = vrot.lane.b32.xlu0 %v3687_v61, %s4162_s26  ;;  %v3692_v61 = vpack.i.bf16 %v4916_v48, %v4896_v21  ;;  %v3450_v48 = vunpack.i.l.bf16 %v4667_v9  ;;  %v7689_v34 = vunpack.i.h.bf16 %v4824_v4  ;;  %v3515_v4 = vunpack.i.l.bf16 %v4850_v27 }
 0x1f5   : > { %v5042_v29 = vsel %vm585_vm2, %v3551_v8, %v3585_v49  ;;  %v5045_v46 = vsel %vm585_vm2, %v3585_v49, %v3586_v12  ;;  %v3505_v49 = vunpack.i.l.bf16 %v4842_v17  ;;  %v7690_v17 = vunpack.i.h.bf16 %v4844_v30 }
 0x1f6   : > { %v5053_v33 = vpop.permute.xlu0 %3598  ;;  %v5055_v63 = vpop.permute.xlu1 %3593  ;;  %v5061_v59 = vpack.c.bf16 %v5042_v29, %v5048_v54  ;;  %v5065_v8 = vpack.c.bf16 %v5045_v46, %v5051_v20 }
 0x1f7   : > { %3678 = vrot.lane.b32.xlu1 %v3677_v41, %s4162_s26  ;;  %v624_v22 = vsel %vm585_vm2, %v7689_v34, %v3505_v49  ;;  %v625_v41 = vsel %vm585_vm2, %v3505_v49, %v3506_v5 }
 0x1f8   : > { %7687 = vst [vmem:[#allocation73_spill] sm:$0xff] %v5061_v59  ;;  %7688 = vst [vmem:[#allocation74_spill] sm:$0xff] %v5065_v8  ;;  %3693 = vrot.lane.b32.xlu0 %v3692_v61, %s4162_s26  ;;  %v5085_v8 = vsel %vm585_vm2, %v7690_v17, %v3510_v7  ;;  %v7692_v61 = vunpack.i.h.bf16 %v4865_v53  ;;  %v3707_v30 = vpack.i.bf16 %v625_v41, %v624_v22  ;;  %v7694_v53 = vunpack.i.h.bf16 %v4650_v45 }
 0x1f9   : > { %7691 = vst [vmem:[#allocation75_spill] sm:$0xff] %v5085_v8 }
 0x1fa   : > { %v5074_v21 = vpop.permute.xlu0 %3613  ;;  %v5076_v0 = vpop.permute.xlu1 %3603 }
 0x1fb   : > { %3683 = vrot.lane.b32.xlu1 %v4440_v51, %s4162_s26  ;;  %v5090_v51 = vsel %vm585_vm2, %v3510_v7, %v7692_v61  ;;  %v3615_v49 = vunpack.i.l.bf16 %v5074_v21  ;;  %v5105_v7 = vsel %vm585_vm2, %v7694_v53, %v3450_v48 }
 0x1fc   : > { %7693 = vst [vmem:[#allocation76_spill] sm:$0xff] %v5090_v51  ;;  %3698 = vrot.lane.b32.xlu0 %v4342_v10, %s4162_s26  ;;  %v3717_v17 = vpack.i.bf16 %v5090_v51, %v5085_v8  ;;  %v7695_v10 = vunpack.i.h.bf16 %v4667_v9  ;;  %v7697_v9 = vunpack.i.h.bf16 %v5074_v21 }
 0x1fd   : > { %v5119_v45 = vsel %vm585_vm2, %v3586_v12, %v3615_v49 }
 0x1fe   : > { %v5098_v34 = vpop.permute.xlu1 %3608  ;;  %v5110_v61 = vsel %vm585_vm2, %v3450_v48, %v7695_v10  ;;  %v5124_v48 = vsel %vm585_vm2, %v3615_v49, %v7697_v9  ;;  %v626_v9 = vsel %vm585_vm2, %v3506_v5, %v3515_v4  ;;  %v3742_v5 = vpack.i.bf16 %v4957_v55, %v4954_v13 }
 0x1ff   : > { %3703 = vrot.lane.b32.xlu1 %v4402_v35, %s4162_s26  ;;  %7696 = vst [vmem:[#allocation77_spill] sm:$0xff] %v5110_v61  ;;  %v3516_v35 = vunpack.i.h.bf16 %v4850_v27  ;;  %v7364_v59 = vunpack.i.h.bf16 %v5098_v34  ;;  %v3610_v3 = vunpack.i.l.bf16 %v5098_v34  ;;  %v3752_v13 = vpack.i.bf16 %v4623_v24, %v4460_v57 }
 0x200   : > { %3708 = vrot.lane.b32.xlu0 %v3707_v30, %s4162_s26  ;;  %v3712_v30 = vpack.i.bf16 %v5110_v61, %v5105_v7  ;;  %v3747_v57 = vpack.i.bf16 %v4965_v38, %v4962_v25  ;;  %v7708_v25 = vpack.i.bf16 %v4723_v19, %v4690_v58  ;;  %v3590_v58 = vunpack.i.l.bf16 %v5035_v26  ;;  %v7709_v19 = vld [vmem:[#allocation51_spill] sm:$0xff] }
 0x201   : > { %v5127_v53 = vsel %vm585_vm2, %v3581_v62, %v3610_v3  ;;  %v5132_v27 = vsel %vm585_vm2, %v3610_v3, %v7364_v59  ;;  %v627_v51 = vsel %vm585_vm2, %v3515_v4, %v3516_v35  ;;  %v7700_v3 = vpack.i.bf16 %v4613_v2, %v4559_v6 }
 0x202   : > { %v3619_v10 = vpop.permute.xlu1 %3618  ;;  %v5138_v12 = vpack.c.bf16 %v5119_v45, %v5127_v53  ;;  %v5142_v49 = vpack.c.bf16 %v5124_v48, %v5132_v27  ;;  %v7701_v59 = vunpack.i.h.bf16 %v4872_v42 }
 0x203   : > { %3718 = vrot.lane.b32.xlu1 %v3717_v17, %s4162_s26  ;;  %v3621_v17 = vunpack.i.h.bf16 %v3619_v10  ;;  %v3620_v62 = vunpack.i.l.bf16 %v3619_v10  ;;  %v3722_v10 = vpack.i.bf16 %v627_v51, %v626_v9 }
 0x204   : > { %7698 = vst [vmem:[#allocation78_spill] sm:$0xff] %v5138_v12  ;;  %7699 = vst [vmem:[#allocation79_spill] sm:$0xff] %v5142_v49  ;;  %3713 = vrot.lane.b32.xlu0 %v3712_v30, %s4162_s26 }
 0x205   : > { %v640_v12 = vsel %vm585_vm2, %v7701_v59, %v3620_v62  ;;  %v641_v61 = vsel %vm585_vm2, %v3620_v62, %v3621_v17  ;;  %v7713_v62 = vld [vmem:[#allocation22_spill] sm:$0xff] }
 0x206   : > { %v5155_v49 = vpop.permute.xlu1 %3623  ;;  %v5159_v4 = vpack.c.bf16 %v641_v61, %v625_v41  ;;  %v5161_v30 = vpack.c.bf16 %v640_v12, %v624_v22  ;;  %v7369_v22 = vmov 0   ;;  %v7706_v41 = vpack.i.bf16 %v4687_v14, %v4590_v47 }
 0x207   : > { %3733 = vrot.lane.b32.xlu1 %v7700_v3, %s4162_s26  ;;  %v3626_v8 = vunpack.i.h.bf16 %v5155_v49  ;;  %v3625_v6 = vunpack.i.l.bf16 %v5155_v49  ;;  %1413 = vmatprep.mubr.bf16.mxu0 %v7369_v22  ;;  %v3566_v14 = vunpack.i.h.bf16 %v5026_v31  ;;  %v3565_v47 = vunpack.i.l.bf16 %v5026_v31  ;;  %v7716_v3 = vld [vmem:[#allocation23_spill] sm:$0xff] }
 0x208   : > { %7702 = vst [vmem:[#allocation80_spill] sm:$0xff] %v5159_v4  ;;  %7703 = vst [vmem:[#allocation81_spill] sm:$0xff] %v5161_v30  ;;  %3723 = vrot.lane.b32.xlu0 %v3722_v10, %s4162_s26  ;;  %1456 = vmatprep.mubr.bf16.mxu1 %v7369_v22  ;;  %v3560_v49 = vunpack.i.l.bf16 %v5008_v18 }
 0x209   : > { %v642_v2 = vsel %vm585_vm2, %v3621_v17, %v3625_v6  ;;  %v643_v42 = vsel %vm585_vm2, %v3625_v6, %v3626_v8  ;;  %v5210_v38 = vsel %vm585_vm2, %v3516_v35, %v3565_v47  ;;  %v5232_v31 = vsel %vm585_vm2, %v3566_v14, %v3590_v58 }
 0x20a   : > { %v5173_v55 = vpack.c.bf16 %v643_v42, %v627_v51  ;;  %v5175_v59 = vpack.c.bf16 %v642_v2, %v626_v9  ;;  %v3772_v51 = vpack.i.bf16 %v641_v61, %v640_v12  ;;  %v3777_v17 = vpack.i.bf16 %v643_v42, %v642_v2 }
 0x20b   : > { %3743 = vrot.lane.b32.xlu1 %v3742_v5, %s4162_s26  ;;  %v3837_v12 = vpack.i.bf16 %v5132_v27, %v5127_v53 }
 0x20c   : > { %7704 = vst [vmem:[#allocation82_spill] sm:$0xff] %v5173_v55  ;;  %7705 = vst [vmem:[#allocation83_spill] sm:$0xff] %v5175_v59  ;;  %3728 = vrot.lane.b32.xlu0 %v4949_v1, %s4161_s23 }
 0x20f   : > { %3753 = vrot.lane.b32.xlu1 %v3752_v13, %s4161_s23 }
 0x210   : > { %3738 = vrot.lane.b32.xlu0 %v7706_v41, %s4162_s26  ;;  %v7717_v41 = vld [vmem:[#allocation66_spill] sm:$0xff] }
 0x213   : > { %3763 = vrot.lane.b32.xlu1 %v4422_v43, %s4162_s26  ;;  %v7707_v43 = vpack.i.bf16 %v4643_v23, %v4616_v44  ;;  %v3817_v23 = vpack.i.bf16 %v5045_v46, %v5042_v29  ;;  %v3842_v46 = vpack.i.bf16 %v5124_v48, %v5119_v45  ;;  %v7714_v45 = vld [vmem:[#allocation46_spill] sm:$0xff]  ;;  %v7715_v48 = vld [vmem:[#allocation47_spill] sm:$0xff] }
 0x214   : > { %3748 = vrot.lane.b32.xlu0 %v3747_v57, %s4162_s26  ;;  %v3867_v9 = vpack.i.bf16 %v7715_v48, %v7714_v45  ;;  %v7373_v57 = vunpack.i.h.bf16 %v7717_v41 }
 0x217   : > { %3773 = vrot.lane.b32.xlu1 %v3772_v51, %s4162_s26 }
 0x218   : > { %3758 = vrot.lane.b32.xlu0 %v5014_v37, %s4161_s23 }
 0x21b   : > { %3778 = vrot.lane.b32.xlu1 %v3777_v17, %s4162_s26 }
 0x21c   : > { %3768 = vrot.lane.b32.xlu0 %v4437_v50, %s4162_s26  ;;  %v5213_v50 = vsel %vm585_vm2, %v3565_v47, %v3566_v14  ;;  %v7371_v14 = vunpack.i.h.bf16 %v5006_v11  ;;  %v7374_v47 = vunpack.i.l.bf16 %v5006_v11 }
 0x21d   : > { %v3807_v44 = vpack.i.bf16 %v5213_v50, %v5210_v38 }
 0x21f   : > { %3783 = vrot.lane.b32.xlu1 %v7707_v43, %s4162_s26  ;;  %v7375_v43 = vunpack.i.l.bf16 %v7717_v41 }
 0x220   : > { %3788 = vrot.lane.b32.xlu0 %v7708_v25, %s4162_s26 }
 0x223   : > { %3793 = vrot.lane.b32.xlu1 %v4729_v39, %s4161_s23  ;;  %v7372_v39 = vunpack.i.h.bf16 %v5035_v26 }
 0x224   : > { %3798 = vrot.lane.b32.xlu0 %v4473_v60, %s4162_s26  ;;  %v3832_v60 = vpack.i.bf16 %v4885_v52, %v7709_v19 }
 0x225   : > { %v5237_v29 = vsel %vm585_vm2, %v3590_v58, %v7372_v39  ;;  %v7377_v58 = vunpack.i.h.bf16 %v5055_v63 }
 0x226   : > { %7710 = vst [vmem:[#allocation51_spill] sm:$0xff] %v5237_v29  ;;  %v3822_v61 = vpack.i.bf16 %v5237_v29, %v5232_v31 }
 0x227   : > { %3803 = vrot.lane.b32.xlu1 %v4457_v56, %s4162_s26  ;;  %v3812_v56 = vpack.i.bf16 %v5051_v20, %v5048_v54  ;;  %v7711_v54 = vld [vmem:[#allocation38_spill] sm:$0xff]  ;;  %v7712_v20 = vld [vmem:[#allocation45_spill] sm:$0xff] }
 0x228   : > { %3808 = vrot.lane.b32.xlu0 %v3807_v44, %s4162_s26  ;;  %v3827_v35 = vpack.i.bf16 %v7712_v20, %v7711_v54 }
 0x22b   : > { %3818 = vrot.lane.b32.xlu1 %v3817_v23, %s4162_s26 }
 0x22c   : > { %3813 = vrot.lane.b32.xlu0 %v3812_v56, %s4162_s26  ;;  %v5296_v56 = vsel %vm986_vm3, %v7374_v47, %v7371_v14 }
 0x22f   : > { %3833 = vrot.lane.b32.xlu1 %v3832_v60, %s4162_s26  ;;  %v7378_v60 = vunpack.i.l.bf16 %v5055_v63 }
 0x230   : > { %3823 = vrot.lane.b32.xlu0 %v3822_v61, %s4162_s26 }
 0x231   : > { %v5323_v39 = vsel %vm986_vm3, %v7378_v60, %v7377_v58 }
 0x233   : > { %3843 = vrot.lane.b32.xlu1 %v3842_v46, %s4162_s26 }
 0x234   : > { %3828 = vrot.lane.b32.xlu0 %v3827_v35, %s4162_s26 }
 0x238   : > { %3838 = vrot.lane.b32.xlu0 %v3837_v12, %s4162_s26 }
 0x23c   : > { %3848 = vrot.lane.b32.xlu0 %v7713_v62, %s4162_s26  ;;  %v5308_v62 = vsel %vm986_vm3, %v7375_v43, %v7373_v57 }
 0x240   : > { %3868 = vrot.lane.b32.xlu0 %v3867_v9, %s4162_s26 }
 0x244   : > { %3878 = vrot.lane.b32.xlu0 %v7716_v3, %s4162_s26 }
 0x252   : > { %v3629_v10 = vpop.permute.xlu0 %3628  ;;  %v5260_v5 = vpop.permute.xlu1 %3638 }
 0x253   : > { %v3631_v46 = vunpack.i.h.bf16 %v3629_v10  ;;  %v3640_v61 = vunpack.i.l.bf16 %v5260_v5  ;;  %v3630_v22 = vunpack.i.l.bf16 %v3629_v10 }
 0x255   : > { %v1085_v24 = vsel %vm986_vm3, %v3630_v22, %v3631_v46 }
 0x256   : > { %v5262_v6 = vpop.permute.xlu0 %3633  ;;  %v5264_v2 = vpop.permute.xlu1 %3648 }
 0x257   : > { %v3636_v57 = vunpack.i.h.bf16 %v5262_v6  ;;  %v3635_v47 = vunpack.i.l.bf16 %v5262_v6 }
 0x25a   : > { %v3644_v53 = vpop.permute.xlu0 %3643 }
 0x25b   : > { %v3646_v42 = vunpack.i.h.bf16 %v3644_v53  ;;  %v3645_v13 = vunpack.i.l.bf16 %v3644_v53 }
 0x25d   : > { %v5266_v27 = vpop.permute.xlu1 %3653  ;;  %v5272_v51 = vsel %vm585_vm2, %v3626_v8, %v3645_v13  ;;  %v5275_v17 = vsel %vm585_vm2, %v3645_v13, %v3646_v42  ;;  %v7376_v8 = vunpack.i.h.bf16 %v5008_v18 }
 0x25e   : > { %7718 = vst [vmem:[#allocation38_spill] sm:$0xff] %v5275_v17  ;;  %v3852_v25 = vpack.i.bf16 %v5275_v17, %v5272_v51  ;;  %v5282_v23 = vpop.permute.xlu0 %3668  ;;  %v3655_v9 = vunpack.i.l.bf16 %v5266_v27 }
 0x25f   : > { %7719 = vst [vmem:[#allocation22_spill] sm:$0xff] %v5282_v23  ;;  %v1053_v13 = vsel %vm986_vm3, %v3560_v49, %v7376_v8  ;;  %v1086_v8 = vsel %vm986_vm3, %v3631_v46, %v3640_v61 }
 0x260   : > { %3853 = vrot.lane.b32.xlu1 %v3852_v25, %s4162_s26 }
 0x261   : > { %v5284_v44 = vpop.permute.xlu1 %3658 }
 0x262   : > { %v5299_v35 = vpop.permute.xlu0 %3673  ;;  %v3660_v25 = vunpack.i.l.bf16 %v5284_v44 }
 0x265   : > { %v5301_v12 = vpop.permute.xlu1 %3663 }
 0x266   : > { %v7380_v3 = vunpack.i.h.bf16 %v5301_v12  ;;  %v3665_v53 = vunpack.i.l.bf16 %v5301_v12  ;;  %v5338_v58 = vpop.permute.xlu0 %3688 }
 0x267   : > { %7721 = vst [vmem:[#allocation66_spill] sm:$0xff] %v5338_v58  ;;  %v7386_v14 = vunpack.i.l.bf16 %v5338_v58 }
 0x268   : > { %v5328_v43 = vsel %vm585_vm2, %v3646_v42, %v3665_v53  ;;  %v5333_v10 = vsel %vm585_vm2, %v3665_v53, %v7380_v3  ;;  %v7722_v53 = vunpack.i.h.bf16 %v5260_v5 }
 0x269   : > { %7720 = vst [vmem:[#allocation23_spill] sm:$0xff] %v5333_v10  ;;  %v3679_v60 = vpop.permute.xlu1 %3678  ;;  %v3857_v6 = vpack.i.bf16 %v5333_v10, %v5328_v43  ;;  %v1084_v42 = vsel %vm986_vm3, %v7386_v14, %v3630_v22 }
 0x26a   : > { %v3681_v1 = vunpack.i.h.bf16 %v3679_v60  ;;  %v3680_v48 = vunpack.i.l.bf16 %v3679_v60  ;;  %v1087_v3 = vsel %vm986_vm3, %v3640_v61, %v7722_v53  ;;  %v7723_v60 = vunpack.i.h.bf16 %v5338_v58  ;;  %v5361_v52 = vpop.permute.xlu0 %3693 }
 0x26b   : > { %3858 = vrot.lane.b32.xlu1 %v3857_v6, %s4162_s26  ;;  %v1069_v61 = vsel %vm986_vm3, %v3635_v47, %v3636_v57  ;;  %v7390_v22 = vunpack.i.h.bf16 %v5361_v52  ;;  %v3695_v14 = vunpack.i.l.bf16 %v5361_v52  ;;  %v7727_v53 = vunpack.i.h.bf16 %v5264_v2 }
 0x26c   : > { %v1101_v10 = vsel %vm986_vm3, %v3680_v48, %v3681_v1  ;;  %v1100_v29 = vsel %vm986_vm3, %v7723_v60, %v3680_v48  ;;  %v7726_v48 = vunpack.i.l.bf16 %v5264_v2 }
 0x26d   : > { %v5363_v6 = vpop.permute.xlu1 %3683  ;;  %v5365_v46 = vpack.c.bf16 %v1101_v10, %v1085_v24  ;;  %v5367_v20 = vpack.c.bf16 %v1100_v29, %v1084_v42  ;;  %v1068_v58 = vsel %vm986_vm3, %v7727_v53, %v3635_v47  ;;  %v7728_v24 = vld [vmem:[#allocation25_spill] sm:$0xff]  ;;  %v5382_v29 = vpack.c.bf16 %v1069_v61, %v1053_v13 }
 0x26e   : > { %7724 = vst [vmem:[#allocation84_spill] sm:$0xff] %v5363_v6  ;;  %v1052_v60 = vsel %vm986_vm3, %v7726_v48, %v3560_v49  ;;  %v7730_v10 = vunpack.i.h.bf16 %v5266_v27  ;;  %v3675_v48 = vunpack.i.l.bf16 %v5299_v35  ;;  %v1102_v47 = vsel %vm986_vm3, %v3681_v1, %v3695_v14 }
 0x26f   : > { %7725 = vst [vmem:[#allocation85_spill] sm:$0xff] %v5365_v46  ;;  %1381 = vmatprep.subr.bf16.mxu0 %v5365_v46  ;;  %3863 = vrot.lane.b32.xlu1 %v7728_v24, %s4162_s26  ;;  %7729 = vst [vmem:[#allocation25_spill] sm:$0xff] %v5382_v29  ;;  %v1103_v53 = vsel %vm986_vm3, %v3695_v14, %v7390_v22  ;;  %v7731_v24 = vunpack.i.h.bf16 %v5284_v44  ;;  %v5397_v61 = vpack.c.bf16 %v1102_v47, %v1086_v8  ;;  %v7748_v46 = vld [vmem:[#allocation32_spill] sm:$0xff] }
 0x270   : > { %v1037_v42 = vsel %vm986_vm3, %v3655_v9, %v7730_v10  ;;  %1382 = vmatpush1.bf16.msra.mxu0 %v5367_v20  ;;  %v5399_v45 = vpack.c.bf16 %v1103_v53, %v1087_v3  ;;  %v5401_v10 = vpop.permute.xlu0 %3698  ;;  %v7734_v1 = vunpack.i.h.bf16 %v5053_v33  ;;  %v7735_v14 = vunpack.i.l.bf16 %v5053_v33 }
 0x271   : > { %v1071_v13 = vsel %vm986_vm3, %v3660_v25, %v7731_v24  ;;  %7732 = vst [vmem:[#allocation86_spill] sm:$0xff] %v5397_v61  ;;  %v5403_v49 = vpop.permute.xlu1 %3703  ;;  %1383 = vmatprep.subr.bf16.mxu0 %v5382_v29  ;;  %v3605_v24 = vunpack.i.l.bf16 %v5076_v0  ;;  %v5413_v8 = vpack.c.bf16 %v1068_v58, %v1052_v60  ;;  %v5416_v3 = vpack.c.bf16 %v1037_v42, %v5308_v62 }
 0x272   : > { %7733 = vst [vmem:[#allocation87_spill] sm:$0xff] %v5399_v45  ;;  %v1005_v22 = vsel %vm986_vm3, %v7735_v14, %v7734_v1  ;;  %1424 = vmatprep.subr.bf16.mxu1 %v5399_v45  ;;  %v7737_v29 = vpack.i.bf16 %v4861_v15, %v4856_v16  ;;  %v7738_v1 = vunpack.i.l.bf16 %v7717_v41  ;;  %v7739_v14 = vunpack.i.l.bf16 %v5282_v23 }
 0x273   : > { %7736 = vst [vmem:[#allocation88_spill] sm:$0xff] %v5416_v3  ;;  %v7740_v62 = vunpack.i.h.bf16 %v5282_v23  ;;  %v1070_v42 = vsel %vm986_vm3, %v3636_v57, %v3660_v25  ;;  %v7741_v47 = vunpack.i.h.bf16 %v5299_v35  ;;  %v3700_v45 = vunpack.i.l.bf16 %v5401_v10  ;;  %1425 = vmatpush1.bf16.msra.mxu1 %v5397_v61  ;;  %v7784_v61 = vld [vmem:[#allocation59_spill] sm:$0xff] }
 0x274   : > { %3873 = vrot.lane.b32.xlu1 %v7737_v29, %s4162_s26  ;;  %v1020_v58 = vsel %vm986_vm3, %v7739_v14, %v7738_v1  ;;  %1384 = vmatpush1.bf16.msra.mxu0 %v5413_v8  ;;  %v5439_v29 = vpack.c.bf16 %v1071_v13, %v5296_v56  ;;  %v3705_v14 = vunpack.i.l.bf16 %v5403_v49  ;;  %v5446_v57 = vpop.permute.xlu0 %3708  ;;  %v7743_v25 = vunpack.i.l.bf16 %v5006_v11 }
 0x275   : > { %v1036_v60 = vsel %vm986_vm3, %v7740_v62, %v3655_v9  ;;  %v1039_v53 = vsel %vm986_vm3, %v3675_v48, %v7741_v47  ;;  %v5448_v9 = vpop.permute.xlu1 %3718  ;;  %1385 = vmatprep.subr.bf16.mxu0 %v5416_v3  ;;  %v7744_v56 = vunpack.i.h.bf16 %v5008_v18  ;;  %v5460_v62 = vpack.c.bf16 %v1005_v22, %v5323_v39 }
 0x276   : > { %7742 = vst [vmem:[#allocation89_spill] sm:$0xff] %v5439_v29  ;;  %1426 = vmatprep.subr.bf16.mxu1 %v5439_v29  ;;  %v5457_v47 = vpack.c.bf16 %v1036_v60, %v1020_v58  ;;  %v7747_v1 = vunpack.i.h.bf16 %v5076_v0  ;;  %v7750_v18 = vunpack.i.l.bf16 %v5055_v63  ;;  %v7752_v58 = vunpack.i.l.bf16 %v5053_v33 }
 0x277   : > { %v1054_v13 = vsel %vm986_vm3, %v7744_v56, %v7743_v25  ;;  %7746 = vst [vmem:[#allocation91_spill] sm:$0xff] %v5460_v62  ;;  %v7751_v25 = vunpack.i.l.bf16 %v5363_v6  ;;  %v7753_v39 = vunpack.i.h.bf16 %v5363_v6  ;;  %v7754_v60 = vunpack.i.h.bf16 %v5266_v27 }
 0x278   : > { %7745 = vst [vmem:[#allocation90_spill] sm:$0xff] %v5457_v47  ;;  %v1023_v17 = vsel %vm986_vm3, %v3605_v24, %v7747_v1  ;;  %3883 = vrot.lane.b32.xlu1 %v7748_v46, %s4162_s26  ;;  %v5467_v3 = vpack.c.bf16 %v1070_v42, %v1054_v13  ;;  %1386 = vmatpush1.bf16.msra.mxu0 %v5457_v47  ;;  %v7756_v46 = vunpack.i.h.bf16 %v5401_v10  ;;  %v7757_v13 = vunpack.i.h.bf16 %v5403_v49  ;;  %v7792_v47 = vld [vmem:[#allocation53_spill] sm:$0xff] }
 0x279   : > { %v988_v56 = vsel %vm986_vm3, %v7751_v25, %v7750_v18  ;;  %v1004_v22 = vsel %vm986_vm3, %v7753_v39, %v7752_v58  ;;  %v1038_v1 = vsel %vm986_vm3, %v7754_v60, %v3675_v48  ;;  %v5482_v29 = vpack.c.bf16 %v1039_v53, %v1023_v17  ;;  %v5492_v25 = vpop.permute.xlu0 %3713  ;;  %v5494_v27 = vpop.permute.xlu1 %3733  ;;  %1387 = vmatprep.subr.bf16.mxu0 %v5460_v62  ;;  %v7773_v62 = vld [vmem:[#allocation64_spill] sm:$0xff] }
 0x27a   : > { %7749 = vst [vmem:[#allocation32_spill] sm:$0xff] %v5467_v3  ;;  %v991_v42 = vsel %vm986_vm3, %v3700_v45, %v7756_v46  ;;  %v1007_v18 = vsel %vm986_vm3, %v3705_v14, %v7757_v13  ;;  %1427 = vmatpush1.bf16.msra.mxu1 %v5467_v3  ;;  %v7758_v17 = vunpack.i.h.bf16 %v7717_v41  ;;  %v5501_v53 = vpack.c.bf16 %v1004_v22, %v988_v56  ;;  %v7764_v22 = vld [vmem:[#allocation60_spill] sm:$0xff] }
 0x27b   : > { %7755 = vst [vmem:[#allocation92_spill] sm:$0xff] %v5482_v29  ;;  %1428 = vmatprep.subr.bf16.mxu1 %v5482_v29  ;;  %v7761_v39 = vunpack.i.h.bf16 %v5055_v63  ;;  %v7762_v46 = vunpack.i.h.bf16 %v5053_v33  ;;  %v5512_v41 = vpack.c.bf16 %v1007_v18, %v991_v42  ;;  %v3985_v33 = vld [vmem:[%s4309_s4 + $0x10] sm:$0xff]  ;;  %v7765_v63 = vld [vmem:[#allocation12_spill] sm:$0xff]  ;;  %v7772_v29 = vld [vmem:[#allocation13_spill] sm:$0xff]  ;;  %v7789_v6 = vunpack.i.h.bf16 %v5074_v21 }
 0x27c   : > { %v1022_v48 = vsel %vm986_vm3, %v7758_v17, %v3605_v24  ;;  %7759 = vst [vmem:[#allocation93_spill] sm:$0xff] %v5501_v53  ;;  %1388 = vmatpush1.bf16.msra.mxu0 %v5501_v53  ;;  %v7768_v42 = vld [vmem:[#allocation18_spill] sm:$0xff]  ;;  %v3987_v17 = vld [vmem:[%s4309_s4 + $0x20] sm:$0xff]  ;;  %v7791_v15 = vunpack.i.h.bf16 %v5098_v34 }
 0x27d   : > { %v5503_v58 = vpack.c.bf16 %v1038_v1, %v1022_v48  ;;  %v990_v60 = vsel %vm986_vm3, %v7761_v39, %v3700_v45  ;;  %v1006_v13 = vsel %vm986_vm3, %v7762_v46, %v3705_v14  ;;  %7763 = vst [vmem:[#allocation95_spill] sm:$0xff] %v5512_v41  ;;  %v5515_v24 = vpop.permute.xlu0 %3723  ;;  %v5517_v56 = vpop.permute.xlu1 %3743  ;;  %1389 = vmatprep.subr.bf16.mxu0 %v7764_v22  ;;  %v3986_v1 = vld [vmem:[%s4309_s4 + $0x8] sm:$0xff]  ;;  %v3988_v46 = vld [vmem:[%s4309_s4 + $0x18] sm:$0xff] }
 0x27e   : > { %v5523_v45 = vpack.c.bf16 %v7765_v63, %v3985_v33  ;;  %v5525_v14 = vpack.c.bf16 %v1006_v13, %v990_v60  ;;  %v5529_v18 = vpack.c.bf16 %v7768_v42, %v3986_v1  ;;  %v7770_v48 = vld [vmem:[#allocation14_spill] sm:$0xff]  ;;  %v5537_v22 = vpack.c.bf16 %v7772_v29, %v3988_v46  ;;  %v7776_v60 = vld [vmem:[#allocation27_spill] sm:$0xff]  ;;  %v7778_v1 = vld [vmem:[#allocation36_spill] sm:$0xff] }
 0x27f   : > { %7760 = vst [vmem:[#allocation94_spill] sm:$0xff] %v5503_v58  ;;  %1429 = vmatpush1.bf16.msra.mxu1 %v5503_v58  ;;  %v5533_v39 = vpack.c.bf16 %v7770_v48, %v3987_v17  ;;  %v5546_v13 = vpack.c.bf16 %v4534_v28, %v7776_v60  ;;  %v5549_v63 = vld [vmem:[%s4309_s4 + $0x70] sm:$0xff]  ;;  %v3990_v17 = vld [vmem:[%s4309_s4 + $0x80] sm:$0xff]  ;;  %v3715_v28 = vunpack.i.l.bf16 %v5492_v25  ;;  %v3725_v23 = vunpack.i.l.bf16 %v5515_v24 }
 0x280   : > { %1430 = vmatprep.subr.bf16.mxu1 %v5512_v41  ;;  %7766 = vst [vmem:[#allocation12_spill] sm:$0xff] %v5523_v45  ;;  %7767 = vst [vmem:[#allocation96_spill] sm:$0xff] %v5525_v14  ;;  %1390 = vmatpush1.bf16.msra.mxu0 %v7773_v62  ;;  %v7774_v41 = vld [vmem:[#allocation26_spill] sm:$0xff]  ;;  %v7779_v48 = vld [vmem:[#allocation33_spill] sm:$0xff]  ;;  %v3716_v62 = vunpack.i.h.bf16 %v5492_v25 }
 0x281   : > { %7769 = vst [vmem:[#allocation18_spill] sm:$0xff] %v5529_v18  ;;  %7771 = vst [vmem:[#allocation14_spill] sm:$0xff] %v5533_v39  ;;  %v5542_v33 = vpack.c.bf16 %v4540_v36, %v7774_v41  ;;  %v5555_v58 = vpack.i.bf16 %v7779_v48, %v3990_v17  ;;  %v7780_v29 = vld [vmem:[#allocation43_spill] sm:$0xff]  ;;  %v3711_v36 = vunpack.i.h.bf16 %v5446_v57  ;;  %v3710_v41 = vunpack.i.l.bf16 %v5446_v57  ;;  %v5565_v60 = vpop.permute.xlu0 %3728  ;;  %v5567_v3 = vpop.permute.xlu1 %3753  ;;  %v7783_v42 = vld [vmem:[#allocation50_spill] sm:$0xff] }
 0x282   : > { %7777 = vst [vmem:[#allocation26_spill] sm:$0xff] %v5546_v13  ;;  %v5559_v46 = vpack.c.bf16 %v4982_v32, %v7780_v29  ;;  %7782 = vst [vmem:[#allocation33_spill] sm:$0xff] %v5565_v60  ;;  %1391 = vmatprep.subr.bf16.mxu0 %v7783_v42  ;;  %v7420_v48 = vunpack.i.l.bf16 %v5565_v60  ;;  %v7785_v17 = vunpack.i.h.bf16 %v5035_v26  ;;  %v7786_v32 = vunpack.i.h.bf16 %v5565_v60 }
 0x283   : > { %7775 = vst [vmem:[#allocation13_spill] sm:$0xff] %v5542_v33  ;;  %1431 = vmatpush1.bf16.msra.mxu1 %v5525_v14  ;;  %v3720_v14 = vunpack.i.l.bf16 %v5448_v9  ;;  %v7787_v29 = vunpack.i.h.bf16 %v5301_v12  ;;  %v7788_v57 = vunpack.i.h.bf16 %v5567_v3  ;;  %v7790_v53 = vunpack.i.l.bf16 %v5567_v3 }
 0x284   : > { %7781 = vst [vmem:[#allocation27_spill] sm:$0xff] %v5559_v46  ;;  %1432 = vmatprep.subr.bf16.mxu1 %v7784_v61  ;;  %v632_v42 = vsel %vm585_vm2, %v7785_v17, %v7420_v48  ;;  %1392 = vmatpush1.bf16.msra.mxu0 %v7792_v47  ;;  %v3735_v17 = vunpack.i.l.bf16 %v5494_v27  ;;  %v7802_v60 = vunpack.i.h.bf16 %v5448_v9 }
 0x285   : > { %v648_v61 = vsel %vm585_vm2, %v7787_v29, %v7786_v32  ;;  %v616_v25 = vsel %vm585_vm2, %v7789_v6, %v7788_v57  ;;  %v600_v26 = vsel %vm585_vm2, %v7791_v15, %v7790_v53  ;;  %v7794_v32 = vld [vmem:[#allocation58_spill] sm:$0xff]  ;;  %v5604_v29 = vpop.permute.xlu0 %3738  ;;  %v5606_v21 = vpop.permute.xlu1 %3763  ;;  %1393 = vmatprep.subr.bf16.mxu0 %v5542_v33  ;;  %v5610_v57 = vld [vmem:[%s4309_s4] sm:$0xff]  ;;  %v7796_v53 = vunpack.i.h.bf16 %v5260_v5 }
 0x286   : > { %v3897_v48 = vpack.i.bf16 %v648_v61, %v632_v42  ;;  %v5601_v12 = vpack.c.bf16 %v648_v61, %v632_v42  ;;  %v3887_v6 = vpack.i.bf16 %v616_v25, %v600_v26  ;;  %v7795_v15 = vld [vmem:[#allocation41_spill] sm:$0xff]  ;;  %v7797_v61 = vunpack.i.h.bf16 %v5006_v11 }
 0x287   : > { %1433 = vmatpush1.bf16.msra.mxu1 %v7794_v32  ;;  %v1088_v47 = vsel %vm986_vm3, %v7796_v53, %v3710_v41  ;;  %v1057_v33 = vsel %vm986_vm3, %v3715_v28, %v3716_v62  ;;  %v5628_v5 = vpack.c.bf16 %v616_v25, %v600_v26  ;;  %v1089_v11 = vsel %vm986_vm3, %v3710_v41, %v3711_v36  ;;  %v7805_v26 = vld [vmem:[#allocation49_spill] sm:$0xff] }
 0x288   : > { %7793 = vst [vmem:[#allocation43_spill] sm:$0xff] %v5601_v12  ;;  %v1056_v42 = vsel %vm986_vm3, %v7797_v61, %v3715_v28  ;;  %1434 = vmatprep.subr.bf16.mxu1 %v5559_v46  ;;  %v7798_v12 = vld [vmem:[#allocation48_spill] sm:$0xff]  ;;  %3888 = vrot.lane.b32.xlu1 %v3887_v6, %s4162_s26  ;;  %v7800_v53 = vunpack.i.h.bf16 %v5284_v44  ;;  %v3745_v28 = vunpack.i.l.bf16 %v5517_v56  ;;  %v1073_v6 = vsel %vm986_vm3, %v3720_v14, %v7802_v60 }
 0x289   : > { %v3892_v32 = vpack.i.bf16 %v5021_v40, %v7798_v12  ;;  %3898 = vrot.lane.b32.xlu0 %v3897_v48, %s4162_s26  ;;  %7799 = vst [vmem:[#allocation41_spill] sm:$0xff] %v5628_v5  ;;  %v7801_v40 = vld [vmem:[#allocation29_spill] sm:$0xff]  ;;  %v7803_v48 = vunpack.i.h.bf16 %v5076_v0  ;;  %v7804_v41 = vunpack.i.h.bf16 %v5494_v27  ;;  %v3774_v34 = vpop.permute.xlu1 %3773  ;;  %v1090_v5 = vsel %vm986_vm3, %v3711_v36, %v3725_v23 }
 0x28a   : > { %v1072_v61 = vsel %vm986_vm3, %v7800_v53, %v3720_v14  ;;  %1394 = vmatpush1.bf16.msra.mxu0 %v7801_v40  ;;  %v5651_v53 = vpop.permute.xlu0 %3748  ;;  %v5656_v14 = vpack.c.bf16 %v1073_v6, %v1057_v33  ;;  %v3776_v0 = vunpack.i.h.bf16 %v3774_v34  ;;  %v3775_v60 = vunpack.i.l.bf16 %v3774_v34 }
 0x28b   : > { %v5643_v25 = vsel %vm986_vm3, %v7803_v48, %v3735_v17  ;;  %v5648_v44 = vsel %vm986_vm3, %v3735_v17, %v7804_v41  ;;  %1435 = vmatpush1.bf16.msra.mxu1 %v7805_v26  ;;  %1395 = vmatprep.subr.bf16.mxu0 %v5523_v45  ;;  %v5654_v12 = vpack.c.bf16 %v1072_v61, %v1056_v42  ;;  %v7807_v48 = vld [vmem:[#allocation28_spill] sm:$0xff]  ;;  %v7808_v17 = vunpack.i.h.bf16 %v5515_v24 }
 0x28c   : > { %7806 = vst [vmem:[#allocation29_spill] sm:$0xff] %v5656_v14  ;;  %1436 = vmatprep.subr.bf16.mxu1 %v7807_v48  ;;  %v3740_v26 = vunpack.i.l.bf16 %v5604_v29  ;;  %3893 = vrot.lane.b32.xlu1 %v3892_v32, %s4162_s26  ;;  %v1058_v42 = vsel %vm986_vm3, %v3716_v62, %v3745_v28  ;;  %v7809_v33 = vunpack.i.h.bf16 %v5517_v56  ;;  %v7810_v61 = vunpack.i.h.bf16 %v5361_v52 }
 0x28d   : > { %v1091_v41 = vsel %vm986_vm3, %v3725_v23, %v7808_v17  ;;  %v1105_v6 = vsel %vm986_vm3, %v3775_v60, %v3776_v0  ;;  %v5675_v23 = vld [vmem:[#allocation5 + $0x4] ss:$16 sps:$4 sm:$0xff]   ;;  %v3750_v32 = vunpack.i.l.bf16 %v5651_v53  ;;  %v5680_v46 = vpop.permute.xlu1 %3778  ;;  %v7812_v17 = vunpack.i.h.bf16 %v5299_v35 }
 0x28e   : > { %v1059_v34 = vsel %vm986_vm3, %v3745_v28, %v7809_v33  ;;  %v1104_v36 = vsel %vm986_vm3, %v7810_v61, %v3775_v60  ;;  %1396 = vmatpush1.bf16.msra.mxu0 %v5529_v18  ;;  %v3759_v62 = vpop.permute.xlu0 %3758  ;;  %v5682_v28 = vpack.c.bf16 %v1105_v6, %v1089_v11  ;;  %v7437_v60 = vunpack.i.h.bf16 %v5680_v46  ;;  %v7815_v6 = vld [vmem:[#allocation57_spill] sm:$0xff] }
 0x28f   : > { %1437 = vmatpush1.bf16.msra.mxu1 %v5546_v13  ;;  %v5684_v52 = vpack.c.bf16 %v1104_v36, %v1088_v47  ;;  %v3761_v33 = vunpack.i.h.bf16 %v3759_v62  ;;  %v3760_v61 = vunpack.i.l.bf16 %v3759_v62  ;;  %v3780_v48 = vunpack.i.l.bf16 %v5680_v46 }
 0x290   : > { %7811 = vst [vmem:[#allocation97_spill] sm:$0xff] %v5682_v28  ;;  %1438 = vmatprep.subr.bf16.mxu1 %v5533_v39  ;;  %v1040_v45 = vsel %vm986_vm3, %v7812_v17, %v3740_v26  ;;  %v7813_v13 = vunpack.i.h.bf16 %v5604_v29  ;;  %v3765_v47 = vunpack.i.l.bf16 %v5606_v21  ;;  %1467 = vmatprep.subr.bf16.mxu0 %v5682_v28  ;;  %v7814_v36 = vpack.i.bf16 %v7778_v1, %v5549_v63 }
 0x291   : > { %v7816_v62 = vunpack.i.h.bf16 %v7815_v6  ;;  %v7817_v17 = vunpack.i.l.bf16 %v7815_v6  ;;  %v1107_v11 = vsel %vm986_vm3, %v3780_v48, %v7437_v60  ;;  %1414 = vmatmul.mubr.bf16.vlgmr.msra.gmra.mxu0 %v5675_v23  ;;  %v7821_v1 = vmov 0  }
 0x292   : > { %v1041_v18 = vsel %vm986_vm3, %v3740_v26, %v7813_v13  ;;  %3913 = vrot.lane.b32.xlu1 %v7814_v36, %s4162_s26  ;;  %v1106_v26 = vsel %vm986_vm3, %v3776_v0, %v3780_v48  ;;  %1468 = vmatpush1.bf16.msra.mxu0 %v5684_v52  ;;  %v5725_v36 = vpop.permute.xlu1 %3783  ;;  %v5727_v0 = vpack.c.bf16 %v1107_v11, %v1091_v41  ;;  %v7819_v48 = vunpack.i.h.bf16 %v5448_v9 }
 0x293   : > { %v5705_v35 = vsel %vm585_vm2, %v3761_v33, %v7816_v62  ;;  %v5710_v13 = vsel %vm585_vm2, %v3760_v61, %v7817_v17  ;;  %1439 = vmatpush1.bf16.msra.mxu1 %v5537_v22  ;;  %v5723_v61 = vpop.permute.xlu0 %3768  ;;  %v7820_v62 = vunpack.i.h.bf16 %v5651_v53  ;;  %1469 = vmatprep.subr.bf16.mxu0 %v5656_v14  ;;  %v7822_v39 = vunpack.i.h.bf16 %v5401_v10 }
 0x294   : > { %v3902_v63 = vpack.i.bf16 %v5705_v35, %v5710_v13  ;;  %7818 = vst [vmem:[#allocation57_spill] sm:$0xff] %v5727_v0  ;;  %v1074_v6 = vsel %vm986_vm3, %v7819_v48, %v3750_v32  ;;  %v3771_v33 = vunpack.i.h.bf16 %v5723_v61  ;;  %v3770_v60 = vunpack.i.l.bf16 %v5723_v61  ;;  %1499 = vmatprep.mubr.bf16.mxu0 %v7821_v1  ;;  %1510 = vmatprep.subr.bf16.mxu1 %v5727_v0 }
 0x295   : > { %v1075_v17 = vsel %vm986_vm3, %v3750_v32, %v7820_v62  ;;  %v992_v41 = vsel %vm986_vm3, %v7822_v39, %v3765_v47  ;;  %v3785_v11 = vunpack.i.l.bf16 %v5725_v36  ;;  %v7823_v32 = vpack.i.bf16 %v7795_v15, %v5610_v57 }
 0x296   : > { %v5749_v61 = vpack.c.bf16 %v1106_v26, %v1090_v5  ;;  %v5752_v48 = vpack.c.bf16 %v1040_v45, %v5643_v25  ;;  %v5755_v10 = vpack.c.bf16 %v1041_v18, %v5648_v44  ;;  %v7826_v39 = vunpack.i.h.bf16 %v5606_v21  ;;  %3903 = vrot.lane.b32.xlu0 %v3902_v63, %s4162_s26  ;;  %1457 = vmatmul.mubr.bf16.vlgmr.msra.gmra.mxu1 %v5675_v23  ;;  %v3794_v25 = vpop.permute.xlu1 %3793 }
 0x297   : > { %3923 = vrot.lane.b32.xlu1 %v7823_v32, %s4162_s26  ;;  %v1009_v9 = vsel %vm986_vm3, %v3770_v60, %v3771_v33  ;;  %v5762_v0 = vpack.c.bf16 %v1074_v6, %v1058_v42  ;;  %v5764_v14 = vpack.c.bf16 %v1075_v17, %v1059_v34  ;;  %v7829_v5 = vunpack.i.h.bf16 %v5403_v49  ;;  %1470 = vmatpush1.bf16.msra.mxu0 %v5654_v12  ;;  %v5771_v18 = vpop.permute.xlu0 %3788 }
 0x298   : > { %7824 = vst [vmem:[#allocation98_spill] sm:$0xff] %v5749_v61  ;;  %7825 = vst [vmem:[#allocation99_spill] sm:$0xff] %v5755_v10  ;;  %v993_v62 = vsel %vm986_vm3, %v3765_v47, %v7826_v39  ;;  %1511 = vmatpush1.bf16.msra.mxu1 %v5749_v61  ;;  %v7447_v44 = vunpack.i.h.bf16 %v5771_v18  ;;  %v3790_v42 = vunpack.i.l.bf16 %v5771_v18  ;;  %v3796_v47 = vunpack.i.h.bf16 %v3794_v25  ;;  %1471 = vmatprep.subr.bf16.mxu0 %v5755_v10 }
 0x299   : > { %7827 = vst [vmem:[#allocation100_spill] sm:$0xff] %v5762_v0  ;;  %7828 = vst [vmem:[#allocation101_spill] sm:$0xff] %v5764_v14  ;;  %v1008_v45 = vsel %vm986_vm3, %v7829_v5, %v3770_v60  ;;  %v3795_v34 = vunpack.i.l.bf16 %v3794_v25  ;;  %v5777_v49 = vpack.c.bf16 %v1009_v9, %v993_v62  ;;  %v7831_v60 = vunpack.i.h.bf16 %v5494_v27  ;;  %1512 = vmatprep.subr.bf16.mxu1 %v5764_v14  ;;  %v7834_v27 = vld [vmem:[#allocation52_spill] sm:$0xff]  ;;  %v7859_v14 = vld [vmem:[#allocation35_spill] sm:$0xff] }
 0x29a   : > { %v7832_v63 = vunpack.i.h.bf16 %v5725_v36  ;;  %v7833_v17 = vunpack.i.h.bf16 %v5604_v29  ;;  %v1043_v9 = vsel %vm986_vm3, %v3790_v42, %v7447_v44  ;;  %v7835_v39 = vunpack.i.h.bf16 %v7834_v27  ;;  %1542 = vmatprep.mubr.bf16.mxu1 %v7821_v1 }
 0x29b   : > { %7830 = vst [vmem:[#allocation102_spill] sm:$0xff] %v5777_v49  ;;  %v1026_v26 = vsel %vm986_vm3, %v7831_v60, %v3785_v11  ;;  %3933 = vrot.lane.b32.xlu1 %v5555_v58, %s4161_s23  ;;  %1472 = vmatpush1.bf16.msra.mxu0 %v5752_v48  ;;  %v5810_v60 = vpop.permute.xlu0 %3798 }
 0x29c   : > { %v1027_v6 = vsel %vm986_vm3, %v3785_v11, %v7832_v63  ;;  %v1042_v32 = vsel %vm986_vm3, %v7833_v17, %v3790_v42  ;;  %v5797_v62 = vsel %vm585_vm2, %v3796_v47, %v7835_v39  ;;  %v7836_v11 = vunpack.i.l.bf16 %v7834_v27  ;;  %v5812_v42 = vpop.permute.xlu1 %3803  ;;  %1513 = vmatpush1.bf16.msra.mxu1 %v5762_v0  ;;  %1473 = vmatprep.subr.bf16.mxu0 %v5777_v49 }
 0x29d   : > { %v5805_v25 = vpack.c.bf16 %v1042_v32, %v1026_v26  ;;  %v5807_v29 = vpack.c.bf16 %v1043_v9, %v1027_v6  ;;  %v3800_v26 = vunpack.i.l.bf16 %v5810_v60  ;;  %v7445_v6 = vunpack.i.h.bf16 %v5812_v42 }
 0x29e   : > { %v5802_v5 = vsel %vm585_vm2, %v3795_v34, %v7836_v11  ;;  %v7446_v34 = vunpack.i.h.bf16 %v5810_v60  ;;  %v3805_v17 = vunpack.i.l.bf16 %v5812_v42  ;;  %v5824_v32 = vpack.c.bf16 %v1008_v45, %v992_v41 }
 0x29f   : > { %7837 = vst [vmem:[#allocation52_spill] sm:$0xff] %v5805_v25  ;;  %7838 = vst [vmem:[#allocation103_spill] sm:$0xff] %v5807_v29  ;;  %v3907_v47 = vpack.i.bf16 %v5797_v62, %v5802_v5  ;;  %1514 = vmatprep.subr.bf16.mxu1 %v5807_v29  ;;  %v7839_v9 = vunpack.i.h.bf16 %v5606_v21  ;;  %v5841_v45 = vpop.permute.xlu0 %3808 }
 0x2a0   : > { %v995_v39 = vsel %vm986_vm3, %v3800_v26, %v7446_v34  ;;  %v1010_v11 = vsel %vm986_vm3, %v3771_v33, %v3805_v17  ;;  %v1011_v63 = vsel %vm986_vm3, %v3805_v17, %v7445_v6  ;;  %1474 = vmatpush1.bf16.msra.mxu0 %v5824_v32  ;;  %v5839_v41 = vpop.permute.xlu1 %3818  ;;  %1515 = vmatpush1.bf16.msra.mxu1 %v5805_v25  ;;  %v7842_v33 = vld [vmem:[#allocation75_spill] sm:$0xff]  ;;  %v7850_v34 = vunpack.i.h.bf16 %v5517_v56 }
 0x2a1   : > { %3908 = vrot.lane.b32.xlu0 %v3907_v47, %s4162_s26  ;;  %v994_v27 = vsel %vm986_vm3, %v7839_v9, %v3800_v26  ;;  %v5843_v47 = vpack.c.bf16 %v1011_v63, %v995_v39  ;;  %1475 = vmatprep.subr.bf16.mxu0 %v5161_v30  ;;  %v5854_v26 = vpack.c.bf16 %v7842_v33, %v5105_v7  ;;  %v7452_v17 = vunpack.i.l.bf16 %v5839_v41  ;;  %v7844_v9 = vld [vmem:[#allocation61_spill] sm:$0xff]  ;;  %v7845_v39 = vld [vmem:[#allocation44_spill] sm:$0xff] }
 0x2a2   : > { %v5847_v21 = vpack.c.bf16 %v1010_v11, %v994_v27  ;;  %v7846_v11 = vld [vmem:[#allocation69_spill] sm:$0xff]  ;;  %v7848_v7 = vld [vmem:[#allocation56_spill] sm:$0xff]  ;;  %v7849_v33 = vunpack.i.h.bf16 %v5651_v53 }
 0x2a3   : > { %7840 = vst [vmem:[#allocation104_spill] sm:$0xff] %v5843_v47  ;;  %1516 = vmatprep.subr.bf16.mxu1 %v5843_v47  ;;  %7843 = vst [vmem:[#allocation75_spill] sm:$0xff] %v5854_v26  ;;  %v5858_v63 = vpop.permute.xlu0 %3813  ;;  %v7853_v53 = vld [vmem:[#allocation68_spill] sm:$0xff] }
 0x2a4   : > { %7841 = vst [vmem:[#allocation105_spill] sm:$0xff] %v5847_v21  ;;  %1476 = vmatpush1.bf16.msra.mxu0 %v7844_v9  ;;  %1517 = vmatpush1.bf16.msra.mxu1 %v5847_v21  ;;  %v3815_v27 = vunpack.i.l.bf16 %v5858_v63  ;;  %v1076_v6 = vsel %vm986_vm3, %v7849_v33, %v7452_v17  ;;  %v5878_v47 = vpop.permute.xlu1 %3833  ;;  %v7854_v33 = vld [vmem:[#allocation77_spill] sm:$0xff]  ;;  %v7855_v17 = vld [vmem:[#allocation76_spill] sm:$0xff] }
 0x2a5   : > { %3918 = vrot.lane.b32.xlu0 %v5014_v37, %s4162_s26  ;;  %1477 = vmatprep.subr.bf16.mxu0 %v5854_v26  ;;  %v5865_v37 = vpack.c.bf16 %v7846_v11, %v7845_v39  ;;  %v7852_v11 = vld [vmem:[#allocation34_spill] sm:$0xff]  ;;  %v5890_v56 = vpack.c.bf16 %v7855_v17, %v7854_v33  ;;  %v7860_v17 = vld [vmem:[#allocation39_spill] sm:$0xff] }
 0x2a6   : > { %1518 = vmatprep.subr.bf16.mxu1 %v5175_v59  ;;  %v1060_v44 = vsel %vm986_vm3, %v7850_v34, %v3815_v27  ;;  %v3835_v34 = vunpack.i.l.bf16 %v5878_v47  ;;  %v3993_v33 = vld [vmem:[%s4309_s4 + $0x28] sm:$0xff] }
 0x2a7   : > { %7847 = vst [vmem:[#allocation61_spill] sm:$0xff] %v5865_v37  ;;  %v5880_v29 = vpack.c.bf16 %v1076_v6, %v1060_v44  ;;  %v5883_v39 = vpop.permute.xlu0 %3823  ;;  %7856 = vst [vmem:[#allocation69_spill] sm:$0xff] %v5890_v56  ;;  %v3992_v44 = vld [vmem:[%s4309_s4 + $0x30] sm:$0xff]  ;;  %v7857_v6 = vld [vmem:[#allocation16_spill] sm:$0xff] }
 0x2a8   : > { %1478 = vmatpush1.bf16.msra.mxu0 %v5865_v37  ;;  %1519 = vmatpush1.bf16.msra.mxu1 %v5159_v4  ;;  %v5895_v59 = vpack.c.bf16 %v7857_v6, %v3992_v44  ;;  %v7863_v44 = vunpack.i.h.bf16 %v5771_v18  ;;  %v7864_v4 = vunpack.i.h.bf16 %v5725_v36  ;;  %v7869_v18 = vld [vmem:[#allocation17_spill] sm:$0xff]  ;;  %v3810_v36 = vunpack.i.l.bf16 %v5841_v45 }
 0x2a9   : > { %3928 = vrot.lane.b32.xlu0 %v7848_v7, %s4161_s23  ;;  %7851 = vst [vmem:[#allocation44_spill] sm:$0xff] %v5880_v29  ;;  %1479 = vmatprep.subr.bf16.mxu0 %v7852_v11  ;;  %v7861_v11 = vld [vmem:[#allocation15_spill] sm:$0xff] }
 0x2aa   : > { %1520 = vmatprep.subr.bf16.mxu1 %v7853_v53  ;;  %7858 = vst [vmem:[#allocation56_spill] sm:$0xff] %v5895_v59  ;;  %v5906_v30 = vpack.c.bf16 %v7861_v11, %v3993_v33  ;;  %v1044_v6 = vsel %vm986_vm3, %v7863_v44, %v3835_v34  ;;  %v3995_v11 = vld [vmem:[%s4309_s4 + $0x38] sm:$0xff] }
 0x2ab   : > { %v5898_v26 = vpop.permute.xlu0 %3828  ;;  %v5925_v33 = vpack.c.bf16 %v7869_v18, %v3995_v11 }
 0x2ac   : > { %1480 = vmatpush1.bf16.msra.mxu0 %v7859_v14  ;;  %1521 = vmatpush1.bf16.msra.mxu1 %v5890_v56  ;;  %v3830_v53 = vunpack.i.l.bf16 %v5898_v26  ;;  %7862 = vst [vmem:[#allocation77_spill] sm:$0xff] %v5906_v30  ;;  %v7866_v56 = vld [vmem:[#allocation19_spill] sm:$0xff]  ;;  %v7485_v25 = vunpack.i.h.bf16 %v5898_v26 }
 0x2ad   : > { %1481 = vmatprep.subr.bf16.mxu0 %v5895_v59  ;;  %1522 = vmatprep.subr.bf16.mxu1 %v7860_v17  ;;  %v3994_v59 = vld [vmem:[%s4309_s4 + $0x40] sm:$0xff]  ;;  %7870 = vst [vmem:[#allocation15_spill] sm:$0xff] %v5925_v33 }
 0x2ae   : > { %v1028_v49 = vsel %vm986_vm3, %v7864_v4, %v3830_v53  ;;  %v5919_v10 = vpack.c.bf16 %v7866_v56, %v3994_v59  ;;  %v7868_v17 = vld [vmem:[#allocation40_spill] sm:$0xff]  ;;  %v5932_v4 = vpop.permute.xlu1 %3843  ;;  %v3811_v59 = vunpack.i.h.bf16 %v5841_v45  ;;  %v3816_v56 = vunpack.i.h.bf16 %v5858_v63 }
 0x2af   : > { %v5914_v21 = vpack.c.bf16 %v1044_v6, %v1028_v49  ;;  %v5936_v49 = vpop.permute.xlu0 %3838  ;;  %v3821_v6 = vunpack.i.h.bf16 %v5839_v41  ;;  %v7872_v45 = vunpack.i.h.bf16 %v5680_v46  ;;  %v7492_v46 = vunpack.i.h.bf16 %v5883_v39 }
 0x2b0   : > { %1482 = vmatpush1.bf16.msra.mxu0 %v5906_v30  ;;  %7867 = vst [vmem:[#allocation16_spill] sm:$0xff] %v5919_v10  ;;  %1523 = vmatpush1.bf16.msra.mxu1 %v7868_v17  ;;  %v1093_v17 = vsel %vm986_vm3, %v3810_v36, %v3811_v59  ;;  %v1061_v30 = vsel %vm986_vm3, %v3815_v27, %v3816_v56  ;;  %v3836_v27 = vunpack.i.h.bf16 %v5878_v47 }
 0x2b1   : > { %7865 = vst [vmem:[#allocation76_spill] sm:$0xff] %v5914_v21  ;;  %1524 = vmatprep.subr.bf16.mxu1 %v5919_v10  ;;  %v7871_v10 = vunpack.i.h.bf16 %v5515_v24  ;;  %v7875_v24 = vunpack.i.l.bf16 %v5839_v41  ;;  %v3840_v41 = vunpack.i.l.bf16 %v5936_v49 }
 0x2b3   : > { %1500 = vmatmul.mubr.bf16.vlgmr.msra.gmra.mxu0 %v5675_v23  ;;  %v5950_v0 = vpop.permute.xlu0 %3848 }
 0x2b4   : > { %1585 = vmatprep.mubr.bf16.mxu0 %v7821_v1  ;;  %1525 = vmatpush1.bf16.msra.mxu1 %v5925_v33  ;;  %v1092_v33 = vsel %vm986_vm3, %v7871_v10, %v3810_v36  ;;  %v1077_v10 = vsel %vm986_vm3, %v7875_v24, %v3821_v6 }
 0x2b5   : > { %v5960_v36 = vpack.c.bf16 %v1077_v10, %v1061_v30  ;;  %v3845_v30 = vunpack.i.l.bf16 %v5932_v4 }
 0x2b7   : > { %1543 = vmatmul.mubr.bf16.vlgmr.msra.gmra.mxu1 %v5675_v23  ;;  %7876 = vst [vmem:[#allocation106_spill] sm:$0xff] %v5960_v36 }
 0x2b8   : > { %1628 = vmatprep.mubr.bf16.mxu1 %v7821_v1 }
 0x2d2   : > { %v3854_v44 = vpop.permute.xlu1 %3853 }
 0x2d3   : > { %v3856_v11 = vunpack.i.h.bf16 %v3854_v44  ;;  %v3855_v18 = vunpack.i.l.bf16 %v3854_v44 }
 0x2d5   : > { %v1108_v14 = vsel %vm986_vm3, %v7872_v45, %v3855_v18  ;;  %v1109_v63 = vsel %vm986_vm3, %v3855_v18, %v3856_v11  ;;  %v3825_v45 = vunpack.i.l.bf16 %v5883_v39  ;;  %v1045_v18 = vsel %vm986_vm3, %v3835_v34, %v3836_v27 }
 0x2d6   : > { %v5952_v37 = vpack.c.bf16 %v1109_v63, %v1093_v17  ;;  %v5954_v44 = vpack.c.bf16 %v1108_v14, %v1092_v33  ;;  %v1029_v17 = vsel %vm986_vm3, %v3830_v53, %v7485_v25  ;;  %v3851_v63 = vunpack.i.h.bf16 %v5950_v0  ;;  %v5986_v14 = vpop.permute.xlu0 %3868 }
 0x2d7   : > { %v1094_v10 = vsel %vm986_vm3, %v3811_v59, %v3825_v45  ;;  %v1095_v25 = vsel %vm986_vm3, %v3825_v45, %v7492_v46  ;;  %v5984_v47 = vpack.c.bf16 %v1045_v18, %v1029_v17  ;;  %v7879_v45 = vunpack.i.h.bf16 %v5932_v4 }
 0x2d8   : > { %7873 = vst [vmem:[#allocation19_spill] sm:$0xff] %v5952_v37  ;;  %7874 = vst [vmem:[#allocation17_spill] sm:$0xff] %v5954_v44  ;;  %1553 = vmatprep.subr.bf16.mxu0 %v5952_v37  ;;  %v3850_v37 = vunpack.i.l.bf16 %v5950_v0  ;;  %v1062_v0 = vsel %vm986_vm3, %v3816_v56, %v3840_v41  ;;  %v7502_v56 = vunpack.i.h.bf16 %v5986_v14 }
 0x2d9   : > { %1554 = vmatpush1.bf16.msra.mxu0 %v5954_v44  ;;  %v1079_v17 = vsel %vm986_vm3, %v3845_v30, %v7879_v45 }
 0x2da   : > { %1555 = vmatprep.subr.bf16.mxu0 %v5960_v36  ;;  %v7877_v36 = vunpack.i.h.bf16 %v5936_v49 }
 0x2dc   : > { %v1063_v34 = vsel %vm986_vm3, %v3840_v41, %v7877_v36  ;;  %v7884_v41 = vunpack.i.h.bf16 %v5812_v42 }
 0x2dd   : > { %v5973_v33 = vpop.permute.xlu1 %3858  ;;  %1556 = vmatpush1.bf16.msra.mxu0 %v5880_v29  ;;  %v3870_v29 = vunpack.i.l.bf16 %v5986_v14 }
 0x2de   : > { %v3860_v24 = vunpack.i.l.bf16 %v5973_v33  ;;  %v7878_v44 = vunpack.i.h.bf16 %v5973_v33  ;;  %1557 = vmatprep.subr.bf16.mxu0 %v5984_v47 }
 0x2e0   : > { %v1110_v53 = vsel %vm986_vm3, %v3856_v11, %v3860_v24  ;;  %v1111_v59 = vsel %vm986_vm3, %v3860_v24, %v7878_v44  ;;  %v997_v11 = vsel %vm986_vm3, %v3850_v37, %v3851_v63  ;;  %v1078_v44 = vsel %vm986_vm3, %v3821_v6, %v3845_v30 }
 0x2e1   : > { %v6000_v18 = vpack.c.bf16 %v1110_v53, %v1094_v10  ;;  %v6002_v46 = vpack.c.bf16 %v1111_v59, %v1095_v25  ;;  %v3864_v28 = vpop.permute.xlu1 %3863  ;;  %v6008_v24 = vpack.c.bf16 %v1079_v17, %v1063_v34  ;;  %v6012_v53 = vpop.permute.xlu0 %3878  ;;  %v7883_v25 = vunpack.i.h.bf16 %v5810_v60  ;;  %1558 = vmatpush1.bf16.msra.mxu0 %v5914_v21 }
 0x2e2   : > { %v3866_v36 = vunpack.i.h.bf16 %v3864_v28  ;;  %v3865_v61 = vunpack.i.l.bf16 %v3864_v28  ;;  %v6024_v30 = vpack.c.bf16 %v1078_v44, %v1062_v0  ;;  %v3880_v45 = vunpack.i.l.bf16 %v6012_v53 }
 0x2e3   : > { %7880 = vst [vmem:[#allocation107_spill] sm:$0xff] %v6000_v18  ;;  %7881 = vst [vmem:[#allocation108_spill] sm:$0xff] %v6002_v46  ;;  %1596 = vmatprep.subr.bf16.mxu1 %v6002_v46  ;;  %v996_v10 = vsel %vm986_vm3, %v7883_v25, %v3850_v37  ;;  %v6039_v17 = vpack.c.bf16 %v5272_v51, %v5210_v38  ;;  %v7887_v0 = vunpack.i.h.bf16 %v5898_v26 }
 0x2e4   : > { %7882 = vst [vmem:[#allocation109_spill] sm:$0xff] %v6008_v24  ;;  %v1012_v28 = vsel %vm986_vm3, %v7884_v41, %v3865_v61  ;;  %v1013_v6 = vsel %vm986_vm3, %v3865_v61, %v3866_v36  ;;  %1597 = vmatpush1.bf16.msra.mxu1 %v6000_v18  ;;  %7885 = vst [vmem:[#allocation110_spill] sm:$0xff] %v6024_v30  ;;  %v7500_v61 = vunpack.i.h.bf16 %v6012_v53 }
 0x2e5   : > { %v6026_v34 = vpack.c.bf16 %v1012_v28, %v996_v10  ;;  %v6028_v59 = vpack.c.bf16 %v1013_v6, %v997_v11  ;;  %1598 = vmatprep.subr.bf16.mxu1 %v6008_v24  ;;  %v1030_v11 = vsel %vm986_vm3, %v7887_v0, %v3870_v29  ;;  %v1031_v44 = vsel %vm986_vm3, %v3870_v29, %v7502_v56 }
 0x2e6   : > { %v6030_v60 = vpop.permute.xlu1 %3873  ;;  %v998_v41 = vsel %vm986_vm3, %v3851_v63, %v3880_v45  ;;  %v999_v28 = vsel %vm986_vm3, %v3880_v45, %v7500_v61  ;;  %v6086_v45 = vpack.c.bf16 %v5328_v43, %v5232_v31  ;;  %v7901_v31 = vld [vmem:[#allocation78_spill] sm:$0xff]  ;;  %v7910_v61 = vld [vmem:[#allocation55_spill] sm:$0xff] }
 0x2e7   : > { %7886 = vst [vmem:[#allocation111_spill] sm:$0xff] %v6026_v34  ;;  %v7501_v42 = vunpack.i.h.bf16 %v6030_v60  ;;  %v3875_v37 = vunpack.i.l.bf16 %v6030_v60  ;;  %1559 = vmatprep.subr.bf16.mxu0 %v6028_v59  ;;  %v3997_v43 = vld [vmem:[%s4309_s4 + $0x48] sm:$0xff] }
 0x2e8   : > { %1560 = vmatpush1.bf16.msra.mxu0 %v6026_v34  ;;  %1599 = vmatpush1.bf16.msra.mxu1 %v6024_v30  ;;  %7894 = vst [vmem:[#allocation117_spill] sm:$0xff] %v6086_v45 }
 0x2e9   : > { %v1046_v25 = vsel %vm986_vm3, %v3836_v27, %v3875_v37  ;;  %v1047_v10 = vsel %vm986_vm3, %v3875_v37, %v7501_v42  ;;  %1561 = vmatprep.subr.bf16.mxu0 %v6039_v17 }
 0x2ea   : > { %v6054_v38 = vpack.c.bf16 %v1046_v25, %v1030_v11  ;;  %v6056_v51 = vpack.c.bf16 %v1047_v10, %v1031_v44  ;;  %v6058_v26 = vpop.permute.xlu1 %3883  ;;  %v7892_v11 = vld [vmem:[#allocation73_spill] sm:$0xff]  ;;  %v7895_v44 = vld [vmem:[#allocation67_spill] sm:$0xff]  ;;  %v7896_v25 = vld [vmem:[#allocation38_spill] sm:$0xff] }
 0x2eb   : > { %v7499_v29 = vunpack.i.h.bf16 %v6058_v26  ;;  %v3885_v27 = vunpack.i.l.bf16 %v6058_v26  ;;  %v6094_v10 = vpack.c.bf16 %v7896_v25, %v5213_v50  ;;  %v7906_v25 = vld [vmem:[#allocation74_spill] sm:$0xff] }
 0x2ec   : > { %7888 = vst [vmem:[#allocation112_spill] sm:$0xff] %v6054_v38  ;;  %7889 = vst [vmem:[#allocation113_spill] sm:$0xff] %v6056_v51  ;;  %1600 = vmatprep.subr.bf16.mxu1 %v6056_v51  ;;  %1562 = vmatpush1.bf16.msra.mxu0 %v5173_v55 }
 0x2ed   : > { %v1014_v6 = vsel %vm986_vm3, %v3866_v36, %v3885_v27  ;;  %v1015_v37 = vsel %vm986_vm3, %v3885_v27, %v7499_v29  ;;  %1601 = vmatpush1.bf16.msra.mxu1 %v6054_v38  ;;  %1563 = vmatprep.subr.bf16.mxu0 %v7892_v11  ;;  %v6082_v36 = vpack.c.bf16 %v7709_v19, %v7711_v54  ;;  %v3996_v27 = vld [vmem:[%s4309_s4 + $0x50] sm:$0xff]  ;;  %v7909_v29 = vld [vmem:[#allocation45_spill] sm:$0xff] }
 0x2ee   : > { %v6074_v0 = vpack.c.bf16 %v1014_v6, %v998_v41  ;;  %v6076_v63 = vpack.c.bf16 %v1015_v37, %v999_v28  ;;  %7897 = vst [vmem:[#allocation38_spill] sm:$0xff] %v6094_v10  ;;  %v7898_v41 = vld [vmem:[#allocation21_spill] sm:$0xff]  ;;  %v7900_v54 = vld [vmem:[#allocation42_spill] sm:$0xff]  ;;  %v7902_v28 = vld [vmem:[#allocation20_spill] sm:$0xff]  ;;  %v6121_v42 = vpack.c.bf16 %v7910_v61, %v7909_v29  ;;  %v7913_v61 = vunpack.i.h.bf16 %v5973_v33 }
 0x2ef   : > { %7893 = vst [vmem:[#allocation116_spill] sm:$0xff] %v6082_v36  ;;  %v6098_v19 = vpack.c.bf16 %v7898_v41, %v3996_v27  ;;  %v6106_v6 = vpack.c.bf16 %v7902_v28, %v3997_v43  ;;  %v7904_v37 = vld [vmem:[#allocation46_spill] sm:$0xff]  ;;  %v7507_v43 = vmov 0.0   ;;  %v7919_v33 = vmov 0.0  }
 0x2f0   : > { %7890 = vst [vmem:[#allocation114_spill] sm:$0xff] %v6074_v0  ;;  %7891 = vst [vmem:[#allocation115_spill] sm:$0xff] %v6076_v63  ;;  %1602 = vmatprep.subr.bf16.mxu1 %v6076_v63  ;;  %1564 = vmatpush1.bf16.msra.mxu0 %v7895_v44  ;;  %v6110_v50 = vpack.c.bf16 %v4856_v16, %v7904_v37  ;;  %v7914_v16 = vunpack.i.h.bf16 %v5883_v39 }
 0x2f1   : > { %1603 = vmatpush1.bf16.msra.mxu1 %v6074_v0  ;;  %1565 = vmatprep.subr.bf16.mxu0 %v6082_v36  ;;  %7899 = vst [vmem:[#allocation21_spill] sm:$0xff] %v6098_v19  ;;  %7903 = vst [vmem:[#allocation20_spill] sm:$0xff] %v6106_v6 }
 0x2f2   : > { %1604 = vmatprep.subr.bf16.mxu1 %v6086_v45  ;;  %7905 = vst [vmem:[#allocation46_spill] sm:$0xff] %v6110_v50  ;;  %7911 = vst [vmem:[#allocation45_spill] sm:$0xff] %v6121_v42  ;;  %v7912_v45 = vld [vmem:[#allocation30_spill] sm:$0xff] }
 0x2f4   : > { %1566 = vmatpush1.bf16.msra.mxu0 %v7900_v54 }
 0x2f5   : > { %1605 = vmatpush1.bf16.msra.mxu1 %v6094_v10  ;;  %1567 = vmatprep.subr.bf16.mxu0 %v6098_v19 }
 0x2f6   : > { %1606 = vmatprep.subr.bf16.mxu1 %v7901_v31  ;;  %v3998_v31 = vld [vmem:[%s4309_s4 + $0x60] sm:$0xff] }
 0x2f7   : > { %v6130_v63 = vpack.c.bf16 %v7912_v45, %v3998_v31  ;;  %v3999_v31 = vld [vmem:[%s4309_s4 + $0x58] sm:$0xff] }
 0x2f8   : > { %1568 = vmatpush1.bf16.msra.mxu0 %v6106_v6 }
 0x2f9   : > { %1607 = vmatpush1.bf16.msra.mxu1 %v7906_v25  ;;  %3182 = vmatprep.subr.bf16.mxu0 %v7507_v43 }
 0x2fa   : > { %v6114_v27 = vpop.permute.xlu1 %3888  ;;  %1608 = vmatprep.subr.bf16.mxu1 %v6110_v50  ;;  %v7917_v50 = vld [vmem:[#allocation24_spill] sm:$0xff] }
 0x2fb   : > { %7907 = vst [vmem:[#allocation118_spill] sm:$0xff] %v6114_v27  ;;  %v6116_v41 = vpop.permute.xlu0 %3898  ;;  %1586 = vmatmul.mubr.bf16.vlgmr.msra.gmra.mxu0 %v5675_v23  ;;  %v6151_v19 = vpack.c.bf16 %v7917_v50, %v3999_v31  ;;  %v7920_v39 = vunpack.i.l.bf16 %v6114_v27 }
 0x2fc   : > { %7908 = vst [vmem:[#allocation119_spill] sm:$0xff] %v6116_v41  ;;  %v7513_v37 = vunpack.i.h.bf16 %v6116_v41  ;;  %v7514_v56 = vunpack.i.l.bf16 %v6116_v41  ;;  %3198 = vmatprep.mubr.msk.bf16.mxu0 %vm4165_vm4, %v7919_v33 }
 0x2fd   : > { %1609 = vmatpush1.bf16.msra.mxu1 %v6121_v42  ;;  %7918 = vst [vmem:[#allocation24_spill] sm:$0xff] %v6151_v19 }
 0x2fe   : > { %v1112_v29 = vsel %vm986_vm3, %v7913_v61, %v7513_v37  ;;  %v1096_v28 = vsel %vm986_vm3, %v7914_v16, %v7514_v56  ;;  %v6146_v45 = vpop.permute.xlu1 %3893  ;;  %1610 = vmatprep.subr.bf16.mxu1 %v6130_v63  ;;  %v7921_v16 = vunpack.i.h.bf16 %v5936_v49 }
 0x2ff   : > { %v6144_v43 = vpack.c.bf16 %v1112_v29, %v1096_v28  ;;  %7916 = vst [vmem:[#allocation30_spill] sm:$0xff] %v6146_v45  ;;  %v7922_v28 = vunpack.i.h.bf16 %v6114_v27  ;;  %v7923_v29 = vunpack.i.h.bf16 %v5932_v4  ;;  %v7516_v56 = vunpack.i.h.bf16 %v6146_v45 }
 0x300   : > { %v1064_v61 = vsel %vm986_vm3, %v7921_v16, %v7920_v39  ;;  %v7515_v50 = vunpack.i.l.bf16 %v6146_v45  ;;  %v7926_v4 = vunpack.i.h.bf16 %v5986_v14  ;;  %v7927_v16 = vunpack.i.h.bf16 %v6030_v60 }
 0x301   : > { %7915 = vst [vmem:[#allocation55_spill] sm:$0xff] %v6144_v43  ;;  %v1080_v37 = vsel %vm986_vm3, %v7923_v29, %v7922_v28  ;;  %3183 = vmatpush3.bf16.msra.mxu0 %v6144_v43  ;;  %1611 = vmatpush1.bf16.msra.mxu1 %v6151_v19  ;;  %v7929_v60 = vunpack.i.h.bf16 %v6012_v53  ;;  %v8004_v43 = vld [vmem:[#allocation105_spill] sm:$0xff] }
 0x302   : > { %3184 = vmatprep.subr.bf16.mxu0 %v7919_v33  ;;  %v6170_v31 = vpack.c.bf16 %v1080_v37, %v1064_v61  ;;  %1684 = vmatprep.subr.bf16.mxu1 %v5367_v20  ;;  %v1032_v39 = vsel %vm986_vm3, %v7926_v4, %v7515_v50  ;;  %v1048_v28 = vsel %vm986_vm3, %v7927_v16, %v7516_v56  ;;  %v7930_v4 = vunpack.i.h.bf16 %v6058_v26 }
 0x303   : > { %v6191_v20 = vpack.c.bf16 %v1048_v28, %v1032_v39  ;;  %v7932_v28 = vld [vmem:[#allocation66_spill] sm:$0xff] }
 0x304   : > { %7924 = vst [vmem:[#allocation120_spill] sm:$0xff] %v6170_v31  ;;  %v6172_v49 = vpop.permute.xlu1 %3913  ;;  %1629 = vmatmul.mubr.bf16.vlgmr.msra.gmra.mxu1 %v5675_v23  ;;  %v7933_v27 = vunpack.i.h.bf16 %v7932_v28 }
 0x305   : > { %7925 = vst [vmem:[#allocation121_spill] sm:$0xff] %v6172_v49  ;;  %v7524_v29 = vunpack.i.h.bf16 %v6172_v49  ;;  %v7521_v37 = vunpack.i.l.bf16 %v6172_v49  ;;  %3185 = vmatpush3.bf16.msra.mxu0 %v6170_v31  ;;  %1716 = vmatprep.mubr.bf16.mxu1 %v7821_v1  ;;  %7928 = vst [vmem:[#allocation122_spill] sm:$0xff] %v6191_v20  ;;  %v8003_v31 = vld [vmem:[#allocation77_spill] sm:$0xff] }
 0x306   : > { %3186 = vmatprep.subr.bf16.mxu0 %v7919_v33 }
 0x307   : > { %v1000_v61 = vsel %vm986_vm3, %v7929_v60, %v7521_v37  ;;  %v1016_v16 = vsel %vm986_vm3, %v7930_v4, %v7524_v29  ;;  %v7934_v60 = vunpack.i.l.bf16 %v7932_v28  ;;  %v7940_v28 = vld [vmem:[#allocation23_spill] sm:$0xff] }
 0x308   : > { %v3904_v50 = vpop.permute.xlu0 %3903  ;;  %v6205_v39 = vpack.c.bf16 %v1016_v16, %v1000_v61  ;;  %v7937_v61 = vunpack.i.l.bf16 %v5567_v3 }
 0x309   : > { %v3924_v14 = vpop.permute.xlu1 %3923  ;;  %v3906_v56 = vunpack.i.h.bf16 %v3904_v50  ;;  %v3905_v45 = vunpack.i.l.bf16 %v3904_v50  ;;  %3187 = vmatpush3.bf16.msra.mxu0 %v6191_v20  ;;  %v7935_v50 = vunpack.i.h.bf16 %v5567_v3  ;;  %v8002_v20 = vld [vmem:[#allocation99_spill] sm:$0xff] }
 0x30a   : > { %3188 = vmatprep.subr.bf16.mxu0 %v7919_v33  ;;  %7931 = vst [vmem:[#allocation123_spill] sm:$0xff] %v6205_v39 }
 0x30b   : > { %v1099_v53 = vsel %vm986_vm3, %v3906_v56, %v7933_v27  ;;  %v1083_v37 = vsel %vm986_vm3, %v3905_v45, %v7934_v60 }
 0x30c   : > { %v1355_v49 = vpack.c.bf16 %v1099_v53, %v1083_v37  ;;  %v7939_v37 = vld [vmem:[#allocation51_spill] sm:$0xff] }
 0x30d   : > { %v3934_v26 = vpop.permute.xlu1 %3933  ;;  %3189 = vmatpush3.bf16.msra.mxu0 %v6205_v39  ;;  %v6232_v53 = vpack.c.bf16 %v7940_v28, %v7939_v37  ;;  %v4000_v37 = vld [vmem:[%s4309_s4 + $0x78] sm:$0xff]  ;;  %v7944_v28 = vld [vmem:[#allocation37_spill] sm:$0xff] }
 0x30e   : > { %v3936_v4 = vunpack.i.h.bf16 %v3934_v26  ;;  %v3935_v29 = vunpack.i.l.bf16 %v3934_v26  ;;  %1685 = vmatpush1.bf16.msra.mxu1 %v1355_v49  ;;  %3190 = vmatprep.subr.bf16.mxu0 %v7919_v33  ;;  %v7942_v49 = vunpack.i.h.bf16 %v5264_v2  ;;  %v3952_v27 = vpack.i.bf16 %v7944_v28, %v4000_v37  ;;  %v7951_v37 = vld [vmem:[#allocation54_spill] sm:$0xff]  ;;  %v7953_v39 = vld [vmem:[#allocation84_spill] sm:$0xff] }
 0x30f   : > { %1686 = vmatprep.subr.bf16.mxu1 %v5413_v8  ;;  %7941 = vst [vmem:[#allocation51_spill] sm:$0xff] %v6232_v53 }
 0x310   : > { %v6217_v41 = vsel %vm585_vm2, %v7935_v50, %v3936_v4  ;;  %v6222_v16 = vsel %vm585_vm2, %v7937_v61, %v3935_v29  ;;  %v7943_v4 = vunpack.i.l.bf16 %v5264_v2 }
 0x311   : > { %7936 = vst [vmem:[#allocation66_spill] sm:$0xff] %v6217_v41  ;;  %7938 = vst [vmem:[#allocation124_spill] sm:$0xff] %v6222_v16  ;;  %v3942_v56 = vpack.i.bf16 %v6217_v41, %v6222_v16  ;;  %3191 = vmatpush3.bf16.msra.mxu0 %v6232_v53  ;;  %v3925_v41 = vunpack.i.l.bf16 %v3924_v14  ;;  %v7945_v53 = vld [vmem:[#allocation79_spill] sm:$0xff] }
 0x312   : > { %3192 = vmatprep.subr.bf16.mxu0 %v7919_v33 }
 0x313   : > { %v3909_v45 = vpop.permute.xlu0 %3908  ;;  %3943 = vrot.lane.b32.xlu1 %v3942_v56, %s4162_s26  ;;  %v3926_v56 = vunpack.i.h.bf16 %v3924_v14  ;;  %v7950_v14 = vld [vmem:[#allocation47_spill] sm:$0xff] }
 0x314   : > { %v3911_v3 = vunpack.i.h.bf16 %v3909_v45  ;;  %v3910_v29 = vunpack.i.l.bf16 %v3909_v45 }
 0x315   : > { %3193 = vmatpush3.bf16.msra.mxu0 %v7945_v53 }
 0x316   : > { %v1067_v60 = vsel %vm986_vm3, %v3911_v3, %v7942_v49  ;;  %v1051_v50 = vsel %vm986_vm3, %v3910_v29, %v7943_v4  ;;  %v7946_v3 = vld [vmem:[#allocation22_spill] sm:$0xff]  ;;  %3194 = vmatprep.subr.bf16.mxu0 %v7919_v33 }
 0x317   : > { %v1339_v8 = vpack.c.bf16 %v1067_v60, %v1051_v50  ;;  %v3919_v61 = vpop.permute.xlu0 %3918  ;;  %3953 = vrot.lane.b32.xlu1 %v3952_v27, %s4162_s26  ;;  %v7947_v49 = vunpack.i.h.bf16 %v7946_v3  ;;  %v7948_v29 = vunpack.i.l.bf16 %v7946_v3  ;;  %v7949_v50 = vld [vmem:[#allocation90_spill] sm:$0xff]  ;;  %v6257_v27 = vpack.c.bf16 %v7951_v37, %v7950_v14 }
 0x318   : > { %v3921_v45 = vunpack.i.h.bf16 %v3919_v61  ;;  %v3920_v16 = vunpack.i.l.bf16 %v3919_v61  ;;  %v4001_v14 = vld [vmem:[%s4309_s4 + $0x68] sm:$0xff] }
 0x319   : > { %1687 = vmatpush1.bf16.msra.mxu1 %v1339_v8  ;;  %7952 = vst [vmem:[#allocation23_spill] sm:$0xff] %v6257_v27  ;;  %3195 = vmatpush3.bf16.msra.mxu0 %v6257_v27  ;;  %v8001_v27 = vld [vmem:[#allocation28_spill] sm:$0xff] }
 0x31a   : > { %v1035_v2 = vsel %vm986_vm3, %v3921_v45, %v7947_v49  ;;  %v1019_v60 = vsel %vm986_vm3, %v3920_v16, %v7948_v29  ;;  %1688 = vmatprep.subr.bf16.mxu1 %v7949_v50  ;;  %v7954_v45 = vunpack.i.h.bf16 %v7953_v39  ;;  %v7955_v16 = vunpack.i.l.bf16 %v7953_v39  ;;  %v7956_v49 = vld [vmem:[#allocation33_spill] sm:$0xff]  ;;  %3196 = vmatprep.subr.bf16.mxu0 %v7919_v33  ;;  %v7997_v39 = vld [vmem:[#allocation27_spill] sm:$0xff] }
 0x31b   : > { %v1323_v4 = vpack.c.bf16 %v1035_v2, %v1019_v60  ;;  %v3929_v61 = vpop.permute.xlu0 %3928  ;;  %3963 = vrot.lane.b32.xlu1 %v3934_v26, %s4162_s26  ;;  %v7957_v2 = vunpack.i.h.bf16 %v7956_v49  ;;  %v7959_v60 = vunpack.i.l.bf16 %v7956_v49  ;;  %v7961_v26 = vld [vmem:[#allocation93_spill] sm:$0xff]  ;;  %v7971_v49 = vpack.c.bf16 %v5797_v62, %v5802_v5  ;;  %v6320_v5 = vld [vmem:[#allocation5] ss:$16 sps:$4 sm:$0xff]  }
 0x31c   : > { %v3931_v28 = vunpack.i.h.bf16 %v3929_v61  ;;  %v3930_v53 = vunpack.i.l.bf16 %v3929_v61  ;;  %v1003_v3 = vsel %vm986_vm3, %v3926_v56, %v7954_v45  ;;  %v987_v8 = vsel %vm986_vm3, %v3925_v41, %v7955_v16  ;;  %v7966_v45 = vld [vmem:[#allocation65_spill] sm:$0xff] }
 0x31d   : > { %1689 = vmatpush1.bf16.msra.mxu1 %v1323_v4  ;;  %v1307_v56 = vpack.c.bf16 %v1003_v3, %v987_v8  ;;  %v7965_v4 = vld [vmem:[#allocation86_spill] sm:$0xff]  ;;  %v7967_v3 = vpack.c.bf16 %v5705_v35, %v5710_v13  ;;  %v7968_v16 = vld [vmem:[#allocation85_spill] sm:$0xff]  ;;  %v7970_v8 = vld [vmem:[#allocation32_spill] sm:$0xff]  ;;  %v1243_v62 = vpack.c.bf16 %v7795_v15, %v5610_v57 }
 0x31e   : > { %v6270_v29 = vsel %vm585_vm2, %v7957_v2, %v3931_v28  ;;  %v6275_v50 = vsel %vm585_vm2, %v7959_v60, %v3930_v53  ;;  %1690 = vmatprep.subr.bf16.mxu1 %v7961_v26  ;;  %v7962_v28 = vld [vmem:[#allocation31_spill] sm:$0xff]  ;;  %v7964_v53 = vld [vmem:[#allocation64_spill] sm:$0xff]  ;;  %v7972_v2 = vld [vmem:[#allocation25_spill] sm:$0xff] }
 0x31f   : > { %7958 = vst [vmem:[#allocation22_spill] sm:$0xff] %v6270_v29  ;;  %7960 = vst [vmem:[#allocation90_spill] sm:$0xff] %v6275_v50  ;;  %v3937_v41 = vpack.i.bf16 %v6270_v29, %v6275_v50  ;;  %v6285_v37 = vpack.c.bf16 %v7962_v28, %v4001_v14  ;;  %3973 = vrot.lane.b32.xlu1 %v5555_v58, %s4162_s26  ;;  %v7969_v58 = vld [vmem:[#allocation53_spill] sm:$0xff]  ;;  %v7974_v35 = vld [vmem:[#allocation71_spill] sm:$0xff] }
 0x320   : > { %v7975_v13 = vld [vmem:[#allocation70_spill] sm:$0xff]  ;;  %v7979_v26 = vld [vmem:[#allocation96_spill] sm:$0xff]  ;;  %v7983_v14 = vld [vmem:[#allocation87_spill] sm:$0xff] }
 0x321   : > { %7963 = vst [vmem:[#allocation47_spill] sm:$0xff] %v6285_v37  ;;  %3938 = vrot.lane.b32.xlu0 %v3937_v41, %s4162_s26  ;;  %3197 = vmatpush3.bf16.msra.mxu0 %v6285_v37  ;;  %v7976_v60 = vpack.c.bf16 %v7974_v35, %v7975_v13  ;;  %v7977_v41 = vld [vmem:[#allocation88_spill] sm:$0xff]  ;;  %v7984_v28 = vld [vmem:[#allocation49_spill] sm:$0xff]  ;;  %v7985_v57 = vld [vmem:[#allocation50_spill] sm:$0xff] }
 0x322   : > { %1691 = vmatpush1.bf16.msra.mxu1 %v1307_v56  ;;  %1727 = vmatprep.subr.bf16.mxu0 %v7965_v4  ;;  %v7981_v56 = vld [vmem:[#allocation58_spill] sm:$0xff]  ;;  %v7986_v15 = vld [vmem:[#allocation89_spill] sm:$0xff]  ;;  %v7993_v13 = vld [vmem:[#allocation59_spill] sm:$0xff] }
 0x323   : > { %1692 = vmatprep.subr.bf16.mxu1 %v7964_v53  ;;  %v7987_v53 = vld [vmem:[#allocation26_spill] sm:$0xff]  ;;  %v7998_v50 = vld [vmem:[#allocation29_spill] sm:$0xff]  ;;  %v7999_v29 = vld [vmem:[#allocation35_spill] sm:$0xff] }
 0x324   : > { %3199 = vmatmul.mubr.bf16.vlgmr.msra.gmra.mxu0 %v5675_v23  ;;  %v7973_v23 = vld [vmem:[#allocation94_spill] sm:$0xff]  ;;  %v8000_v37 = vld [vmem:[#allocation52_spill] sm:$0xff] }
 0x325   : > { %3948 = vrot.lane.b32.xlu0 %v7966_v45, %s4162_s26  ;;  %1728 = vmatpush1.bf16.msra.mxu0 %v7968_v16  ;;  %v7988_v45 = vld [vmem:[#allocation13_spill] sm:$0xff]  ;;  %v7992_v35 = vld [vmem:[#allocation98_spill] sm:$0xff] }
 0x326   : > { %1693 = vmatpush1.bf16.msra.mxu1 %v7967_v3  ;;  %1729 = vmatprep.subr.bf16.mxu0 %v7970_v8  ;;  %v7989_v3 = vld [vmem:[#allocation92_spill] sm:$0xff] }
 0x327   : > { %1694 = vmatprep.subr.bf16.mxu1 %v7969_v58  ;;  %1759 = vmatprep.mubr.bf16.mxu0 %v7821_v1  ;;  %v7990_v58 = vld [vmem:[#allocation12_spill] sm:$0xff] }
 0x329   : > { %3958 = vrot.lane.b32.xlu0 %v3929_v61, %s4162_s26  ;;  %1730 = vmatpush1.bf16.msra.mxu0 %v7972_v2  ;;  %v7978_v61 = vld [vmem:[#allocation18_spill] sm:$0xff] }
 0x32a   : > { %1695 = vmatpush1.bf16.msra.mxu1 %v7971_v49  ;;  %1731 = vmatprep.subr.bf16.mxu0 %v7973_v23  ;;  %v7991_v49 = vld [vmem:[#allocation95_spill] sm:$0xff] }
 0x32b   : > { %1696 = vmatprep.subr.bf16.mxu1 %v7801_v40  ;;  %v7980_v40 = vld [vmem:[#allocation91_spill] sm:$0xff] }
 0x32d   : > { %3968 = vrot.lane.b32.xlu0 %v7848_v7, %s4162_s26  ;;  %1732 = vmatpush1.bf16.msra.mxu0 %v7977_v41  ;;  %v7982_v7 = vld [vmem:[#allocation60_spill] sm:$0xff] }
 0x32e   : > { %1697 = vmatpush1.bf16.msra.mxu1 %v7976_v60  ;;  %1733 = vmatprep.subr.bf16.mxu0 %v7979_v26  ;;  %v7994_v60 = vld [vmem:[#allocation97_spill] sm:$0xff] }
 0x32f   : > { %1698 = vmatprep.subr.bf16.mxu1 %v7978_v61  ;;  %v7995_v61 = vld [vmem:[#allocation61_spill] sm:$0xff] }
 0x331   : > { %1734 = vmatpush1.bf16.msra.mxu0 %v7980_v40 }
 0x332   : > { %1699 = vmatpush1.bf16.msra.mxu1 %v1243_v62  ;;  %1735 = vmatprep.subr.bf16.mxu0 %v7981_v56  ;;  %v7996_v62 = vld [vmem:[#allocation100_spill] sm:$0xff] }
 0x333   : > { %1770 = vmatprep.subr.bf16.mxu1 %v5684_v52 }
 0x335   : > { %1717 = vmatmul.mubr.bf16.vlgmr.msra.gmra.mxu1 %v6320_v5  ;;  %1736 = vmatpush1.bf16.msra.mxu0 %v7982_v7 }
 0x336   : > { %1771 = vmatpush1.bf16.msra.mxu1 %v7983_v14  ;;  %1737 = vmatprep.subr.bf16.mxu0 %v7984_v28 }
 0x337   : > { %1772 = vmatprep.subr.bf16.mxu1 %v5654_v12  ;;  %1802 = vmatprep.mubr.bf16.mxu1 %v7821_v1 }
 0x339   : > { %1738 = vmatpush1.bf16.msra.mxu0 %v7985_v57 }
 0x33a   : > { %1773 = vmatpush1.bf16.msra.mxu1 %v7986_v15  ;;  %1739 = vmatprep.subr.bf16.mxu0 %v7987_v53 }
 0x33b   : > { %1774 = vmatprep.subr.bf16.mxu1 %v5752_v48 }
 0x33d   : > { %1740 = vmatpush1.bf16.msra.mxu0 %v7988_v45 }
 0x33e   : > { %1775 = vmatpush1.bf16.msra.mxu1 %v7989_v3  ;;  %1741 = vmatprep.subr.bf16.mxu0 %v5537_v22 }
 0x33f   : > { %1776 = vmatprep.subr.bf16.mxu1 %v5824_v32 }
 0x341   : > { %1742 = vmatpush1.bf16.msra.mxu0 %v7990_v58 }
 0x342   : > { %1777 = vmatpush1.bf16.msra.mxu1 %v7991_v49  ;;  %1813 = vmatprep.subr.bf16.mxu0 %v7992_v35 }
 0x343   : > { %1778 = vmatprep.subr.bf16.mxu1 %v7844_v9 }
 0x344   : > { %1760 = vmatmul.mubr.bf16.vlgmr.msra.gmra.mxu0 %v6320_v5 }
 0x345   : > { %1814 = vmatpush1.bf16.msra.mxu0 %v7994_v60  ;;  %1845 = vmatprep.mubr.bf16.mxu0 %v7821_v1 }
 0x346   : > { %1779 = vmatpush1.bf16.msra.mxu1 %v7993_v13  ;;  %1815 = vmatprep.subr.bf16.mxu0 %v7996_v62  ;;  %v8006_v62 = vld [vmem:[#allocation102_spill] sm:$0xff]  ;;  %v8007_v13 = vld [vmem:[#allocation80_spill] sm:$0xff] }
 0x347   : > { %1780 = vmatprep.subr.bf16.mxu1 %v7995_v61  ;;  %v8005_v61 = vld [vmem:[#allocation14_spill] sm:$0xff] }
 0x349   : > { %1816 = vmatpush1.bf16.msra.mxu0 %v7998_v50 }
 0x34a   : > { %1781 = vmatpush1.bf16.msra.mxu1 %v7997_v39  ;;  %1817 = vmatprep.subr.bf16.mxu0 %v8000_v37  ;;  %v8008_v39 = vld [vmem:[#allocation17_spill] sm:$0xff] }
 0x34b   : > { %1782 = vmatprep.subr.bf16.mxu1 %v7999_v29  ;;  %v8009_v29 = vld [vmem:[#allocation81_spill] sm:$0xff] }
 0x34c   : > { %v8010_v37 = vld [vmem:[#allocation57_spill] sm:$0xff] }
 0x34d   : > { %1818 = vmatpush1.bf16.msra.mxu0 %v8002_v20  ;;  %v8012_v20 = vld [vmem:[#allocation44_spill] sm:$0xff] }
 0x34e   : > { %1783 = vmatpush1.bf16.msra.mxu1 %v8001_v27  ;;  %1819 = vmatprep.subr.bf16.mxu0 %v8004_v43  ;;  %v8011_v27 = vld [vmem:[#allocation69_spill] sm:$0xff] }
 0x34f   : > { %1784 = vmatprep.subr.bf16.mxu1 %v8003_v31  ;;  %v8013_v31 = vld [vmem:[#allocation75_spill] sm:$0xff] }
 0x351   : > { %1820 = vmatpush1.bf16.msra.mxu0 %v8006_v62  ;;  %v8015_v62 = vld [vmem:[#allocation40_spill] sm:$0xff] }
 0x352   : > { %1785 = vmatpush1.bf16.msra.mxu1 %v8005_v61  ;;  %1821 = vmatprep.subr.bf16.mxu0 %v8007_v13  ;;  %v8014_v61 = vld [vmem:[#allocation101_spill] sm:$0xff]  ;;  %v8017_v13 = vld [vmem:[#allocation103_spill] sm:$0xff] }
 0x353   : > { %1856 = vmatprep.subr.bf16.mxu1 %v8008_v39  ;;  %v8016_v39 = vld [vmem:[#allocation34_spill] sm:$0xff] }
 0x355   : > { %1803 = vmatmul.mubr.bf16.vlgmr.msra.gmra.mxu1 %v6320_v5  ;;  %1822 = vmatpush1.bf16.msra.mxu0 %v8009_v29  ;;  %v8018_v29 = vld [vmem:[#allocation15_spill] sm:$0xff] }
 0x356   : > { %1857 = vmatpush1.bf16.msra.mxu1 %v8010_v37  ;;  %1823 = vmatprep.subr.bf16.mxu0 %v8011_v27  ;;  %v8019_v27 = vld [vmem:[#allocation56_spill] sm:$0xff] }
 0x357   : > { %1858 = vmatprep.subr.bf16.mxu1 %v8012_v20  ;;  %1888 = vmatprep.mubr.bf16.mxu1 %v7821_v1  ;;  %v8020_v20 = vld [vmem:[#allocation104_spill] sm:$0xff] }
 0x359   : > { %1824 = vmatpush1.bf16.msra.mxu0 %v8013_v31 }
 0x35a   : > { %1859 = vmatpush1.bf16.msra.mxu1 %v8014_v61  ;;  %1825 = vmatprep.subr.bf16.mxu0 %v8015_v62  ;;  %v8021_v62 = vld [vmem:[#allocation83_spill] sm:$0xff] }
 0x35b   : > { %1860 = vmatprep.subr.bf16.mxu1 %v5914_v21  ;;  %v8022_v21 = vld [vmem:[#allocation19_spill] sm:$0xff] }
 0x35d   : > { %1826 = vmatpush1.bf16.msra.mxu0 %v8016_v39 }
 0x35e   : > { %1861 = vmatpush1.bf16.msra.mxu1 %v8017_v13  ;;  %1827 = vmatprep.subr.bf16.mxu0 %v8018_v29 }
 0x35f   : > { %1862 = vmatprep.subr.bf16.mxu1 %v6026_v34  ;;  %v8023_v34 = vld [vmem:[#allocation68_spill] sm:$0xff] }
 0x361   : > { %1828 = vmatpush1.bf16.msra.mxu0 %v8019_v27  ;;  %v8024_v27 = vld [vmem:[#allocation106_spill] sm:$0xff] }
 0x362   : > { %1863 = vmatpush1.bf16.msra.mxu1 %v8020_v20  ;;  %1899 = vmatprep.subr.bf16.mxu0 %v6000_v18 }
 0x363   : > { %1864 = vmatprep.subr.bf16.mxu1 %v5173_v55  ;;  %v8025_v55 = vld [vmem:[#allocation39_spill] sm:$0xff] }
 0x364   : > { %1846 = vmatmul.mubr.bf16.vlgmr.msra.gmra.mxu0 %v6320_v5 }
 0x365   : > { %1900 = vmatpush1.bf16.msra.mxu0 %v8022_v21  ;;  %1931 = vmatprep.mubr.bf16.mxu0 %v7821_v1 }
 0x366   : > { %1865 = vmatpush1.bf16.msra.mxu1 %v8021_v62  ;;  %1901 = vmatprep.subr.bf16.mxu0 %v6024_v30 }
 0x367   : > { %1866 = vmatprep.subr.bf16.mxu1 %v7895_v44  ;;  %v8026_v44 = vld [vmem:[#allocation16_spill] sm:$0xff] }
 0x369   : > { %1902 = vmatpush1.bf16.msra.mxu0 %v8024_v27 }
 0x36a   : > { %1867 = vmatpush1.bf16.msra.mxu1 %v8023_v34  ;;  %1903 = vmatprep.subr.bf16.mxu0 %v6054_v38 }
 0x36b   : > { %1868 = vmatprep.subr.bf16.mxu1 %v7900_v54 }
 0x36d   : > { %1904 = vmatpush1.bf16.msra.mxu0 %v5984_v47 }
 0x36e   : > { %1869 = vmatpush1.bf16.msra.mxu1 %v8025_v55  ;;  %1905 = vmatprep.subr.bf16.mxu0 %v6074_v0 }
 0x36f   : > { %1870 = vmatprep.subr.bf16.mxu1 %v6106_v6 }
 0x371   : > { %1906 = vmatpush1.bf16.msra.mxu0 %v6028_v59 }
 0x372   : > { %1871 = vmatpush1.bf16.msra.mxu1 %v8026_v44  ;;  %1907 = vmatprep.subr.bf16.mxu0 %v6094_v10 }
 0x373   : > { %3202 = vmatprep.subr.bf16.mxu1 %v7919_v33 }
 0x375   : > { %1889 = vmatmul.mubr.bf16.vlgmr.msra.gmra.mxu1 %v6320_v5  ;;  %1908 = vmatpush1.bf16.msra.mxu0 %v6039_v17 }
 0x376   : > { %3203 = vmatpush3.bf16.msra.mxu1 %v6002_v46  ;;  %1909 = vmatprep.subr.bf16.mxu0 %v7906_v25  ;;  %v8027_v25 = vld [vmem:[#allocation21_spill] sm:$0xff]  ;;  %v8028_v46 = vld [vmem:[#allocation115_spill] sm:$0xff] }
 0x377   : > { %3204 = vmatprep.subr.bf16.mxu1 %v7919_v33  ;;  %3218 = vmatprep.mubr.msk.bf16.mxu1 %vm4165_vm4, %v7919_v33 }
 0x379   : > { %1910 = vmatpush1.bf16.msra.mxu0 %v7892_v11 }
 0x37a   : > { %3205 = vmatpush3.bf16.msra.mxu1 %v6008_v24  ;;  %1911 = vmatprep.subr.bf16.mxu0 %v6121_v42  ;;  %v8029_v42 = vld [vmem:[#allocation117_spill] sm:$0xff] }
 0x37b   : > { %3206 = vmatprep.subr.bf16.mxu1 %v7919_v33 }
 0x37d   : > { %1912 = vmatpush1.bf16.msra.mxu0 %v6082_v36 }
 0x37e   : > { %3207 = vmatpush3.bf16.msra.mxu1 %v6056_v51  ;;  %1913 = vmatprep.subr.bf16.mxu0 %v6151_v19 }
 0x37f   : > { %3208 = vmatprep.subr.bf16.mxu1 %v7919_v33 }
 0x381   : > { %1914 = vmatpush1.bf16.msra.mxu0 %v8027_v25  ;;  %v8030_v25 = vld [vmem:[#allocation78_spill] sm:$0xff] }
 0x382   : > { %3209 = vmatpush3.bf16.msra.mxu1 %v8028_v46  ;;  %1989 = vmatprep.subr.bf16.mxu0 %v7965_v4 }
 0x383   : > { %3210 = vmatprep.subr.bf16.mxu1 %v7919_v33 }
 0x384   : > { %1932 = vmatmul.mubr.bf16.vlgmr.msra.gmra.mxu0 %v6320_v5 }
 0x385   : > { %1990 = vmatpush1.bf16.msra.mxu0 %v7968_v16  ;;  %v6420_v51 = vpop.permute.xlu1 %3943  ;;  %2021 = vmatprep.mubr.bf16.mxu0 %v7821_v1 }
 0x386   : > { %3211 = vmatpush3.bf16.msra.mxu1 %v8029_v42  ;;  %1991 = vmatprep.subr.bf16.mxu0 %v7970_v8  ;;  %v8031_v42 = vld [vmem:[#allocation46_spill] sm:$0xff]  ;;  %v7563_v8 = vunpack.i.h.bf16 %v6420_v51 }
 0x387   : > { %3212 = vmatprep.subr.bf16.mxu1 %v7919_v33 }
 0x389   : > { %1992 = vmatpush1.bf16.msra.mxu0 %v7972_v2  ;;  %v6427_v4 = vpop.permute.xlu1 %3953 }
 0x38a   : > { %3213 = vmatpush3.bf16.msra.mxu1 %v8030_v25  ;;  %1993 = vmatprep.subr.bf16.mxu0 %v7973_v23  ;;  %v7564_v25 = vunpack.i.l.bf16 %v6420_v51 }
 0x38b   : > { %3214 = vmatprep.subr.bf16.mxu1 %v7919_v33 }
 0x38d   : > { %1994 = vmatpush1.bf16.msra.mxu0 %v7977_v41  ;;  %v3964_v16 = vpop.permute.xlu1 %3963 }
 0x38e   : > { %3215 = vmatpush3.bf16.msra.mxu1 %v8031_v42  ;;  %1995 = vmatprep.subr.bf16.mxu0 %v7979_v26  ;;  %v3966_v2 = vunpack.i.h.bf16 %v3964_v16  ;;  %v3965_v46 = vunpack.i.l.bf16 %v3964_v16 }
 0x38f   : > { %3216 = vmatprep.subr.bf16.mxu1 %v7919_v33 }
 0x390   : > { %v6439_v23 = vsel %vm986_vm3, %v7563_v8, %v3966_v2  ;;  %v6444_v41 = vsel %vm986_vm3, %v7564_v25, %v3965_v46  ;;  %v7566_v2 = vunpack.i.h.bf16 %v6427_v4  ;;  %v7567_v8 = vunpack.i.l.bf16 %v6427_v4 }
 0x391   : > { %8032 = vst [vmem:[#allocation54_spill] sm:$0xff] %v6439_v23  ;;  %8033 = vst [vmem:[#allocation84_spill] sm:$0xff] %v6444_v41  ;;  %1996 = vmatpush1.bf16.msra.mxu0 %v7980_v40  ;;  %v3974_v16 = vpop.permute.xlu1 %3973  ;;  %v8049_v23 = vld [vmem:[#allocation102_spill] sm:$0xff] }
 0x392   : > { %3217 = vmatpush3.bf16.msra.mxu1 %v6130_v63  ;;  %1997 = vmatprep.subr.bf16.mxu0 %v7981_v56  ;;  %v3976_v46 = vunpack.i.h.bf16 %v3974_v16  ;;  %v3975_v25 = vunpack.i.l.bf16 %v3974_v16 }
 0x393   : > { %2032 = vmatprep.subr.bf16.mxu1 %v5684_v52  ;;  %v6452_v42 = vpop.permute.xlu0 %3938 }
 0x394   : > { %v6460_v40 = vsel %vm986_vm3, %v7566_v2, %v3976_v46  ;;  %v6465_v26 = vsel %vm986_vm3, %v7567_v8, %v3975_v25  ;;  %v7571_v16 = vunpack.i.l.bf16 %v6452_v42 }
 0x395   : > { %3219 = vmatmul.mubr.bf16.vlgmr.msra.gmra.mxu1 %v6320_v5  ;;  %8034 = vst [vmem:[#allocation33_spill] sm:$0xff] %v6460_v40  ;;  %8035 = vst [vmem:[#allocation93_spill] sm:$0xff] %v6465_v26  ;;  %1998 = vmatpush1.bf16.msra.mxu0 %v7982_v7  ;;  %v7569_v7 = vunpack.i.h.bf16 %v6452_v42 }
 0x396   : > { %2033 = vmatpush1.bf16.msra.mxu1 %v7983_v14  ;;  %1999 = vmatprep.subr.bf16.mxu0 %v7984_v28 }
 0x397   : > { %v6472_v5 = vpop.permute.xlu0 %3948  ;;  %2034 = vmatprep.subr.bf16.mxu1 %v5654_v12  ;;  %2064 = vmatprep.mubr.bf16.mxu1 %v7821_v1 }
 0x398   : > { %v7573_v26 = vunpack.i.h.bf16 %v6472_v5 }
 0x399   : > { %2000 = vmatpush1.bf16.msra.mxu0 %v7985_v57 }
 0x39a   : > { %2035 = vmatpush1.bf16.msra.mxu1 %v7986_v15  ;;  %2001 = vmatprep.subr.bf16.mxu0 %v7987_v53 }
 0x39b   : > { %v3959_v25 = vpop.permute.xlu0 %3958  ;;  %2036 = vmatprep.subr.bf16.mxu1 %v5752_v48 }
 0x39c   : > { %v3961_v46 = vunpack.i.h.bf16 %v3959_v25  ;;  %v3960_v41 = vunpack.i.l.bf16 %v3959_v25 }
 0x39d   : > { %2002 = vmatpush1.bf16.msra.mxu0 %v7988_v45 }
 0x39e   : > { %v6485_v2 = vsel %vm986_vm3, %v7569_v7, %v3961_v46  ;;  %v6490_v57 = vsel %vm986_vm3, %v7571_v16, %v3960_v41  ;;  %2037 = vmatpush1.bf16.msra.mxu1 %v7989_v3  ;;  %2003 = vmatprep.subr.bf16.mxu0 %v5537_v22  ;;  %v7572_v46 = vunpack.i.l.bf16 %v6472_v5  ;;  %v6500_v41 = vld [vmem:[#allocation5 + $0x8] ss:$16 sps:$4 sm:$0xff]   ;;  %v8044_v16 = vld [vmem:[#allocation52_spill] sm:$0xff] }
 0x39f   : > { %8036 = vst [vmem:[#allocation31_spill] sm:$0xff] %v6485_v2  ;;  %8037 = vst [vmem:[#allocation64_spill] sm:$0xff] %v6490_v57  ;;  %v3969_v25 = vpop.permute.xlu0 %3968  ;;  %2038 = vmatprep.subr.bf16.mxu1 %v5824_v32  ;;  %v8050_v57 = vld [vmem:[#allocation14_spill] sm:$0xff]  ;;  %v8051_v2 = vld [vmem:[#allocation80_spill] sm:$0xff] }
 0x3a0   : > { %v3971_v7 = vunpack.i.h.bf16 %v3969_v25  ;;  %v3970_v40 = vunpack.i.l.bf16 %v3969_v25  ;;  %v8043_v25 = vld [vmem:[#allocation27_spill] sm:$0xff] }
 0x3a1   : > { %2004 = vmatpush1.bf16.msra.mxu0 %v7990_v58  ;;  %v8042_v58 = vld [vmem:[#allocation61_spill] sm:$0xff] }
 0x3a2   : > { %v6505_v45 = vsel %vm986_vm3, %v7573_v26, %v3971_v7  ;;  %v6510_v8 = vsel %vm986_vm3, %v7572_v46, %v3970_v40  ;;  %2039 = vmatpush1.bf16.msra.mxu1 %v7991_v49  ;;  %2075 = vmatprep.subr.bf16.mxu0 %v7992_v35  ;;  %v8040_v7 = vld [vmem:[#allocation59_spill] sm:$0xff]  ;;  %v8041_v40 = vld [vmem:[#allocation100_spill] sm:$0xff] }
 0x3a3   : > { %8038 = vst [vmem:[#allocation65_spill] sm:$0xff] %v6505_v45  ;;  %8039 = vst [vmem:[#allocation85_spill] sm:$0xff] %v6510_v8  ;;  %2040 = vmatprep.subr.bf16.mxu1 %v7844_v9  ;;  %v8045_v46 = vld [vmem:[#allocation35_spill] sm:$0xff]  ;;  %v8047_v8 = vld [vmem:[#allocation28_spill] sm:$0xff] }
 0x3a4   : > { %2022 = vmatmul.mubr.bf16.vlgmr.msra.gmra.mxu0 %v6500_v41  ;;  %v8046_v26 = vld [vmem:[#allocation99_spill] sm:$0xff]  ;;  %v8048_v45 = vld [vmem:[#allocation77_spill] sm:$0xff] }
 0x3a5   : > { %2076 = vmatpush1.bf16.msra.mxu0 %v7994_v60  ;;  %2107 = vmatprep.mubr.bf16.mxu0 %v7821_v1 }
 0x3a6   : > { %2041 = vmatpush1.bf16.msra.mxu1 %v8040_v7  ;;  %2077 = vmatprep.subr.bf16.mxu0 %v8041_v40  ;;  %v8052_v40 = vld [vmem:[#allocation17_spill] sm:$0xff] }
 0x3a7   : > { %2042 = vmatprep.subr.bf16.mxu1 %v8042_v58  ;;  %v8055_v58 = vld [vmem:[#allocation44_spill] sm:$0xff] }
 0x3a9   : > { %2078 = vmatpush1.bf16.msra.mxu0 %v7998_v50 }
 0x3aa   : > { %2043 = vmatpush1.bf16.msra.mxu1 %v8043_v25  ;;  %2079 = vmatprep.subr.bf16.mxu0 %v8044_v16  ;;  %v8053_v16 = vld [vmem:[#allocation81_spill] sm:$0xff] }
 0x3ab   : > { %2044 = vmatprep.subr.bf16.mxu1 %v8045_v46  ;;  %v8054_v46 = vld [vmem:[#allocation69_spill] sm:$0xff] }
 0x3ad   : > { %2080 = vmatpush1.bf16.msra.mxu0 %v8046_v26 }
 0x3ae   : > { %2045 = vmatpush1.bf16.msra.mxu1 %v8047_v8  ;;  %2081 = vmatprep.subr.bf16.mxu0 %v8004_v43  ;;  %v6543_v43 = vpop.f32.mrf.mxu0 }
 0x3af   : > { %2046 = vmatprep.subr.bf16.mxu1 %v8048_v45  ;;  %8056 = vst [vmem:[#allocation53_spill] sm:$0xff] %v6543_v43  ;;  %v8063_v43 = vld [vmem:[#allocation82_spill] sm:$0xff] }
 0x3b0   : > { %v6549_v45 = vpop.f32.mrf.mxu0 }
 0x3b1   : > { %2082 = vmatpush1.bf16.msra.mxu0 %v8049_v23  ;;  %8059 = vst [vmem:[#allocation25_spill] sm:$0xff] %v6549_v45 }
 0x3b2   : > { %2047 = vmatpush1.bf16.msra.mxu1 %v8050_v57  ;;  %2083 = vmatprep.subr.bf16.mxu0 %v8051_v2  ;;  %v8057_v2 = vld [vmem:[#allocation40_spill] sm:$0xff] }
 0x3b3   : > { %2118 = vmatprep.subr.bf16.mxu1 %v8052_v40  ;;  %v8058_v40 = vld [vmem:[#allocation76_spill] sm:$0xff] }
 0x3b5   : > { %2065 = vmatmul.mubr.bf16.vlgmr.msra.gmra.mxu1 %v6500_v41  ;;  %2084 = vmatpush1.bf16.msra.mxu0 %v8053_v16 }
 0x3b6   : > { %2119 = vmatpush1.bf16.msra.mxu1 %v8010_v37  ;;  %2085 = vmatprep.subr.bf16.mxu0 %v8054_v46  ;;  %v8060_v46 = vld [vmem:[#allocation111_spill] sm:$0xff] }
 0x3b7   : > { %2120 = vmatprep.subr.bf16.mxu1 %v8055_v58  ;;  %2150 = vmatprep.mubr.bf16.mxu1 %v7821_v1  ;;  %v8061_v58 = vld [vmem:[#allocation56_spill] sm:$0xff] }
 0x3b9   : > { %2086 = vmatpush1.bf16.msra.mxu0 %v8013_v31  ;;  %v6555_v31 = vpop.f32.mrf.mxu0 }
 0x3ba   : > { %2121 = vmatpush1.bf16.msra.mxu1 %v8014_v61  ;;  %2087 = vmatprep.subr.bf16.mxu0 %v8057_v2  ;;  %8062 = vst [vmem:[#allocation71_spill] sm:$0xff] %v6555_v31 }
 0x3bb   : > { %2122 = vmatprep.subr.bf16.mxu1 %v8058_v40  ;;  %v6563_v45 = vpop.f32.mrf.mxu0 }
 0x3bc   : > { %8064 = vst [vmem:[#allocation70_spill] sm:$0xff] %v6563_v45 }
 0x3bd   : > { %2088 = vmatpush1.bf16.msra.mxu0 %v8016_v39  ;;  %v6568_v31 = vpop.f32.mrf.mxu0 }
 0x3be   : > { %2123 = vmatpush1.bf16.msra.mxu1 %v8017_v13  ;;  %2089 = vmatprep.subr.bf16.mxu0 %v8018_v29  ;;  %v8065_v29 = vld [vmem:[#allocation67_spill] sm:$0xff]  ;;  %8066 = vst [vmem:[#allocation88_spill] sm:$0xff] %v6568_v31 }
 0x3bf   : > { %2124 = vmatprep.subr.bf16.mxu1 %v8060_v46  ;;  %v8069_v31 = vld [vmem:[#allocation55_spill] sm:$0xff] }
 0x3c1   : > { %2090 = vmatpush1.bf16.msra.mxu0 %v8061_v58 }
 0x3c2   : > { %2125 = vmatpush1.bf16.msra.mxu1 %v8020_v20  ;;  %2161 = vmatprep.subr.bf16.mxu0 %v6000_v18  ;;  %v6574_v18 = vpop.f32.mrf.mxu0 }
 0x3c3   : > { %2126 = vmatprep.subr.bf16.mxu1 %v8063_v43  ;;  %8067 = vst [vmem:[#allocation18_spill] sm:$0xff] %v6574_v18 }
 0x3c4   : > { %2108 = vmatmul.mubr.bf16.vlgmr.msra.gmra.mxu0 %v6500_v41  ;;  %v6580_v45 = vpop.f32.mrf.mxu0 }
 0x3c5   : > { %2162 = vmatpush1.bf16.msra.mxu0 %v8022_v21  ;;  %2193 = vmatprep.mubr.bf16.mxu0 %v7821_v1  ;;  %8068 = vst [vmem:[#allocation91_spill] sm:$0xff] %v6580_v45  ;;  %v8074_v45 = vld [vmem:[#allocation120_spill] sm:$0xff] }
 0x3c6   : > { %2127 = vmatpush1.bf16.msra.mxu1 %v8021_v62  ;;  %2163 = vmatprep.subr.bf16.mxu0 %v6024_v30  ;;  %v8082_v30 = vld [vmem:[#allocation119_spill] sm:$0xff] }
 0x3c7   : > { %2128 = vmatprep.subr.bf16.mxu1 %v8065_v29 }
 0x3c9   : > { %2164 = vmatpush1.bf16.msra.mxu0 %v8024_v27 }
 0x3ca   : > { %2129 = vmatpush1.bf16.msra.mxu1 %v8023_v34  ;;  %2165 = vmatprep.subr.bf16.mxu0 %v6054_v38  ;;  %v6586_v38 = vpop.f32.mrf.mxu0 }
 0x3cb   : > { %2130 = vmatprep.subr.bf16.mxu1 %v7900_v54  ;;  %8070 = vst [vmem:[#allocation58_spill] sm:$0xff] %v6586_v38  ;;  %v8076_v38 = vld [vmem:[#allocation45_spill] sm:$0xff] }
 0x3cc   : > { %v6590_v18 = vpop.f32.mrf.mxu0  ;;  %v8079_v54 = vld [vmem:[#allocation113_spill] sm:$0xff] }
 0x3cd   : > { %2166 = vmatpush1.bf16.msra.mxu0 %v5984_v47  ;;  %8071 = vst [vmem:[#allocation60_spill] sm:$0xff] %v6590_v18 }
 0x3ce   : > { %2131 = vmatpush1.bf16.msra.mxu1 %v8025_v55  ;;  %2167 = vmatprep.subr.bf16.mxu0 %v6074_v0  ;;  %v8072_v0 = vld [vmem:[#allocation108_spill] sm:$0xff] }
 0x3cf   : > { %2132 = vmatprep.subr.bf16.mxu1 %v6106_v6  ;;  %v8073_v6 = vld [vmem:[#allocation74_spill] sm:$0xff] }
 0x3d1   : > { %2168 = vmatpush1.bf16.msra.mxu0 %v6028_v59 }
 0x3d2   : > { %2133 = vmatpush1.bf16.msra.mxu1 %v8026_v44  ;;  %2169 = vmatprep.subr.bf16.mxu0 %v6094_v10  ;;  %v6597_v10 = vpop.f32.mrf.mxu0 }
 0x3d3   : > { %2204 = vmatprep.subr.bf16.mxu1 %v8069_v31  ;;  %8075 = vst [vmem:[#allocation87_spill] sm:$0xff] %v6597_v10  ;;  %v8077_v31 = vld [vmem:[#allocation122_spill] sm:$0xff]  ;;  %v8083_v10 = vunpack.i.l.bf16 %v8082_v30 }
 0x3d4   : > { %v6603_v18 = vpop.f32.mrf.mxu0 }
 0x3d5   : > { %2151 = vmatmul.mubr.bf16.vlgmr.msra.gmra.mxu1 %v6500_v41  ;;  %2170 = vmatpush1.bf16.msra.mxu0 %v6039_v17  ;;  %8078 = vst [vmem:[#allocation49_spill] sm:$0xff] %v6603_v18 }
 0x3d6   : > { %2205 = vmatpush1.bf16.msra.mxu1 %v8072_v0  ;;  %2171 = vmatprep.subr.bf16.mxu0 %v8073_v6  ;;  %v8080_v6 = vld [vmem:[#allocation123_spill] sm:$0xff]  ;;  %v6619_v18 = vpop.f32.mrf.mxu0 }
 0x3d7   : > { %2206 = vmatprep.subr.bf16.mxu1 %v8074_v45  ;;  %2236 = vmatprep.mubr.bf16.mxu1 %v7821_v1  ;;  %v8081_v45 = vunpack.i.l.bf16 %v6452_v42  ;;  %8087 = vst [vmem:[#allocation50_spill] sm:$0xff] %v6619_v18 }
 0x3d9   : > { %2172 = vmatpush1.bf16.msra.mxu0 %v7892_v11  ;;  %v1097_v29 = vsel %vm986_vm3, %v8083_v10, %v8081_v45  ;;  %v8090_v11 = vld [vmem:[#allocation51_spill] sm:$0xff] }
 0x3da   : > { %2207 = vmatpush1.bf16.msra.mxu1 %v6008_v24  ;;  %2173 = vmatprep.subr.bf16.mxu0 %v8076_v38  ;;  %v8084_v38 = vunpack.i.h.bf16 %v6452_v42  ;;  %v8086_v24 = vld [vmem:[#allocation21_spill] sm:$0xff]  ;;  %v8092_v42 = vld [vmem:[#allocation118_spill] sm:$0xff] }
 0x3db   : > { %2208 = vmatprep.subr.bf16.mxu1 %v8077_v31  ;;  %v8085_v31 = vunpack.i.h.bf16 %v8082_v30  ;;  %v8091_v30 = vunpack.i.l.bf16 %v6420_v51  ;;  %v8095_v45 = vunpack.i.h.bf16 %v8092_v42 }
 0x3dd   : > { %2174 = vmatpush1.bf16.msra.mxu0 %v6082_v36  ;;  %v1113_v36 = vsel %vm986_vm3, %v8085_v31, %v8084_v38  ;;  %v8093_v38 = vunpack.i.l.bf16 %v8092_v42  ;;  %v8094_v31 = vunpack.i.h.bf16 %v6420_v51  ;;  %v8098_v42 = vld [vmem:[#allocation79_spill] sm:$0xff] }
 0x3de   : > { %2209 = vmatpush1.bf16.msra.mxu1 %v8079_v54  ;;  %2175 = vmatprep.subr.bf16.mxu0 %v6151_v19  ;;  %v8088_v54 = vld [vmem:[#allocation115_spill] sm:$0xff]  ;;  %v6623_v19 = vld [vmem:[#allocation7] sm:$0xff] }
 0x3df   : > { %2210 = vmatprep.subr.bf16.mxu1 %v8080_v6  ;;  %v6625_v6 = vpack.c.bf16 %v1113_v36, %v1097_v29  ;;  %2699 = vrot.lane.b32.xlu1 %v6623_v19, %s4166_s28  ;;  %v1065_v10 = vsel %vm986_vm3, %v8093_v38, %v8091_v30  ;;  %v1081_v18 = vsel %vm986_vm3, %v8095_v45, %v8094_v31  ;;  %v8097_v29 = vld [vmem:[#allocation117_spill] sm:$0xff]  ;;  %v6648_v38 = vld [vmem:[#allocation7 + $0x8] sm:$0xff]  ;;  %v8099_v31 = vunpack.i.h.bf16 %v6472_v5  ;;  %v8100_v45 = vld [vmem:[#allocation30_spill] sm:$0xff] }
 0x3e0   : > { %v6650_v51 = vpack.c.bf16 %v1081_v18, %v1065_v10  ;;  %2800 = vrot.lane.b32.xlu0 %v6648_v38, %s4161_s23  ;;  %v8105_v18 = vld [vmem:[#allocation78_spill] sm:$0xff] }
 0x3e1   : > { %2176 = vmatpush1.bf16.msra.mxu0 %v8086_v24  ;;  %8089 = vst [vmem:[#allocation89_spill] sm:$0xff] %v6625_v6 }
 0x3e2   : > { %2211 = vmatpush1.bf16.msra.mxu1 %v8088_v54  ;;  %3222 = vmatprep.subr.bf16.mxu0 %v7919_v33 }
 0x3e3   : > { %2212 = vmatprep.subr.bf16.mxu1 %v8090_v11  ;;  %2701 = vrot.lane.b32.xlu1 %v6648_v38, %s4166_s28 }
 0x3e4   : > { %2194 = vmatmul.mubr.bf16.vlgmr.msra.gmra.mxu0 %v6500_v41  ;;  %v6641_v36 = vpop.f32.mrf.mxu0 }
 0x3e5   : > { %8096 = vst [vmem:[#allocation26_spill] sm:$0xff] %v6641_v36  ;;  %3223 = vmatpush3.bf16.msra.mxu0 %v6625_v6  ;;  %3238 = vmatprep.mubr.msk.bf16.mxu0 %vm4165_vm4, %v7919_v33  ;;  %v8101_v36 = vunpack.i.h.bf16 %v8100_v45  ;;  %v8103_v6 = vunpack.i.l.bf16 %v8100_v45 }
 0x3e6   : > { %2213 = vmatpush1.bf16.msra.mxu1 %v8097_v29  ;;  %3224 = vmatprep.subr.bf16.mxu0 %v7919_v33  ;;  %v3200_v30 = vpop.f32.mrf.mxu0  ;;  %v8102_v29 = vunpack.i.l.bf16 %v6472_v5  ;;  %v8106_v5 = vld [vmem:[#allocation23_spill] sm:$0xff] }
 0x3e7   : > { %2214 = vmatprep.subr.bf16.mxu1 %v8098_v42  ;;  %v1049_v11 = vsel %vm986_vm3, %v8101_v36, %v8099_v31  ;;  %v6672_v42 = vld [vmem:[#allocation7 + $0x10] sm:$0xff] }
 0x3e8   : > { %v1033_v30 = vsel %vm986_vm3, %v8103_v6, %v8102_v29  ;;  %v6665_v54 = vpop.f32.mrf.mxu0  ;;  %2703 = vrot.lane.b32.xlu1 %v6672_v42, %s4166_s28  ;;  %v8107_v6 = vunpack.i.l.bf16 %v6427_v4  ;;  %v8108_v29 = vld [vmem:[#allocation121_spill] sm:$0xff] }
 0x3e9   : > { %8104 = vst [vmem:[#allocation13_spill] sm:$0xff] %v6665_v54  ;;  %3225 = vmatpush3.bf16.msra.mxu0 %v6650_v51  ;;  %v6674_v36 = vpack.c.bf16 %v1049_v11, %v1033_v30  ;;  %v8109_v31 = vunpack.i.l.bf16 %v8108_v29  ;;  %v8110_v54 = vunpack.i.h.bf16 %v6427_v4  ;;  %v8112_v11 = vld [vmem:[#allocation46_spill] sm:$0xff] }
 0x3ea   : > { %2215 = vmatpush1.bf16.msra.mxu1 %v8105_v18  ;;  %3226 = vmatprep.subr.bf16.mxu0 %v7919_v33  ;;  %v3201_v10 = vpop.f32.mrf.mxu0  ;;  %v8111_v18 = vunpack.i.h.bf16 %v8108_v29  ;;  %v8115_v4 = vld [vmem:[#allocation86_spill] sm:$0xff]  ;;  %v8118_v29 = vld [vmem:[#allocation48_spill] sm:$0xff] }
 0x3eb   : > { %2216 = vmatprep.subr.bf16.mxu1 %v8106_v5  ;;  %v1001_v45 = vsel %vm986_vm3, %v8109_v31, %v8107_v6  ;;  %v8113_v5 = vld [vmem:[#allocation47_spill] sm:$0xff]  ;;  %v6714_v6 = vld [vmem:[#allocation7 + $0x18] sm:$0xff]  ;;  %v8119_v31 = vld [vmem:[#allocation72_spill] sm:$0xff] }
 0x3ec   : > { %v1017_v10 = vsel %vm986_vm3, %v8111_v18, %v8110_v54  ;;  %2749 = vrot.lane.b32.xlu1 %v6623_v19, %s4162_s26  ;;  %v8114_v54 = vld [vmem:[#allocation43_spill] sm:$0xff]  ;;  %v8117_v18 = vld [vmem:[#allocation32_spill] sm:$0xff] }
 0x3ed   : > { %3227 = vmatpush3.bf16.msra.mxu0 %v6674_v36  ;;  %v6692_v30 = vpack.c.bf16 %v1017_v10, %v1001_v45  ;;  %v6719_v45 = vpack.c.bf16 %v8119_v31, %v8118_v29  ;;  %v4002_v10 = vld [vmem:[%s4309_s4 + $0x70] sm:$0xff]  ;;  %v8122_v29 = vld [vmem:[#allocation96_spill] sm:$0xff] }
 0x3ee   : > { %2217 = vmatpush1.bf16.msra.mxu1 %v8112_v11  ;;  %3228 = vmatprep.subr.bf16.mxu0 %v7919_v33 }
 0x3ef   : > { %2218 = vmatprep.subr.bf16.mxu1 %v8113_v5 }
 0x3f0   : > { %2751 = vrot.lane.b32.xlu1 %v6648_v38, %s4162_s26 }
 0x3f1   : > { %3229 = vmatpush3.bf16.msra.mxu0 %v6692_v30 }
 0x3f2   : > { %2219 = vmatpush1.bf16.msra.mxu1 %v6130_v63  ;;  %3230 = vmatprep.subr.bf16.mxu0 %v7919_v33 }
 0x3f3   : > { %2318 = vmatprep.subr.bf16.mxu1 %v7983_v14  ;;  %v8116_v14 = vld [vmem:[#allocation41_spill] sm:$0xff] }
 0x3f4   : > { %2753 = vrot.lane.b32.xlu1 %v6672_v42, %s4162_s26 }
 0x3f5   : > { %2237 = vmatmul.mubr.bf16.vlgmr.msra.gmra.mxu1 %v6500_v41  ;;  %3231 = vmatpush3.bf16.msra.mxu0 %v8114_v54 }
 0x3f6   : > { %2319 = vmatpush1.bf16.msra.mxu1 %v8115_v4  ;;  %3232 = vmatprep.subr.bf16.mxu0 %v7919_v33  ;;  %v8121_v4 = vld [vmem:[#allocation36_spill] sm:$0xff] }
 0x3f7   : > { %2320 = vmatprep.subr.bf16.mxu1 %v7986_v15  ;;  %2350 = vmatprep.mubr.bf16.mxu1 %v7821_v1  ;;  %v8120_v15 = vld [vmem:[#allocation94_spill] sm:$0xff] }
 0x3f8   : > { %2705 = vrot.lane.b32.xlu1 %v6714_v6, %s4166_s28 }
 0x3f9   : > { %3233 = vmatpush3.bf16.msra.mxu0 %v8116_v14 }
 0x3fa   : > { %2321 = vmatpush1.bf16.msra.mxu1 %v8117_v18  ;;  %3234 = vmatprep.subr.bf16.mxu0 %v7919_v33  ;;  %v6729_v18 = vpack.c.bf16 %v8121_v4, %v4002_v10  ;;  %v8145_v10 = vld [vmem:[#allocation20_spill] sm:$0xff] }
 0x3fb   : > { %2322 = vmatprep.subr.bf16.mxu1 %v7989_v3  ;;  %v6731_v3 = vpop.f32.mrf.mxu1 }
 0x3fc   : > { %2798 = vrot.lane.b32.xlu1 %v6623_v19, %s4161_s23 }
 0x3fd   : > { %3235 = vmatpush3.bf16.msra.mxu0 %v6719_v45  ;;  %v6739_v31 = vpop.f32.mrf.mxu1 }
 0x3fe   : > { %2323 = vmatpush1.bf16.msra.mxu1 %v8120_v15  ;;  %3236 = vmatprep.subr.bf16.mxu0 %v7919_v33 }
 0x3ff   : > { %2324 = vmatprep.subr.bf16.mxu1 %v7991_v49  ;;  %v6749_v49 = vpop.f32.mrf.mxu1 }
 0x400   : > { %2802 = vrot.lane.b32.xlu1 %v6672_v42, %s4161_s23 }
 0x401   : > { %3237 = vmatpush3.bf16.msra.mxu0 %v6729_v18 }
 0x402   : > { %2325 = vmatpush1.bf16.msra.mxu1 %v8122_v29  ;;  %2361 = vmatprep.subr.bf16.mxu0 %v7994_v60  ;;  %v8131_v60 = vld [vmem:[#allocation80_spill] sm:$0xff]  ;;  %v8146_v29 = vld [vmem:[#allocation114_spill] sm:$0xff] }
 0x403   : > { %2326 = vmatprep.subr.bf16.mxu1 %v8040_v7  ;;  %v8142_v7 = vld [vmem:[#allocation42_spill] sm:$0xff] }
 0x404   : > { %3239 = vmatmul.mubr.bf16.vlgmr.msra.gmra.mxu0 %v6500_v41  ;;  %2755 = vrot.lane.b32.xlu1 %v6714_v6, %s4162_s26 }
 0x405   : > { %2362 = vmatpush1.bf16.msra.mxu0 %v5684_v52  ;;  %2393 = vmatprep.mubr.bf16.mxu0 %v7821_v1  ;;  %v6757_v52 = vpop.f32.mrf.mxu1 }
 0x406   : > { %2327 = vmatpush1.bf16.msra.mxu1 %v7981_v56  ;;  %2363 = vmatprep.subr.bf16.mxu0 %v7998_v50  ;;  %v8127_v56 = vld [vmem:[#allocation52_spill] sm:$0xff] }
 0x407   : > { %2328 = vmatprep.subr.bf16.mxu1 %v8043_v25  ;;  %v6762_v50 = vpop.f32.mrf.mxu1  ;;  %v8144_v25 = vld [vmem:[#allocation115_spill] sm:$0xff] }
 0x408   : > { %2804 = vrot.lane.b32.xlu1 %v6714_v6, %s4161_s23 }
 0x409   : > { %2364 = vmatpush1.bf16.msra.mxu0 %v5654_v12  ;;  %v6768_v12 = vld [vmem:[#allocation5 + $0xc] ss:$16 sps:$4 sm:$0xff]  }
 0x40a   : > { %2329 = vmatpush1.bf16.msra.mxu1 %v7984_v28  ;;  %2365 = vmatprep.subr.bf16.mxu0 %v8046_v26  ;;  %v8125_v26 = vld [vmem:[#allocation100_spill] sm:$0xff] }
 0x40b   : > { %2330 = vmatprep.subr.bf16.mxu1 %v8047_v8  ;;  %v6770_v8 = vpop.f32.mrf.mxu1 }
 0x40d   : > { %2366 = vmatpush1.bf16.msra.mxu0 %v5752_v48  ;;  %v6777_v48 = vpop.f32.mrf.mxu1 }
 0x40e   : > { %2331 = vmatpush1.bf16.msra.mxu1 %v7987_v53  ;;  %2367 = vmatprep.subr.bf16.mxu0 %v8049_v23  ;;  %v8123_v23 = vld [vmem:[#allocation75_spill] sm:$0xff]  ;;  %v8128_v53 = vld [vmem:[#allocation77_spill] sm:$0xff] }
 0x40f   : > { %2332 = vmatprep.subr.bf16.mxu1 %v8050_v57  ;;  %v8138_v57 = vld [vmem:[#allocation67_spill] sm:$0xff] }
 0x411   : > { %2368 = vmatpush1.bf16.msra.mxu0 %v5824_v32  ;;  %v8124_v32 = vld [vmem:[#allocation61_spill] sm:$0xff] }
 0x412   : > { %2333 = vmatpush1.bf16.msra.mxu1 %v5537_v22  ;;  %2369 = vmatprep.subr.bf16.mxu0 %v8053_v16  ;;  %v6784_v22 = vpop.f32.mrf.mxu1 }
 0x413   : > { %2404 = vmatprep.subr.bf16.mxu1 %v8010_v37  ;;  %v8126_v37 = vld [vmem:[#allocation35_spill] sm:$0xff] }
 0x415   : > { %2351 = vmatmul.mubr.bf16.vlgmr.msra.gmra.mxu1 %v6768_v12  ;;  %2370 = vmatpush1.bf16.msra.mxu0 %v7844_v9  ;;  %v6789_v9 = vpop.f32.mrf.mxu1 }
 0x416   : > { %2405 = vmatpush1.bf16.msra.mxu1 %v7992_v35  ;;  %2371 = vmatprep.subr.bf16.mxu0 %v8123_v23  ;;  %v8129_v35 = vld [vmem:[#allocation105_spill] sm:$0xff] }
 0x417   : > { %2406 = vmatprep.subr.bf16.mxu1 %v8014_v61  ;;  %2436 = vmatprep.mubr.bf16.mxu1 %v7821_v1  ;;  %v6795_v28 = vpop.f32.mrf.mxu1  ;;  %v8132_v61 = vld [vmem:[#allocation44_spill] sm:$0xff]  ;;  %v8147_v23 = vld [vmem:[#allocation89_spill] sm:$0xff] }
 0x419   : > { %2372 = vmatpush1.bf16.msra.mxu0 %v8124_v32  ;;  %v8148_v32 = vld [vmem:[#allocation117_spill] sm:$0xff] }
 0x41a   : > { %2407 = vmatpush1.bf16.msra.mxu1 %v8125_v26  ;;  %2373 = vmatprep.subr.bf16.mxu0 %v8016_v39  ;;  %v6801_v39 = vpop.f32.mrf.mxu1 }
 0x41b   : > { %2408 = vmatprep.subr.bf16.mxu1 %v8017_v13  ;;  %v8130_v13 = vld [vmem:[#allocation17_spill] sm:$0xff] }
 0x41d   : > { %2374 = vmatpush1.bf16.msra.mxu0 %v8126_v37  ;;  %v8149_v37 = vld [vmem:[#allocation55_spill] sm:$0xff] }
 0x41e   : > { %2409 = vmatpush1.bf16.msra.mxu1 %v8127_v56  ;;  %2375 = vmatprep.subr.bf16.mxu0 %v8061_v58  ;;  %v8143_v58 = vld [vmem:[#allocation112_spill] sm:$0xff] }
 0x41f   : > { %2410 = vmatprep.subr.bf16.mxu1 %v8020_v20  ;;  %v6809_v20 = vpop.f32.mrf.mxu1 }
 0x421   : > { %2376 = vmatpush1.bf16.msra.mxu0 %v8128_v53  ;;  %v8150_v53 = vld [vmem:[#allocation38_spill] sm:$0xff] }
 0x422   : > { %2411 = vmatpush1.bf16.msra.mxu1 %v8129_v35  ;;  %2447 = vmatprep.subr.bf16.mxu0 %v8022_v21  ;;  %v6812_v21 = vpop.f32.mrf.mxu1  ;;  %v8151_v35 = vld [vmem:[#allocation78_spill] sm:$0xff] }
 0x423   : > { %2412 = vmatprep.subr.bf16.mxu1 %v8021_v62  ;;  %v8133_v62 = vld [vmem:[#allocation69_spill] sm:$0xff] }
 0x424   : > { %2394 = vmatmul.mubr.bf16.vlgmr.msra.gmra.mxu0 %v6768_v12  ;;  %v6818_v16 = vpop.f32.mrf.mxu1 }
 0x425   : > { %2448 = vmatpush1.bf16.msra.mxu0 %v8130_v13  ;;  %2479 = vmatprep.mubr.bf16.mxu0 %v7821_v1 }
 0x426   : > { %2413 = vmatpush1.bf16.msra.mxu1 %v8131_v60  ;;  %2449 = vmatprep.subr.bf16.mxu0 %v8024_v27  ;;  %v8134_v27 = vld [vmem:[#allocation15_spill] sm:$0xff]  ;;  %v8152_v60 = vld [vmem:[#allocation120_spill] sm:$0xff] }
 0x427   : > { %2414 = vmatprep.subr.bf16.mxu1 %v8023_v34  ;;  %v6824_v34 = vpop.f32.mrf.mxu1 }
 0x429   : > { %2450 = vmatpush1.bf16.msra.mxu0 %v8132_v61 }
 0x42a   : > { %2415 = vmatpush1.bf16.msra.mxu1 %v8133_v62  ;;  %2451 = vmatprep.subr.bf16.mxu0 %v5984_v47  ;;  %v8135_v47 = vld [vmem:[#allocation107_spill] sm:$0xff]  ;;  %v8153_v62 = vld [vmem:[#allocation74_spill] sm:$0xff] }
 0x42b   : > { %2416 = vmatprep.subr.bf16.mxu1 %v8025_v55  ;;  %v6831_v55 = vpop.f32.mrf.mxu1 }
 0x42d   : > { %2452 = vmatpush1.bf16.msra.mxu0 %v8058_v40 }
 0x42e   : > { %2417 = vmatpush1.bf16.msra.mxu1 %v8057_v2  ;;  %2453 = vmatprep.subr.bf16.mxu0 %v6028_v59  ;;  %v8136_v59 = vld [vmem:[#allocation73_spill] sm:$0xff]  ;;  %v6837_v2 = vpop.f32.mrf.mxu1 }
 0x42f   : > { %2418 = vmatprep.subr.bf16.mxu1 %v8026_v44  ;;  %v8137_v44 = vld [vmem:[#allocation109_spill] sm:$0xff] }
 0x430   : > { %v6845_v41 = vpop.f32.mrf.mxu1 }
 0x431   : > { %2454 = vmatpush1.bf16.msra.mxu0 %v8060_v46  ;;  %v8140_v46 = vld [vmem:[#allocation116_spill] sm:$0xff] }
 0x432   : > { %2419 = vmatpush1.bf16.msra.mxu1 %v8134_v27  ;;  %2455 = vmatprep.subr.bf16.mxu0 %v6039_v17  ;;  %v6840_v17 = vpop.f32.mrf.mxu0  ;;  %v6853_v15 = vpop.f32.mrf.mxu1  ;;  %v8154_v27 = vld [vmem:[#allocation122_spill] sm:$0xff] }
 0x433   : > { %2490 = vmatprep.subr.bf16.mxu1 %v8072_v0  ;;  %v8139_v0 = vld [vmem:[#allocation110_spill] sm:$0xff] }
 0x434   : > { %v6848_v40 = vpop.f32.mrf.mxu0  ;;  %v6861_v26 = vpop.f32.mrf.mxu1 }
 0x435   : > { %2437 = vmatmul.mubr.bf16.vlgmr.msra.gmra.mxu1 %v6768_v12  ;;  %2456 = vmatpush1.bf16.msra.mxu0 %v8063_v43  ;;  %v8141_v43 = vld [vmem:[#allocation113_spill] sm:$0xff] }
 0x436   : > { %2491 = vmatpush1.bf16.msra.mxu1 %v8135_v47  ;;  %2457 = vmatprep.subr.bf16.mxu0 %v8136_v59  ;;  %v6856_v4 = vpop.f32.mrf.mxu0  ;;  %v6868_v56 = vpop.f32.mrf.mxu1 }
 0x437   : > { %2492 = vmatprep.subr.bf16.mxu1 %v8137_v44  ;;  %2522 = vmatprep.mubr.bf16.mxu1 %v7821_v1  ;;  %v8156_v44 = vld [vmem:[#allocation123_spill] sm:$0xff] }
 0x438   : > { %v6876_v61 = vpop.f32.mrf.mxu1 }
 0x439   : > { %2458 = vmatpush1.bf16.msra.mxu0 %v8138_v57 }
 0x43a   : > { %2493 = vmatpush1.bf16.msra.mxu1 %v8139_v0  ;;  %2459 = vmatprep.subr.bf16.mxu0 %v8140_v46  ;;  %v6884_v47 = vpop.f32.mrf.mxu1  ;;  %v8159_v46 = vld [vmem:[#allocation31_spill] sm:$0xff] }
 0x43b   : > { %2494 = vmatprep.subr.bf16.mxu1 %v8141_v43  ;;  %v8160_v43 = vld [vmem:[#allocation64_spill] sm:$0xff] }
 0x43c   : > { %v6892_v57 = vpop.f32.mrf.mxu1 }
 0x43d   : > { %2460 = vmatpush1.bf16.msra.mxu0 %v8142_v7  ;;  %v8161_v7 = vpack.c.bf16 %v8159_v46, %v8160_v43  ;;  %v8174_v43 = vld [vmem:[#allocation22_spill] sm:$0xff] }
 0x43e   : > { %2495 = vmatpush1.bf16.msra.mxu1 %v8143_v58  ;;  %2461 = vmatprep.subr.bf16.mxu0 %v8086_v24  ;;  %v6866_v24 = vpop.f32.mrf.mxu0 }
 0x43f   : > { %2496 = vmatprep.subr.bf16.mxu1 %v8144_v25  ;;  %v8162_v25 = vld [vmem:[#allocation79_spill] sm:$0xff] }
 0x440   : > { %v6873_v13 = vpop.f32.mrf.mxu0 }
 0x441   : > { %2462 = vmatpush1.bf16.msra.mxu0 %v8145_v10 }
 0x442   : > { %2497 = vmatpush1.bf16.msra.mxu1 %v8146_v29  ;;  %2533 = vmatprep.subr.bf16.mxu0 %v8147_v23  ;;  %v8163_v29 = vld [vmem:[#allocation54_spill] sm:$0xff]  ;;  %v8164_v23 = vld [vmem:[#allocation84_spill] sm:$0xff] }
 0x443   : > { %2498 = vmatprep.subr.bf16.mxu1 %v8148_v32  ;;  %v8165_v32 = vpack.c.bf16 %v8163_v29, %v8164_v23 }
 0x444   : > { %2480 = vmatmul.mubr.bf16.vlgmr.msra.gmra.mxu0 %v6768_v12 }
 0x445   : > { %2534 = vmatpush1.bf16.msra.mxu0 %v8149_v37  ;;  %2565 = vmatprep.mubr.bf16.mxu0 %v7821_v1  ;;  %v6881_v1 = vpop.f32.mrf.mxu0 }
 0x446   : > { %2499 = vmatpush1.bf16.msra.mxu1 %v8150_v53  ;;  %2535 = vmatprep.subr.bf16.mxu0 %v6650_v51  ;;  %v8155_v51 = vld [vmem:[#allocation45_spill] sm:$0xff] }
 0x447   : > { %2500 = vmatprep.subr.bf16.mxu1 %v8151_v35  ;;  %v6889_v59 = vpop.f32.mrf.mxu0  ;;  %v8167_v35 = vld [vmem:[#allocation65_spill] sm:$0xff] }
 0x449   : > { %2536 = vmatpush1.bf16.msra.mxu0 %v8152_v60  ;;  %v8168_v60 = vld [vmem:[#allocation85_spill] sm:$0xff] }
 0x44a   : > { %2501 = vmatpush1.bf16.msra.mxu1 %v8153_v62  ;;  %2537 = vmatprep.subr.bf16.mxu0 %v6674_v36  ;;  %v8157_v36 = vld [vmem:[#allocation24_spill] sm:$0xff]  ;;  %v8169_v62 = vpack.c.bf16 %v8167_v35, %v8168_v60  ;;  %v8181_v35 = vld [vmem:[#allocation63_spill] sm:$0xff]  ;;  %v8182_v60 = vld [vmem:[#allocation62_spill] sm:$0xff] }
 0x44b   : > { %2502 = vmatprep.subr.bf16.mxu1 %v8112_v11  ;;  %v6897_v11 = vpop.f32.mrf.mxu0 }
 0x44d   : > { %2538 = vmatpush1.bf16.msra.mxu0 %v8154_v27 }
 0x44e   : > { %2503 = vmatpush1.bf16.msra.mxu1 %v8155_v51  ;;  %2539 = vmatprep.subr.bf16.mxu0 %v6692_v30  ;;  %v8158_v30 = vld [vmem:[#allocation51_spill] sm:$0xff]  ;;  %v8170_v51 = vld [vmem:[#allocation33_spill] sm:$0xff] }
 0x44f   : > { %2504 = vmatprep.subr.bf16.mxu1 %v6130_v63  ;;  %v6903_v63 = vpop.f32.mrf.mxu0 }
 0x451   : > { %2540 = vmatpush1.bf16.msra.mxu0 %v8156_v44  ;;  %v6915_v10 = vpop.f32.mrf.mxu0 }
 0x452   : > { %2505 = vmatpush1.bf16.msra.mxu1 %v8157_v36  ;;  %2541 = vmatprep.subr.bf16.mxu0 %v8114_v54  ;;  %v8173_v36 = vld [vmem:[#allocation53_spill] sm:$0xff] }
 0x453   : > { %3242 = vmatprep.subr.bf16.mxu1 %v7919_v33  ;;  %v6923_v53 = vpop.f32.mrf.mxu0 }
 0x455   : > { %v6899_v0 = vpop.f32.mrf.mxu1  ;;  %2523 = vmatmul.mubr.bf16.vlgmr.msra.gmra.mxu1 %v6768_v12  ;;  %2542 = vmatpush1.bf16.msra.mxu0 %v8158_v30  ;;  %v6931_v27 = vpop.f32.mrf.mxu0  ;;  %v1719_v30 = vadd.f32 %v6812_v21, %v8173_v36  ;;  %v1764_v36 = vadd.f32 %v6848_v40, %v6739_v31  ;;  %v8187_v31 = vld [vmem:[#allocation58_spill] sm:$0xff] }
 0x456   : > { %3243 = vmatpush3.bf16.msra.mxu1 %v8161_v7  ;;  %2543 = vmatprep.subr.bf16.mxu0 %v8116_v14  ;;  %v8166_v14 = vld [vmem:[#allocation23_spill] sm:$0xff]  ;;  %v8175_v7 = vld [vmem:[#allocation90_spill] sm:$0xff]  ;;  %v1811_v40 = vadd.f32 %v6861_v26, %v8187_v31  ;;  %v1852_v26 = vadd.f32 %v6889_v59, %v6777_v48  ;;  %v8190_v59 = vld [vmem:[#allocation49_spill] sm:$0xff] }
 0x457   : > { %v3220_v58 = vpop.f32.mrf.mxu1  ;;  %3244 = vmatprep.subr.bf16.mxu1 %v7919_v33  ;;  %3258 = vmatprep.mubr.msk.bf16.mxu1 %vm4165_vm4, %v7919_v33  ;;  %v1895_v31 = vadd.f32 %v6884_v47, %v8190_v59 }
 0x459   : > { %v6912_v54 = vpop.f32.mrf.mxu1  ;;  %2544 = vmatpush1.bf16.msra.mxu0 %v8162_v25  ;;  %v8177_v25 = vld [vmem:[#allocation71_spill] sm:$0xff] }
 0x45a   : > { %3245 = vmatpush3.bf16.msra.mxu1 %v8165_v32  ;;  %2545 = vmatprep.subr.bf16.mxu0 %v6719_v45  ;;  %v8171_v45 = vld [vmem:[#allocation93_spill] sm:$0xff]  ;;  %v1723_v29 = vadd.f32 %v6824_v34, %v8177_v25  ;;  %v8178_v32 = vld [vmem:[#allocation66_spill] sm:$0xff] }
 0x45b   : > { %v3221_v37 = vpop.f32.mrf.mxu1  ;;  %3246 = vmatprep.subr.bf16.mxu1 %v7919_v33  ;;  %v8172_v44 = vpack.c.bf16 %v8170_v51, %v8171_v45  ;;  %v4003_v51 = vld [vmem:[%s4309_s4 + $0x78] sm:$0xff]  ;;  %v8184_v45 = vld [vmem:[#allocation37_spill] sm:$0xff]  ;;  %v8186_v25 = vld [vmem:[#allocation18_spill] sm:$0xff] }
 0x45c   : > { %v8179_v37 = vld [vmem:[#allocation124_spill] sm:$0xff]  ;;  %v1258_v34 = vpack.c.bf16 %v8184_v45, %v4003_v51  ;;  %v1850_v51 = vadd.f32 %v6881_v1, %v6770_v8 }
 0x45d   : > { %2546 = vmatpush1.bf16.msra.mxu0 %v8166_v14  ;;  %v8180_v14 = vpack.c.bf16 %v8178_v32, %v8179_v37 }
 0x45e   : > { %3247 = vmatpush3.bf16.msra.mxu1 %v8169_v62  ;;  %2547 = vmatprep.subr.bf16.mxu0 %v6729_v18  ;;  %v8183_v62 = vpack.c.bf16 %v8181_v35, %v8182_v60 }
 0x45f   : > { %3248 = vmatprep.subr.bf16.mxu1 %v7919_v33 }
 0x461   : > { %2548 = vmatpush1.bf16.msra.mxu0 %v8113_v5  ;;  %v8176_v5 = vpack.c.bf16 %v8174_v43, %v8175_v7  ;;  %v8185_v7 = vld [vmem:[#allocation88_spill] sm:$0xff] }
 0x462   : > { %3249 = vmatpush3.bf16.msra.mxu1 %v8172_v44 }
 0x463   : > { %3250 = vmatprep.subr.bf16.mxu1 %v7919_v33 }
 0x464   : > { %v2023_v46 = vpop.f32.mrf.mxu0  ;;  %2566 = vmatmul.mubr.bf16.vlgmr.msra.gmra.mxu0 %v6768_v12 }
 0x465   : > { %v6940_v18 = vadd.f32 %v2023_v46, %v1719_v30 }
 0x466   : > { %3251 = vmatpush3.bf16.msra.mxu1 %v8176_v5  ;;  %v6945_v58 = vpop.f32.mrf.mxu0  ;;  %v1805_v5 = vadd.f32 %v6837_v2, %v8185_v7  ;;  %v1854_v7 = vadd.f32 %v6897_v11, %v6784_v22  ;;  %v8191_v11 = vld [vmem:[#allocation50_spill] sm:$0xff] }
 0x467   : > { %3252 = vmatprep.subr.bf16.mxu1 %v7919_v33 }
 0x468   : > { %v2027_v23 = vpop.f32.mrf.mxu0 }
 0x469   : > { %v6950_v21 = vadd.f32 %v2027_v23, %v1723_v29  ;;  %v1807_v29 = vadd.f32 %v6845_v41, %v8186_v25  ;;  %v1848_v41 = vadd.f32 %v6873_v13, %v6762_v50  ;;  %v8188_v13 = vld [vmem:[#allocation60_spill] sm:$0xff]  ;;  %v8189_v25 = vld [vmem:[#allocation87_spill] sm:$0xff] }
 0x46a   : > { %3253 = vmatpush3.bf16.msra.mxu1 %v8180_v14  ;;  %v6969_v43 = vpop.f32.mrf.mxu0  ;;  %v1891_v8 = vadd.f32 %v6868_v56, %v8188_v13 }
 0x46b   : > { %3254 = vmatprep.subr.bf16.mxu1 %v7919_v33 }
 0x46e   : > { %3255 = vmatpush3.bf16.msra.mxu1 %v8183_v62 }
 0x46f   : > { %3256 = vmatprep.subr.bf16.mxu1 %v7919_v33 }
 0x472   : > { %3257 = vmatpush3.bf16.msra.mxu1 %v1258_v34 }
 0x475   : > { %v6962_v44 = vpop.f32.mrf.mxu1  ;;  %3259 = vmatmul.mubr.bf16.vlgmr.msra.gmra.mxu1 %v6768_v12 }
 0x477   : > { %v2068_v30 = vpop.f32.mrf.mxu1 }
 0x478   : > { %v6967_v46 = vadd.f32 %v2068_v30, %v1764_v36 }
 0x479   : > { %v6985_v60 = vpop.f32.mrf.mxu1 }
 0x47b   : > { %v6987_v2 = vpop.f32.mrf.mxu1 }
 0x484   : > { %v2109_v33 = vpop.f32.mrf.mxu0 }
 0x485   : > { %v6975_v23 = vadd.f32 %v2109_v33, %v1805_v5 }
 0x486   : > { %v2111_v32 = vpop.f32.mrf.mxu0 }
 0x487   : > { %v6977_v37 = vadd.f32 %v2111_v32, %v1807_v29  ;;  %v1893_v29 = vadd.f32 %v6876_v61, %v8189_v25  ;;  %v1934_v61 = vadd.f32 %v6903_v63, %v6789_v9  ;;  %v8192_v63 = vld [vmem:[#allocation26_spill] sm:$0xff] }
 0x488   : > { %v6979_v12 = vpop.f32.mrf.mxu0 }
 0x48a   : > { %v2115_v14 = vpop.f32.mrf.mxu0 }
 0x48b   : > { %v6983_v35 = vadd.f32 %v2115_v14, %v1811_v40  ;;  %v1897_v14 = vadd.f32 %v6892_v57, %v8191_v11 }
 0x495   : > { %v2152_v62 = vpop.f32.mrf.mxu1 }
 0x496   : > { %v6993_v45 = vadd.f32 %v2152_v62, %v1848_v41 }
 0x497   : > { %v2154_v34 = vpop.f32.mrf.mxu1 }
 0x498   : > { %v6997_v36 = vadd.f32 %v2154_v34, %v1850_v51  ;;  %v1936_v34 = vadd.f32 %v6915_v10, %v6795_v28  ;;  %v1977_v28 = vadd.f32 %v6899_v0, %v8192_v63 }
 0x499   : > { %v2156_v30 = vpop.f32.mrf.mxu1 }
 0x49a   : > { %v7001_v5 = vadd.f32 %v2156_v30, %v1852_v26  ;;  %v1938_v30 = vadd.f32 %v6923_v53, %v6801_v39 }
 0x49b   : > { %v2158_v33 = vpop.f32.mrf.mxu1 }
 0x49c   : > { %v7003_v50 = vadd.f32 %v2158_v33, %v1854_v7  ;;  %v1940_v33 = vadd.f32 %v6931_v27, %v6809_v20  ;;  %v8194_v27 = vld [vmem:[#allocation25_spill] sm:$0xff] }
 0x4a4   : > { %v2195_v1 = vpop.f32.mrf.mxu0 }
 0x4a5   : > { %v7009_v32 = vadd.f32 %v2195_v1, %v1891_v8 }
 0x4a6   : > { %v2197_v48 = vpop.f32.mrf.mxu0 }
 0x4a7   : > { %v7013_v40 = vadd.f32 %v2197_v48, %v1893_v29  ;;  %v8193_v29 = vld [vmem:[#allocation13_spill] sm:$0xff] }
 0x4a8   : > { %v2199_v22 = vpop.f32.mrf.mxu0  ;;  %v1980_v39 = vadd.f32 %v6912_v54, %v8193_v29 }
 0x4a9   : > { %v7017_v41 = vadd.f32 %v2199_v22, %v1895_v31  ;;  %v1721_v31 = vadd.f32 %v6818_v16, %v8194_v27  ;;  %v7047_v22 = vpop.permute.xlu1 %2699  ;;  %v1768_v27 = vadd.f32 %v6866_v24, %v6757_v52 }
 0x4aa   : > { %v2201_v62 = vpop.f32.mrf.mxu0 }
 0x4ab   : > { %v7019_v56 = vadd.f32 %v2201_v62, %v1897_v14  ;;  %v8195_v14 = vld [vmem:[#allocation70_spill] sm:$0xff]  ;;  %v2289_v62 = vadd.f32 %v6945_v58, %v1721_v31 }
 0x4ac   : > { %v1725_v0 = vadd.f32 %v6831_v55, %v8195_v14 }
 0x4ae   : > { %v2302_v54 = vadd.f32 %v6969_v43, %v1725_v0 }
 0x4b5   : > { %v2238_v51 = vpop.f32.mrf.mxu1 }
 0x4b6   : > { %v7025_v26 = vadd.f32 %v2238_v51, %v1934_v61 }
 0x4b7   : > { %v2240_v47 = vpop.f32.mrf.mxu1 }
 0x4b8   : > { %v7029_v7 = vadd.f32 %v2240_v47, %v1936_v34 }
 0x4b9   : > { %v2242_v57 = vpop.f32.mrf.mxu1 }
 0x4ba   : > { %v7033_v13 = vadd.f32 %v2242_v57, %v1938_v30 }
 0x4bb   : > { %v2244_v8 = vpop.f32.mrf.mxu1 }
 0x4bc   : > { %v7035_v9 = vadd.f32 %v2244_v8, %v1940_v33  ;;  %v7055_v33 = vpop.permute.xlu1 %2701 }
 0x4bd   : > { %v7078_v52 = vsel %vm2707_vm5, %v7047_v22, %v7055_v33 }
 0x4c0   : > { %v7060_v43 = vpop.permute.xlu1 %2703 }
 0x4c4   : > { %v2281_v10 = vpop.f32.mrf.mxu0  ;;  %v7071_v14 = vpop.permute.xlu1 %2749 }
 0x4c5   : > { %v7039_v1 = vadd.f32 %v2281_v10, %v1977_v28 }
 0x4c6   : > { %v3240_v25 = vpop.f32.mrf.mxu0 }
 0x4c8   : > { %v2284_v53 = vpop.f32.mrf.mxu0  ;;  %v2752_v24 = vpop.permute.xlu1 %2751 }
 0x4c9   : > { %v7043_v48 = vadd.f32 %v2284_v53, %v1980_v39  ;;  %v1766_v53 = vadd.f32 %v6856_v4, %v6749_v49 }
 0x4ca   : > { %v3241_v59 = vpop.f32.mrf.mxu0 }
 0x4cb   : > { %v2303_v31 = vadd.f32 %v6985_v60, %v1766_v53 }
 0x4d5   : > { %v2352_v20 = vpop.f32.mrf.mxu1 }
 0x4d6   : > { %v2617_v61 = vadd.f32 %v2352_v20, %v6940_v18 }
 0x4d7   : > { %v2354_v11 = vpop.f32.mrf.mxu1 }
 0x4d8   : > { %v2618_v34 = vadd.f32 %v2354_v11, %v2289_v62  ;;  %v2643_v57 = vmul.f32 %v2617_v61, %v2617_v61 }
 0x4d9   : > { %v2356_v51 = vpop.f32.mrf.mxu1 }
 0x4da   : > { %v2630_v47 = vadd.f32 %v2356_v51, %v6950_v21  ;;  %v2644_v63 = vmul.f32 %v2618_v34, %v2618_v34  ;;  %v1762_v21 = vadd.f32 %v6840_v17, %v6731_v3  ;;  %v2304_v3 = vadd.f32 %v6987_v2, %v1768_v27 }
 0x4db   : > { %v2358_v30 = vpop.f32.mrf.mxu1 }
 0x4dc   : > { %v2656_v16 = vmul.f32 %v2630_v47, %v2630_v47  ;;  %v2631_v8 = vadd.f32 %v2358_v30, %v2302_v54  ;;  %v2290_v59 = vadd.f32 %v6962_v44, %v1762_v21 }
 0x4de   : > { %v2669_v28 = vadd.f32 %v2656_v16, %v2643_v57  ;;  %v2657_v10 = vmul.f32 %v2631_v8, %v2631_v8  ;;  %v7088_v16 = vpop.permute.xlu1 %2753 }
 0x4e0   : > { %v2670_v55 = vadd.f32 %v2657_v10, %v2644_v63  ;;  %v2686_v58 = vmul.f32 %v6623_v19, %v2669_v28  ;;  %v8196_v28 = vld [vmem:[#allocation91_spill] sm:$0xff] }
 0x4e1   : > { %v1809_v10 = vadd.f32 %v6853_v15, %v8196_v28  ;;  %v2801_v15 = vpop.permute.xlu0 %2800 }
 0x4e2   : > { %v2687_v18 = vmul.f32 %v6648_v38, %v2670_v55  ;;  %v2716_v25 = vmul.f32 %v7047_v22, %v2670_v55  ;;  %v7097_v21 = vpop.permute.xlu1 %2705 }
 0x4e4   : > { %v2690_v29 = vadd.f32 %v2687_v18, %v2686_v58  ;;  %2726 = vrot.lane.b32.xlu1 %v2716_v25, %s4161_s23  ;;  %v2395_v39 = vpop.f32.mrf.mxu0  ;;  %v2305_v58 = vadd.f32 %v6979_v12, %v1809_v10  ;;  %v7103_v12 = vsel %vm986_vm3, %v2752_v24, %v7088_v16 }
 0x4e5   : > { %v2619_v11 = vadd.f32 %v2395_v39, %v2290_v59 }
 0x4e6   : > { %v2397_v20 = vpop.f32.mrf.mxu0 }
 0x4e7   : > { %v2620_v17 = vadd.f32 %v2397_v20, %v6967_v46  ;;  %v2645_v49 = vmul.f32 %v2619_v11, %v2619_v11 }
 0x4e8   : > { %v2399_v0 = vpop.f32.mrf.mxu0 }
 0x4e9   : > { %v2632_v62 = vadd.f32 %v2399_v0, %v2303_v31  ;;  %v2646_v51 = vmul.f32 %v2620_v17, %v2620_v17 }
 0x4ea   : > { %v2401_v61 = vpop.f32.mrf.mxu0 }
 0x4eb   : > { %v2658_v4 = vmul.f32 %v2632_v62, %v2632_v62  ;;  %v2633_v44 = vadd.f32 %v2401_v61, %v2304_v3 }
 0x4ed   : > { %v2671_v54 = vadd.f32 %v2658_v4, %v2645_v49  ;;  %v2659_v34 = vmul.f32 %v2633_v44, %v2633_v44  ;;  %v2709_v44 = vsel %vm2707_vm5, %v7055_v33, %v7060_v43  ;;  %v2757_v33 = vsel %vm986_vm3, %v7071_v14, %v2752_v24 }
 0x4ef   : > { %v2688_v60 = vmul.f32 %v6672_v42, %v2671_v54  ;;  %v7081_v2 = vadd.f32 %v2659_v34, %v2646_v51  ;;  %v2717_v46 = vmul.f32 %v7078_v52, %v2671_v54  ;;  %v2765_v57 = vmul.f32 %v7071_v14, %v2671_v54 }
 0x4f1   : > { %2728 = vrot.lane.b32.xlu1 %v2717_v46, %s4161_s23  ;;  %v2689_v47 = vmul.f32 %v6714_v6, %v7081_v2  ;;  %v2691_v30 = vadd.f32 %v2690_v29, %v2688_v60  ;;  %v2718_v34 = vmul.f32 %v2709_v44, %v7081_v2 }
 0x4f3   : > { %v7090_v8 = vadd.f32 %v2691_v30, %v2689_v47 }
 0x4f5   : > { %v2438_v63 = vpop.f32.mrf.mxu1  ;;  %2775 = vrot.lane.b32.xlu1 %v2765_v57, %s4162_s26 }
 0x4f6   : > { %v2621_v18 = vadd.f32 %v2438_v63, %v6975_v23  ;;  %v7108_v23 = vsel %vm2707_vm5, %v7060_v43, %v7097_v21 }
 0x4f7   : > { %v2440_v55 = vpop.f32.mrf.mxu1 }
 0x4f8   : > { %v2622_v29 = vadd.f32 %v2440_v55, %v6977_v37  ;;  %v2647_v59 = vmul.f32 %v2621_v18, %v2621_v18  ;;  %v7110_v37 = vpop.permute.xlu1 %2798 }
 0x4f9   : > { %v2442_v25 = vpop.f32.mrf.mxu1  ;;  %v7116_v62 = vsel %vm585_vm2, %v7110_v37, %v2801_v15 }
 0x4fa   : > { %v2634_v39 = vadd.f32 %v2442_v25, %v2305_v58  ;;  %v2648_v31 = vmul.f32 %v2622_v29, %v2622_v29  ;;  %v2814_v29 = vmul.f32 %v7110_v37, %v7081_v2 }
 0x4fb   : > { %v2444_v53 = vpop.f32.mrf.mxu1 }
 0x4fc   : > { %v2660_v20 = vmul.f32 %v2634_v39, %v2634_v39  ;;  %v2635_v27 = vadd.f32 %v2444_v53, %v6983_v35  ;;  %v2803_v18 = vpop.permute.xlu1 %2802 }
 0x4fd   : > { %v7151_v53 = vsel %vm585_vm2, %v2801_v15, %v2803_v18 }
 0x4fe   : > { %v2673_v11 = vadd.f32 %v2660_v20, %v2647_v59  ;;  %v2661_v0 = vmul.f32 %v2635_v27, %v2635_v27 }
 0x500   : > { %v2674_v3 = vadd.f32 %v2661_v0, %v2648_v31  ;;  %v2719_v17 = vmul.f32 %v7108_v23, %v2673_v11  ;;  %v2767_v35 = vmul.f32 %v7103_v12, %v2673_v11  ;;  %v2815_v61 = vmul.f32 %v7116_v62, %v2673_v11  ;;  %v7154_v59 = vpop.permute.xlu1 %2755 }
 0x502   : > { %2732 = vrot.lane.b32.xlu0 %v2719_v17, %s4161_s23  ;;  %2779 = vrot.lane.b32.xlu1 %v2767_v35, %s4162_s26  ;;  %v2720_v28 = vmul.f32 %v7097_v21, %v2674_v3  ;;  %v2847_v55 = vmul.f32 %v6623_v19, %v2674_v3 }
 0x504   : > { %v2481_v49 = vpop.f32.mrf.mxu0 }
 0x505   : > { %v2623_v51 = vadd.f32 %v2481_v49, %v6993_v45 }
 0x506   : > { %2826 = vrot.lane.b32.xlu1 %v2815_v61, %s4166_s28  ;;  %v2483_v4 = vpop.f32.mrf.mxu0 }
 0x507   : > { %v2624_v60 = vadd.f32 %v2483_v4, %v6997_v36  ;;  %v2649_v30 = vmul.f32 %v2623_v51, %v2623_v51 }
 0x508   : > { %v2485_v54 = vpop.f32.mrf.mxu0 }
 0x509   : > { %v2636_v46 = vadd.f32 %v2485_v54, %v7001_v5  ;;  %v2650_v45 = vmul.f32 %v2624_v60, %v2624_v60  ;;  %v2766_v5 = vmul.f32 %v2757_v33, %v7081_v2  ;;  %v7164_v2 = vsel %vm986_vm3, %v7088_v16, %v7154_v59 }
 0x50a   : > { %2730 = vrot.lane.b32.xlu1 %v2718_v34, %s4161_s23  ;;  %v2487_v47 = vpop.f32.mrf.mxu0  ;;  %v2768_v35 = vmul.f32 %v7164_v2, %v2674_v3 }
 0x50b   : > { %v2662_v57 = vmul.f32 %v2636_v46, %v2636_v46  ;;  %v2637_v63 = vadd.f32 %v2487_v47, %v7003_v50 }
 0x50d   : > { %v7134_v43 = vadd.f32 %v2662_v57, %v2649_v30  ;;  %v2663_v10 = vmul.f32 %v2637_v63, %v2637_v63 }
 0x50e   : > { %2734 = vrot.lane.b32.xlu1 %v2720_v28, %s4161_s23 }
 0x50f   : > { %v7137_v36 = vadd.f32 %v2663_v10, %v2650_v45  ;;  %v2848_v50 = vmul.f32 %v6648_v38, %v7134_v43  ;;  %v2769_v60 = vmul.f32 %v7154_v59, %v7134_v43 }
 0x511   : > { %v2857_v58 = vmul.f32 %v7078_v52, %v7137_v36  ;;  %v2849_v24 = vmul.f32 %v6672_v42, %v7137_v36  ;;  %v2851_v25 = vadd.f32 %v2848_v50, %v2847_v55  ;;  %v2816_v52 = vmul.f32 %v7151_v53, %v2674_v3 }
 0x512   : > { %2777 = vrot.lane.b32.xlu1 %v2766_v5, %s4162_s26  ;;  %v2889_v55 = vmul.f32 %v7071_v14, %v7137_v36 }
 0x513   : > { %v2852_v39 = vadd.f32 %v2851_v25, %v2849_v24 }
 0x515   : > { %v2524_v19 = vpop.f32.mrf.mxu1 }
 0x516   : > { %2824 = vrot.lane.b32.xlu1 %v2814_v29, %s4166_s28  ;;  %v2625_v42 = vadd.f32 %v2524_v19, %v7009_v32 }
 0x517   : > { %v2526_v38 = vpop.f32.mrf.mxu1 }
 0x518   : > { %v2626_v27 = vadd.f32 %v2526_v38, %v7013_v40  ;;  %v2651_v0 = vmul.f32 %v2625_v42, %v2625_v42 }
 0x519   : > { %v2528_v20 = vpop.f32.mrf.mxu1 }
 0x51a   : > { %v2638_v31 = vadd.f32 %v2528_v20, %v7017_v41  ;;  %2828 = vrot.lane.b32.xlu1 %v2816_v52, %s4166_s28  ;;  %v2652_v32 = vmul.f32 %v2626_v27, %v2626_v27  ;;  %v2856_v41 = vmul.f32 %v7047_v22, %v7134_v43 }
 0x51b   : > { %v2530_v11 = vpop.f32.mrf.mxu1 }
 0x51c   : > { %v2664_v15 = vmul.f32 %v2638_v31, %v2638_v31  ;;  %v2639_v17 = vadd.f32 %v2530_v11, %v7019_v56 }
 0x51e   : > { %v2677_v61 = vadd.f32 %v2664_v15, %v2651_v0  ;;  %v2665_v49 = vmul.f32 %v2639_v17, %v2639_v17  ;;  %2781 = vrot.lane.b32.xlu1 %v2768_v35, %s4162_s26 }
 0x520   : > { %v2678_v40 = vadd.f32 %v2665_v49, %v2652_v32  ;;  %v2850_v16 = vmul.f32 %v6714_v6, %v2677_v61  ;;  %v2858_v56 = vmul.f32 %v2709_v44, %v2677_v61  ;;  %v2890_v30 = vmul.f32 %v2757_v33, %v2677_v61 }
 0x521   : > { %2693 = vadd.xlane.f32.xlu0 %v7090_v8  ;;  %v2922_v10 = vmul.f32 %v7110_v37, %v2677_v61 }
 0x522   : > { %2866 = vrot.lane.b32.xlu1 %v2856_v41, %s4161_s23  ;;  %v2853_v4 = vadd.f32 %v2852_v39, %v2850_v16  ;;  %v2891_v37 = vmul.f32 %v7103_v12, %v2678_v40  ;;  %v2859_v29 = vmul.f32 %v7108_v23, %v2678_v40 }
 0x524   : > { %v2567_v51 = vpop.f32.mrf.mxu0 }
 0x525   : > { %v2627_v54 = vadd.f32 %v2567_v51, %v7025_v26  ;;  %v2805_v26 = vpop.permute.xlu1 %2804 }
 0x526   : > { %2870 = vrot.lane.b32.xlu1 %v2858_v56, %s4161_s23  ;;  %v2569_v3 = vpop.f32.mrf.mxu0 }
 0x527   : > { %v2628_v22 = vadd.f32 %v2569_v3, %v7029_v7  ;;  %v2653_v46 = vmul.f32 %v2627_v54, %v2627_v54  ;;  %v2808_v7 = vsel %vm585_vm2, %v2803_v18, %v2805_v26 }
 0x528   : > { %v2571_v34 = vpop.f32.mrf.mxu0 }
 0x529   : > { %v2640_v8 = vadd.f32 %v2571_v34, %v7033_v13  ;;  %v2654_v57 = vmul.f32 %v2628_v22, %v2628_v22  ;;  %v2817_v13 = vmul.f32 %v2808_v7, %v7134_v43 }
 0x52a   : > { %2783 = vrot.lane.b32.xlu1 %v2769_v60, %s4162_s26  ;;  %v2573_v6 = vpop.f32.mrf.mxu0 }
 0x52b   : > { %v2666_v47 = vmul.f32 %v2640_v8, %v2640_v8  ;;  %v2641_v44 = vadd.f32 %v2573_v6, %v7035_v9 }
 0x52d   : > { %v2679_v63 = vadd.f32 %v2666_v47, %v2653_v46  ;;  %v2667_v28 = vmul.f32 %v2641_v44, %v2641_v44 }
 0x52e   : > { %2901 = vrot.lane.b32.xlu1 %v2890_v30, %s4162_s26 }
 0x52f   : > { %v2680_v45 = vadd.f32 %v2667_v28, %v2654_v57  ;;  %v2924_v14 = vmul.f32 %v7151_v53, %v2679_v63  ;;  %v2860_v12 = vmul.f32 %v7097_v21, %v2679_v63 }
 0x531   : > { %v2893_v23 = vmul.f32 %v7154_v59, %v2680_v45  ;;  %v2925_v39 = vmul.f32 %v2808_v7, %v2680_v45 }
 0x532   : > { %2932 = vrot.lane.b32.xlu1 %v2922_v10, %s4166_s28 }
 0x535   : > { %v2610_v5 = vpop.f32.mrf.mxu1 }
 0x536   : > { %2868 = vrot.lane.b32.xlu1 %v2857_v58, %s4161_s23  ;;  %v2629_v33 = vadd.f32 %v2610_v5, %v7039_v1  ;;  %v2818_v58 = vmul.f32 %v2805_v26, %v7137_v36  ;;  %v2892_v36 = vmul.f32 %v7164_v2, %v2679_v63 }
 0x537   : > { %v3260_v9 = vpop.f32.mrf.mxu1  ;;  %2830 = vrot.lane.b32.xlu0 %v2817_v13, %s4166_s28 }
 0x538   : > { %v2655_v18 = vmul.f32 %v2629_v33, %v2629_v33 }
 0x539   : > { %v2613_v50 = vpop.f32.mrf.mxu1 }
 0x53a   : > { %v2642_v24 = vadd.f32 %v2613_v50, %v7043_v48  ;;  %2899 = vrot.lane.b32.xlu1 %v2889_v55, %s4162_s26  ;;  %v2923_v48 = vmul.f32 %v7116_v62, %v2678_v40 }
 0x53b   : > { %2903 = vrot.lane.b32.xlu0 %v2891_v37, %s4162_s26  ;;  %v3261_v43 = vpop.f32.mrf.mxu1 }
 0x53c   : > { %v2668_v25 = vmul.f32 %v2642_v24, %v2642_v24 }
 0x53e   : > { %v2681_v1 = vadd.f32 %v2668_v25, %v2655_v18  ;;  %2832 = vrot.lane.b32.xlu1 %v2818_v58, %s4166_s28 }
 0x53f   : > { %2872 = vrot.lane.b32.xlu0 %v2859_v29, %s4161_s23 }
 0x540   : > { %v2926_v62 = vmul.f32 %v2805_v26, %v2681_v1 }
 0x542   : > { %2936 = vrot.lane.b32.xlu1 %v2924_v14, %s4166_s28 }
 0x543   : > { %2934 = vrot.lane.b32.xlu0 %v2923_v48, %s4166_s28 }
 0x546   : > { %2874 = vrot.lane.b32.xlu1 %v2860_v12, %s4161_s23 }
 0x547   : > { %2905 = vrot.lane.b32.xlu0 %v2892_v36, %s4162_s26 }
 0x54a   : > { %2907 = vrot.lane.b32.xlu1 %v2893_v23, %s4162_s26 }
 0x54b   : > { %2938 = vrot.lane.b32.xlu0 %v2925_v39, %s4166_s28 }
 0x54f   : > { %2940 = vrot.lane.b32.xlu0 %v2926_v62, %s4166_s28 }
 0x556   : > { %v2727_v53 = vpop.permute.xlu1 %2726 }
 0x563   : > { %v2729_v19 = vpop.permute.xlu1 %2728 }
 0x564   : > { %v2736_v20 = vsel %vm585_vm2, %v2727_v53, %v2729_v19 }
 0x567   : > { %v2776_v21 = vpop.permute.xlu1 %2775 }
 0x56e   : > { %2854 = vadd.xlane.f32.xlu0 %v2853_v4 }
 0x574   : > { %v2780_v38 = vpop.permute.xlu1 %2779  ;;  %v2733_v59 = vpop.permute.xlu0 %2732 }
 0x578   : > { %v2827_v52 = vpop.permute.xlu1 %2826 }
 0x57c   : > { %v2731_v42 = vpop.permute.xlu1 %2730 }
 0x57d   : > { %v2737_v27 = vsel %vm585_vm2, %v2729_v19, %v2731_v42  ;;  %v2738_v2 = vsel %vm585_vm2, %v2731_v42, %v2733_v59 }
 0x57e   : > { %v2744_v31 = vadd.f32 %v2737_v27, %v2736_v20 }
 0x580   : > { %v2745_v11 = vadd.f32 %v2744_v31, %v2738_v2  ;;  %v2735_v0 = vpop.permute.xlu1 %2734  ;;  %v2956_v31 = vlaneseq }
 0x581   : > { %v2739_v15 = vsel %vm585_vm2, %v2733_v59, %v2735_v0 }
 0x582   : > { %v2746_v17 = vadd.f32 %v2745_v11, %v2739_v15  ;;  %v2957_v11 = vand.u32 127, %v2956_v31  ;;  %v2959_v0 = vshrl.u32 %v2956_v31, 7 }
 0x584   : > { %v2778_v35 = vpop.permute.xlu1 %2777  ;;  %2747 = vadd.xlane.f32.xlu0 %v2746_v17  ;;  %v2960_v17 = vsub.s32 %v2957_v11, %v2959_v0 }
 0x585   : > { %v2785_v41 = vsel %vm986_vm3, %v2776_v21, %v2778_v35  ;;  %v2786_v16 = vsel %vm986_vm3, %v2778_v35, %v2780_v38 }
 0x586   : > { %v2793_v56 = vadd.f32 %v2786_v16, %v2785_v41 }
 0x588   : > { %v2825_v32 = vpop.permute.xlu1 %2824 }
 0x589   : > { %v2834_v30 = vsel %vm2707_vm5, %v2825_v32, %v2827_v52 }
 0x58c   : > { %v2829_v61 = vpop.permute.xlu1 %2828 }
 0x58d   : > { %v2835_v47 = vsel %vm2707_vm5, %v2827_v52, %v2829_v61 }
 0x58e   : > { %v2842_v57 = vadd.f32 %v2835_v47, %v2834_v30 }
 0x590   : > { %v2782_v49 = vpop.permute.xlu1 %2781 }
 0x591   : > { %v2787_v51 = vsel %vm986_vm3, %v2780_v38, %v2782_v49 }
 0x592   : > { %v2794_v3 = vadd.f32 %v2793_v56, %v2787_v51 }
 0x594   : > { %v2867_v40 = vpop.permute.xlu1 %2866 }
 0x598   : > { %v2871_v4 = vpop.permute.xlu1 %2870 }
 0x59c   : > { %v2784_v54 = vpop.permute.xlu1 %2783 }
 0x59d   : > { %v2788_v34 = vsel %vm986_vm3, %v2782_v49, %v2784_v54 }
 0x59e   : > { %v2795_v60 = vadd.f32 %v2794_v3, %v2788_v34 }
 0x5a0   : > { %2796 = vadd.xlane.f32.xlu1 %v2795_v60  ;;  %v2902_v22 = vpop.permute.xlu1 %2901 }
 0x5a4   : > { %v2933_v8 = vpop.permute.xlu1 %2932 }
 0x5a8   : > { %v2869_v6 = vpop.permute.xlu1 %2868 }
 0x5a9   : > { %v2876_v5 = vsel %vm585_vm2, %v2867_v40, %v2869_v6  ;;  %v2877_v9 = vsel %vm585_vm2, %v2869_v6, %v2871_v4 }
 0x5aa   : > { %v7220_v46 = vpop.xlane.xlu0 %2693  ;;  %v2884_v55 = vadd.f32 %v2877_v9, %v2876_v5 }
 0x5ab   : > { %v2961_v40 = vrot.slane %v7220_v46, %v2960_v17 }
 0x5ac   : > { %v2900_v44 = vpop.permute.xlu1 %2899 }
 0x5ad   : > { %v2909_v1 = vsel %vm986_vm3, %v2900_v44, %v2902_v22 }
 0x5ae   : > { %v2831_v63 = vpop.permute.xlu0 %2830 }
 0x5af   : > { %v2836_v28 = vsel %vm2707_vm5, %v2829_v61, %v2831_v63 }
 0x5b0   : > { %v2843_v26 = vadd.f32 %v2842_v57, %v2836_v28  ;;  %v2833_v45 = vpop.permute.xlu1 %2832 }
 0x5b1   : > { %v2837_v10 = vsel %vm2707_vm5, %v2831_v63, %v2833_v45 }
 0x5b2   : > { %v2844_v7 = vadd.f32 %v2843_v26, %v2837_v10  ;;  %v2904_v13 = vpop.permute.xlu0 %2903 }
 0x5b3   : > { %v2910_v29 = vsel %vm986_vm3, %v2902_v22, %v2904_v13 }
 0x5b4   : > { %v2937_v33 = vpop.permute.xlu1 %2936  ;;  %2845 = vadd.xlane.f32.xlu0 %v2844_v7  ;;  %v2917_v14 = vadd.f32 %v2910_v29, %v2909_v1 }
 0x5b6   : > { %v2873_v50 = vpop.permute.xlu0 %2872 }
 0x5b7   : > { %v2878_v37 = vsel %vm585_vm2, %v2871_v4, %v2873_v50 }
 0x5b8   : > { %v2885_v24 = vadd.f32 %v2884_v55, %v2878_v37  ;;  %v2875_v43 = vpop.permute.xlu1 %2874 }
 0x5b9   : > { %v2879_v58 = vsel %vm585_vm2, %v2873_v50, %v2875_v43 }
 0x5ba   : > { %v2886_v18 = vadd.f32 %v2885_v24, %v2879_v58  ;;  %v2935_v25 = vpop.permute.xlu0 %2934 }
 0x5bb   : > { %v2942_v39 = vsel %vm2707_vm5, %v2933_v8, %v2935_v25  ;;  %v2943_v62 = vsel %vm2707_vm5, %v2935_v25, %v2937_v33 }
 0x5bc   : > { %2887 = vadd.xlane.f32.xlu1 %v2886_v18  ;;  %v2908_v36 = vpop.permute.xlu1 %2907  ;;  %v2950_v52 = vadd.f32 %v2943_v62, %v2942_v39 }
 0x5be   : > { %v2906_v48 = vpop.permute.xlu0 %2905 }
 0x5bf   : > { %v2911_v12 = vsel %vm986_vm3, %v2904_v13, %v2906_v48  ;;  %v2912_v53 = vsel %vm986_vm3, %v2906_v48, %v2908_v36 }
 0x5c0   : > { %v2918_v23 = vadd.f32 %v2917_v14, %v2911_v12 }
 0x5c2   : > { %v2919_v19 = vadd.f32 %v2918_v23, %v2912_v53  ;;  %v2939_v21 = vpop.permute.xlu0 %2938 }
 0x5c3   : > { %v2944_v38 = vsel %vm2707_vm5, %v2937_v33, %v2939_v21 }
 0x5c4   : > { %2920 = vadd.xlane.f32.xlu0 %v2919_v19  ;;  %v2951_v42 = vadd.f32 %v2950_v52, %v2944_v38 }
 0x5c6   : > { %v2941_v20 = vpop.permute.xlu0 %2940 }
 0x5c7   : > { %v2945_v27 = vsel %vm2707_vm5, %v2939_v21, %v2941_v20 }
 0x5c8   : > { %v2952_v59 = vadd.f32 %v2951_v42, %v2945_v27 }
 0x5ca   : > { %2953 = vadd.xlane.f32.xlu1 %v2952_v59 }
 0x5f7   : > { %v2855_v2 = vpop.xlane.xlu0 %2854 }
 0x5f8   : > { %v2985_v34 = vrot.slane %v2855_v2, %v2960_v17 }
 0x60d   : > { %v2748_v15 = vpop.xlane.xlu0 %2747 }
 0x60e   : > { %v2967_v61 = vrot.slane %v2748_v15, %v2960_v17 }
 0x610   : > { %v3006_v4 = vsel %vm3005_vm6, %v2961_v40, %v2967_v61 }
 0x629   : > { %v2797_v35 = vpop.xlane.xlu1 %2796 }
 0x62a   : > { %v2973_v49 = vrot.slane %v2797_v35, %v2960_v17 }
 0x62c   : > { %v3008_v56 = vsel %vm3007_vm7, %v3006_v4, %v2973_v49 }
 0x63d   : > { %v2846_v32 = vpop.xlane.xlu0 %2845 }
 0x63e   : > { %v2979_v41 = vrot.slane %v2846_v32, %v2960_v17 }
 0x640   : > { %v3010_v3 = vsel %vm3009_vm8, %v3008_v56, %v2979_v41 }
 0x641   : > { %v3012_v22 = vsel %vm3011_vm9, %v3010_v3, %v2985_v34 }
 0x645   : > { %v2888_v16 = vpop.xlane.xlu1 %2887 }
 0x646   : > { %v2991_v54 = vrot.slane %v2888_v16, %v2960_v17 }
 0x648   : > { %v3014_v6 = vsel %vm3013_vm10, %v3012_v22, %v2991_v54 }
 0x64d   : > { %v2921_v51 = vpop.xlane.xlu0 %2920 }
 0x64e   : > { %v2997_v60 = vrot.slane %v2921_v51, %v2960_v17 }
 0x650   : > { %v3016_v47 = vsel %vm3015_vm11, %v3014_v6, %v2997_v60 }
 0x653   : > { %v2954_v8 = vpop.xlane.xlu1 %2953 }
 0x654   : > { %v3003_v46 = vrot.slane %v2954_v8, %v2960_v17 }
 0x656   : > { %v3018_v44 = vsel %vm3017_vm12, %v3016_v47, %v3003_v46 }
 0x657   : > { %v3019_v30 = vand.u32 2147483647, %v3018_v44 }
 0x659   : > { %v3020_v57 = vadd.f32 1.0, %v3019_v30 }
 0x65b   : > { %3983 = vlog2.f32 %v3020_v57 }
 0x668   : > { %v3984_v63 = vpop.eup %3983 }
 0x669   : > { %v3022_v28 = vmul.f32 0.6931472, %v3984_v63 }
 0x66b   : > { %3024 = vst.msk [vmem:[%s213_s6] sm:$0xff] %vm3023_vm13, %v3022_v28 }
 0x66c   : > { %4097 = shalt.err (!%p4094_p9)
}
 0x66d   : > { %s4098_s4 = scalar_lea.hbm %s3037_s17, 128  ;;  %s4102_s20 = scalar_lea.hbm %s7277_s3, 384 }
 0x66e   : > { %p4099_p12 = scmp.ne.s32.totalorder %s3037_s17, %s4098_s4  ;;  %p4103_p13 = scmp.lt.s32.totalorder %s3037_s17, %s7277_s3 }
 0x66f   : > { %p4104_p4 = scmp.lt.s32.totalorder %s4102_s20, %s4098_s4 }
 0x670   : > { %p4100_p3 = pnand %p4099_p12, %p8197_p10 }
 0x671   : > { %p4105_p8 = por %p4104_p4, %p4103_p13 }
 0x672   : > { %p4101_p0 = pneg %p4100_p3 }
 0x674   : > { %p4106_p5 = pnand %p4105_p8, %p4101_p0 }
 0x676   : > { %4109 = shalt.err (!%p4106_p5)
}
 0x677   : > { %3275 = dma.vmem_to_hbm [thread:$0]  (%p8197_p10), %s3040_s8, 128, %s3037_s17, %s3026_s22  }
 0x678 PF: > { %p3297_p1 = scmp.ge.s32.totalorder %s4152_s15, 2  ;;  %s3051_s28 = sand.u32 1, %s4140_s12  }
 0x679   : > { %p8198_p2 = scmp.ne.s32.totalorder %s7595_s19, 0  ;;  %s3052_s29 = scalar_lea.sflag [#allocation4], %s3051_s28 }
 0x67b   : > { %p3289_p6 = pnand %p3297_p1, %p8198_p2 }
 0x67d   : > { %p3290_p11 = pneg %p3289_p6 }
 0x67f   : > { %4135 = dma.done.wait (%p3290_p11), %s3052_s29, 128  }
 0x680   : > { %4137 = vsyncadd (%p3290_p11), %s3052_s29, 4294967168  ;;  %p17_p7 = scmp.ge.s32.totalorder %s4259_s7, 5   ;;  %s8199_s12 = smov %s4144_s13 }
 0x681   : > { %s8200_s13 = smov %s4148_s14  ;;  %s8201_s14 = smov %s4275_s11 }
 0x682   : > { %s8202_s15 = smov %s4259_s7  ;;  %19 = sbr.rel (!%p17_p7) target bundleno = 6 (0x6), region = 85 }
 0x687   :  { %3057 = vsyncpa [#allocation3], 1 }
 0x688   :  { %3059 = vsyncpa [#allocation3 + $0x1], 1 }
 0x689   :  { %3060 = vsyncpa [#allocation6], 1 }
 0x68a   :  { %3061 = vsyncpa [#allocation4], 1 }
 0x68b   :  { %3063 = vsyncpa [#allocation4 + $0x1], 1 }

</bundles_post_ra>
